<compile_context>
chip_gen: v5e
topology: v5e:2x2
jax: 0.10.0
libtpu: 0.0.40
codegen_flags: <defaults>
</compile_context>

<pallas_src>
import functools

import jax
import jax.numpy as jnp
from jax.experimental import pallas as pl
from jax.experimental.pallas import tpu as pltpu


# ---------------------------------------------------------------------------
# Pallas kernel: fused multi-source conv (k in {1, 3}) + bias (+ReLU) (+res).
# ---------------------------------------------------------------------------
def _conv_kernel(*refs, n_src, H, W, ksize, relu, with_res):
    """refs = (x_0, ..., x_{n_src-1}, w, b, [res], out)

    x_j : (bn, cin_j, H*W)  f32   feature-map source j (implicit channel concat)
    w   : (cout, K)         bf16  packed weight, K = ksize*ksize*sum(cin_j)
    b   : (cout, 1)         f32
    res : (bn, cout, H*W)   f32   optional fused residual
    out : (bn, cout, H*W)   f32
    """
    x_refs = refs[:n_src]
    w_ref = refs[n_src]
    b_ref = refs[n_src + 1]
    r_ref = refs[n_src + 2] if with_res else None
    o_ref = refs[-1]

    bn = o_ref.shape[0]
    HW = H * W

    w = w_ref[...]                                  # (cout, K) bf16
    b = b_ref[...].astype(jnp.float32)              # (cout, 1)

    if ksize == 3:
        # Column index of each flattened pixel: masks the taps that would read
        # across the left/right image border.  (Top/bottom halo is handled for
        # free by the zero blocks concatenated in taps3x3.)
        lane = jax.lax.broadcasted_iota(jnp.int32, (1, HW), 1)
        col_in_row = lane % W
        mask_l = col_in_row >= 1          # tap reads column c - 1
        mask_r = col_in_row < (W - 1)     # tap reads column c + 1

    def taps3x3(x):
        """x: (cin, H*W) bf16 -> 9 shifted/masked copies, row-major (kh, kw)."""
        cin = x.shape[0]
        zeros = lambda n: jnp.zeros((cin, n), x.dtype)
        out = []
        for dh in (-1, 0, 1):
            for dw in (-1, 0, 1):
                s = dh * W + dw
                if s > 0:
                    y = jnp.concatenate([x[:, s:], zeros(s)], axis=1)
                elif s < 0:
                    y = jnp.concatenate([zeros(-s), x[:, :HW + s]], axis=1)
                else:
                    y = x
                if dw == -1:
                    y = jnp.where(mask_l, y, 0)
                elif dw == 1:
                    y = jnp.where(mask_r, y, 0)
                out.append(y)
        return out

    for i in range(bn):                             # bn is a small static int
        parts = []
        for x_ref in x_refs:
            x = x_ref[i].astype(jnp.bfloat16)       # (cin_j, HW)
            if ksize == 1:
                parts.append(x)
            else:
                parts.extend(taps3x3(x))
        col_mat = parts[0] if len(parts) == 1 else jnp.concatenate(parts, axis=0)
        # One MXU matmul with K = ksize*ksize*sum(cin_j); f32 accumulation.
        acc = jnp.dot(w, col_mat, preferred_element_type=jnp.float32) + b
        if relu:
            acc = jnp.maximum(acc, 0.0)
        if with_res:
            acc = acc + r_ref[i].astype(jnp.float32)
        o_ref[i] = acc.astype(o_ref.dtype)          # lane-dense (cout, H*W) store


# ---------------------------------------------------------------------------
# Wrapper: pick a batch tile and launch the kernel.
# ---------------------------------------------------------------------------
def _batch_tile(n, bytes_per_image, vmem_budget=2 << 20):
    bn = max(1, min(n, vmem_budget // max(1, bytes_per_image)))
    if n > 1:
        bn = min(bn, (n + 1) // 2)   # keep >= 2 parallel grid steps (2-TC chips)
    while n % bn:
        bn -= 1
    return bn


def conv_pallas(wb, xs, relu=False, residual=None):
    """Conv2d(k in {1,3}, pad=k//2) over the implicit channel-concat of xs.

    wb       = (weight (cout, sum_cin, k, k) f32, bias (cout,) f32)
    xs       = list of NCHW f32 feature maps sharing N, H, W
    residual = optional NCHW f32 tensor fused into the epilogue
    """
    w, b = wb
    n, _, hgt, wid = xs[0].shape
    hw = hgt * wid
    cout, cin_total, k, _ = w.shape
    cins = [x.shape[1] for x in xs]
    assert sum(cins) == cin_total

    # Pack weight: per source, (cout, cin_j, k, k) -> (cout, k*k*cin_j) with
    # column order (kh, kw, cin); concat sources along the contraction axis.
    blocks, off = [], 0
    for cj in cins:
        wj = w[:, off:off + cj]
        blocks.append(jnp.transpose(wj, (0, 2, 3, 1)).reshape(cout, k * k * cj))
        off += cj
    w_packed = blocks[0] if len(blocks) == 1 else jnp.concatenate(blocks, axis=1)
    w_packed = w_packed.astype(jnp.bfloat16)        # bf16 operands, f32 accum
    b2 = b.reshape(cout, 1).astype(jnp.float32)

    xs_flat = [x.reshape(n, c, hw) for x, c in zip(xs, cins)]   # free reshapes
    res_flat = None if residual is None else residual.reshape(n, cout, hw)

    bytes_per_image = 4 * hw * (sum(cins) + cout * (2 if residual is not None else 1))
    bn = _batch_tile(n, 2 * bytes_per_image)        # x2: double-buffered blocks
    grid = (n // bn,)

    in_specs = [pl.BlockSpec((bn, c, hw), lambda g: (g, 0, 0)) for c in cins]
    in_specs += [
        pl.BlockSpec(w_packed.shape, lambda g: (0, 0)),
        pl.BlockSpec((cout, 1), lambda g: (0, 0)),
    ]
    args = [*xs_flat, w_packed, b2]
    if res_flat is not None:
        in_specs.append(pl.BlockSpec((bn, cout, hw), lambda g: (g, 0, 0)))
        args.append(res_flat)

    kernel = functools.partial(
        _conv_kernel, n_src=len(xs), H=hgt, W=wid, ksize=k,
        relu=relu, with_res=residual is not None)

    out = pl.pallas_call(
        kernel,
        out_shape=jax.ShapeDtypeStruct((n, cout, hw), jnp.float32),
        grid_spec=pltpu.PrefetchScalarGridSpec(
            num_scalar_prefetch=0,
            grid=grid,
            in_specs=in_specs,
            out_specs=pl.BlockSpec((bn, cout, hw), lambda g: (g, 0, 0)),
        ),
        compiler_params=pltpu.CompilerParams(
            dimension_semantics=("parallel",),
        ),
    )(*args)
    return out.reshape(n, cout, hgt, wid)           # free reshape back to NCHW


# ---------------------------------------------------------------------------
# Pure-JAX reference conv (same bf16-operand / f32-accum numerics).
# ---------------------------------------------------------------------------
def conv_reference(wb, xs, relu=False, residual=None):
    w, b = wb
    x = xs[0] if len(xs) == 1 else jnp.concatenate(xs, axis=1)
    pad = w.shape[2] // 2
    y = jax.lax.conv_general_dilated(
        x.astype(jnp.bfloat16), w.astype(jnp.bfloat16),
        window_strides=(1, 1), padding=((pad, pad), (pad, pad)),
        dimension_numbers=("NCHW", "OIHW", "NCHW"),
        preferred_element_type=jnp.float32,
    ) + b[None, :, None, None]
    if relu:
        y = jnp.maximum(y, 0.0)
    if residual is not None:
        y = y + residual
    return y


# ---------------------------------------------------------------------------
# RDN forward (matches the PyTorch module), parameterized by the conv impl.
# ---------------------------------------------------------------------------
def rdn_forward(params, x, conv):
    sfe1 = conv(params["sfe1"], [x])
    sfe2 = conv(params["sfe2"], [sfe1])
    cur = sfe2
    local_features = []
    for blk in params["rdbs"]:
        srcs = [cur]
        for layer_wb in blk["layers"]:
            y = conv(layer_wb, srcs, relu=True)   # DenseLayer conv + ReLU
            srcs.append(y)                        # channel concat is implicit
        cur = conv(blk["lff"], srcs)              # 1x1 local feature fusion
        local_features.append(cur)
    g = conv(params["gff0"], local_features)      # 1x1 over concat of RDB outs
    g = conv(params["gff1"], [g], residual=sfe1)  # 3x3, fused + sfe1
    return conv(params["out"], [g], residual=x)   # 3x3, fused global residual


def _conv_init(key, cout, cin, k):
    bound = 1.0 / float((cin * k * k) ** 0.5)     # PyTorch Conv2d default init
    kw, kb = jax.random.split(key)
    w = jax.random.uniform(kw, (cout, cin, k, k), jnp.float32, -bound, bound)
    b = jax.random.uniform(kb, (cout,), jnp.float32, -bound, bound)
    return w, b


def init_rdn_params(key, num_channels, num_features, growth_rate, num_blocks,
                    num_layers):
    G0, G, D, C = num_features, growth_rate, num_blocks, num_layers
    keys = iter(jax.random.split(key, 2 + D * (C + 1) + 3))
    params = {
        "sfe1": _conv_init(next(keys), G0, num_channels, 3),
        "sfe2": _conv_init(next(keys), G0, G0, 3),
        "rdbs": [],
    }
    for d in range(D):
        in_ch = G0 if d == 0 else G
        layers = [_conv_init(next(keys), G, in_ch + G * i, 3) for i in range(C)]
        lff = _conv_init(next(keys), G, in_ch + G * C, 1)
        params["rdbs"].append({"layers": layers, "lff": lff})
    params["gff0"] = _conv_init(next(keys), G0, G * D, 1)
    params["gff1"] = _conv_init(next(keys), G0, G0, 3)
    params["out"] = _conv_init(next(keys), num_channels, G0, 3)
    return params


if __name__ == "__main__":
    # Small RDN: num_channels=1, num_features(G0)=16, growth_rate(G)=8,
    # num_blocks(D)=2, num_layers(C)=2; input x: (2, 1, 16, 16).
    N, NUM_CHANNELS, H, W = 2, 1, 16, 16
    G0, G, D, C = 16, 8, 2, 2

    key = jax.random.PRNGKey(0)
    kparams, kx = jax.random.split(key)
    params = init_rdn_params(kparams, NUM_CHANNELS, G0, G, D, C)
    x = jax.random.normal(kx, (N, NUM_CHANNELS, H, W), dtype=jnp.float32)

    pallas_fwd = jax.jit(lambda p, v: rdn_forward(p, v, conv_pallas))
    ref_fwd = jax.jit(lambda p, v: rdn_forward(p, v, conv_reference))

    out = jax.block_until_ready(pallas_fwd(params, x))
    ref = jax.block_until_ready(ref_fwd(params, x))

    assert out.shape == (N, NUM_CHANNELS, H, W), out.shape
    max_err = float(jnp.max(jnp.abs(out - ref)))
    assert jnp.allclose(out, ref, atol=5e-3, rtol=5e-3), f"max abs err = {max_err}"
    print("KERNEL_OK")
</pallas_src>

<mosaic_0001>
module attributes {stable_mosaic.version = 11 : i64} {
  func.func @_conv_kernel(%arg0: i32, %arg1: memref<1x16x256xf32, #tpu.memory_space<vmem>>, %arg2: memref<16x144xbf16, #tpu.memory_space<vmem>>, %arg3: memref<16x1xf32, #tpu.memory_space<vmem>>, %arg4: memref<1x16x256xf32, #tpu.memory_space<vmem>>) attributes {dimension_semantics = [#tpu.dimension_semantics<parallel>], iteration_bounds = array<i64: 2>, scalar_prefetch = 0 : i64, scratch_operands = 0 : i64, tpu.core_type = #tpu.core_type<tc>, window_params = [{transform_indices = @transform_0, window_bounds = array<i64: 1, 16, 256>}, {pipeline_mode = #tpu.pipeline_mode<synchronous>, transform_indices = @transform_1, window_bounds = array<i64: 16, 144>}, {pipeline_mode = #tpu.pipeline_mode<synchronous>, transform_indices = @transform_2, window_bounds = array<i64: 16, 1>}, {transform_indices = @transform_3, window_bounds = array<i64: 1, 16, 256>}]} {
    %c0 = arith.constant 0 : index
    %c0_0 = arith.constant 0 : index
    %0 = vector.load %arg2[%c0, %c0_0] : memref<16x144xbf16, #tpu.memory_space<vmem>>, vector<16x144xbf16>
    %c0_1 = arith.constant 0 : index
    %c0_2 = arith.constant 0 : index
    %1 = vector.load %arg3[%c0_1, %c0_2] : memref<16x1xf32, #tpu.memory_space<vmem>>, vector<16x1xf32>
    %2 = tpu.iota {dimensions = array<i32: 1>} : vector<1x256xi32>
    %c16_i32 = arith.constant 16 : i32
    %c0_i32 = arith.constant 0 : i32
    %3 = arith.cmpi eq, %c16_i32, %c0_i32 : i32
    %c1_i32 = arith.constant 1 : i32
    %4 = arith.select %3, %c1_i32, %c16_i32 : i32
    %5 = vector.broadcast %4 : i32 to vector<1x256xi32>
    %6 = arith.remsi %2, %5 : vector<1x256xi32>
    %c0_i32_3 = arith.constant 0 : i32
    %7 = vector.broadcast %c0_i32_3 : i32 to vector<1x256xi32>
    %8 = arith.cmpi ne, %6, %7 : vector<1x256xi32>
    %c0_i32_4 = arith.constant 0 : i32
    %9 = vector.broadcast %c0_i32_4 : i32 to vector<1x256xi32>
    %10 = arith.cmpi slt, %6, %9 : vector<1x256xi32>
    %c0_i32_5 = arith.constant 0 : i32
    %11 = arith.cmpi slt, %4, %c0_i32_5 : i32
    %12 = vector.broadcast %11 : i1 to vector<1x256xi1>
    %13 = vector.broadcast %12 : vector<1x256xi1> to vector<1x256xi1>
    %14 = arith.xori %10, %13 : vector<1x256xi1>
    %15 = arith.andi %14, %8 : vector<1x256xi1>
    %16 = vector.broadcast %4 : i32 to vector<1x256xi32>
    %17 = arith.addi %6, %16 : vector<1x256xi32>
    %18 = arith.select %15, %17, %6 : vector<1x256xi1>, vector<1x256xi32>
    %c1_i32_6 = arith.constant 1 : i32
    %19 = vector.broadcast %c1_i32_6 : i32 to vector<1x256xi32>
    %20 = arith.cmpi sge, %18, %19 : vector<1x256xi32>
    %c15_i32 = arith.constant 15 : i32
    %21 = vector.broadcast %c15_i32 : i32 to vector<1x256xi32>
    %22 = arith.cmpi slt, %18, %21 : vector<1x256xi32>
    %c0_7 = arith.constant 0 : index
    %c0_8 = arith.constant 0 : index
    %c0_9 = arith.constant 0 : index
    %23 = vector.load %arg1[%c0_7, %c0_8, %c0_9] : memref<1x16x256xf32, #tpu.memory_space<vmem>>, vector<1x16x256xf32>
    %24 = vector.shape_cast %23 : vector<1x16x256xf32> to vector<16x256xf32>
    %25 = arith.truncf %24 : vector<16x256xf32> to vector<16x256xbf16>
    %cst = arith.constant 0.000000e+00 : bf16
    %26 = vector.broadcast %cst : bf16 to vector<16x17xbf16>
    %27 = vector.extract_strided_slice %25 {offsets = [0, 0], sizes = [16, 239], strides = [1, 1]} : vector<16x256xbf16> to vector<16x239xbf16>
    %28 = tpu.concatenate %26, %27 in 1 : vector<16x17xbf16>, vector<16x239xbf16> -> vector<16x256xbf16>
    %c0_i32_10 = arith.constant 0 : i32
    %29 = arith.sitofp %c0_i32_10 : i32 to bf16
    %30 = vector.shape_cast %20 : vector<1x256xi1> to vector<1x256xi1>
    %31 = vector.broadcast %30 : vector<1x256xi1> to vector<16x256xi1>
    %32 = vector.broadcast %29 : bf16 to vector<16x256xbf16>
    %33 = arith.select %31, %28, %32 : vector<16x256xi1>, vector<16x256xbf16>
    %cst_11 = arith.constant 0.000000e+00 : bf16
    %34 = vector.broadcast %cst_11 : bf16 to vector<16x16xbf16>
    %35 = vector.extract_strided_slice %25 {offsets = [0, 0], sizes = [16, 240], strides = [1, 1]} : vector<16x256xbf16> to vector<16x240xbf16>
    %36 = tpu.concatenate %34, %35 in 1 : vector<16x16xbf16>, vector<16x240xbf16> -> vector<16x256xbf16>
    %cst_12 = arith.constant 0.000000e+00 : bf16
    %37 = vector.broadcast %cst_12 : bf16 to vector<16x15xbf16>
    %38 = vector.extract_strided_slice %25 {offsets = [0, 0], sizes = [16, 241], strides = [1, 1]} : vector<16x256xbf16> to vector<16x241xbf16>
    %39 = tpu.concatenate %37, %38 in 1 : vector<16x15xbf16>, vector<16x241xbf16> -> vector<16x256xbf16>
    %c0_i32_13 = arith.constant 0 : i32
    %40 = arith.sitofp %c0_i32_13 : i32 to bf16
    %41 = vector.shape_cast %22 : vector<1x256xi1> to vector<1x256xi1>
    %42 = vector.broadcast %41 : vector<1x256xi1> to vector<16x256xi1>
    %43 = vector.broadcast %40 : bf16 to vector<16x256xbf16>
    %44 = arith.select %42, %39, %43 : vector<16x256xi1>, vector<16x256xbf16>
    %cst_14 = arith.constant 0.000000e+00 : bf16
    %45 = vector.broadcast %cst_14 : bf16 to vector<16x1xbf16>
    %46 = vector.extract_strided_slice %25 {offsets = [0, 0], sizes = [16, 255], strides = [1, 1]} : vector<16x256xbf16> to vector<16x255xbf16>
    %47 = tpu.concatenate %45, %46 in 1 : vector<16x1xbf16>, vector<16x255xbf16> -> vector<16x256xbf16>
    %c0_i32_15 = arith.constant 0 : i32
    %48 = arith.sitofp %c0_i32_15 : i32 to bf16
    %49 = vector.shape_cast %20 : vector<1x256xi1> to vector<1x256xi1>
    %50 = vector.broadcast %49 : vector<1x256xi1> to vector<16x256xi1>
    %51 = vector.broadcast %48 : bf16 to vector<16x256xbf16>
    %52 = arith.select %50, %47, %51 : vector<16x256xi1>, vector<16x256xbf16>
    %53 = vector.extract_strided_slice %25 {offsets = [0, 1], sizes = [16, 255], strides = [1, 1]} : vector<16x256xbf16> to vector<16x255xbf16>
    %cst_16 = arith.constant 0.000000e+00 : bf16
    %54 = vector.broadcast %cst_16 : bf16 to vector<16x1xbf16>
    %55 = tpu.concatenate %53, %54 in 1 : vector<16x255xbf16>, vector<16x1xbf16> -> vector<16x256xbf16>
    %c0_i32_17 = arith.constant 0 : i32
    %56 = arith.sitofp %c0_i32_17 : i32 to bf16
    %57 = vector.shape_cast %22 : vector<1x256xi1> to vector<1x256xi1>
    %58 = vector.broadcast %57 : vector<1x256xi1> to vector<16x256xi1>
    %59 = vector.broadcast %56 : bf16 to vector<16x256xbf16>
    %60 = arith.select %58, %55, %59 : vector<16x256xi1>, vector<16x256xbf16>
    %61 = vector.extract_strided_slice %25 {offsets = [0, 15], sizes = [16, 241], strides = [1, 1]} : vector<16x256xbf16> to vector<16x241xbf16>
    %cst_18 = arith.constant 0.000000e+00 : bf16
    %62 = vector.broadcast %cst_18 : bf16 to vector<16x15xbf16>
    %63 = tpu.concatenate %61, %62 in 1 : vector<16x241xbf16>, vector<16x15xbf16> -> vector<16x256xbf16>
    %c0_i32_19 = arith.constant 0 : i32
    %64 = arith.sitofp %c0_i32_19 : i32 to bf16
    %65 = vector.shape_cast %20 : vector<1x256xi1> to vector<1x256xi1>
    %66 = vector.broadcast %65 : vector<1x256xi1> to vector<16x256xi1>
    %67 = vector.broadcast %64 : bf16 to vector<16x256xbf16>
    %68 = arith.select %66, %63, %67 : vector<16x256xi1>, vector<16x256xbf16>
    %69 = vector.extract_strided_slice %25 {offsets = [0, 16], sizes = [16, 240], strides = [1, 1]} : vector<16x256xbf16> to vector<16x240xbf16>
    %cst_20 = arith.constant 0.000000e+00 : bf16
    %70 = vector.broadcast %cst_20 : bf16 to vector<16x16xbf16>
    %71 = tpu.concatenate %69, %70 in 1 : vector<16x240xbf16>, vector<16x16xbf16> -> vector<16x256xbf16>
    %72 = vector.extract_strided_slice %25 {offsets = [0, 17], sizes = [16, 239], strides = [1, 1]} : vector<16x256xbf16> to vector<16x239xbf16>
    %cst_21 = arith.constant 0.000000e+00 : bf16
    %73 = vector.broadcast %cst_21 : bf16 to vector<16x17xbf16>
    %74 = tpu.concatenate %72, %73 in 1 : vector<16x239xbf16>, vector<16x17xbf16> -> vector<16x256xbf16>
    %c0_i32_22 = arith.constant 0 : i32
    %75 = arith.sitofp %c0_i32_22 : i32 to bf16
    %76 = vector.shape_cast %22 : vector<1x256xi1> to vector<1x256xi1>
    %77 = vector.broadcast %76 : vector<1x256xi1> to vector<16x256xi1>
    %78 = vector.broadcast %75 : bf16 to vector<16x256xbf16>
    %79 = arith.select %77, %74, %78 : vector<16x256xi1>, vector<16x256xbf16>
    %80 = tpu.concatenate %33, %36, %44, %52, %25, %60, %68, %71, %79 in 0 : vector<16x256xbf16>, vector<16x256xbf16>, vector<16x256xbf16>, vector<16x256xbf16>, vector<16x256xbf16>, vector<16x256xbf16>, vector<16x256xbf16>, vector<16x256xbf16>, vector<16x256xbf16> -> vector<144x256xbf16>
    %cst_23 = arith.constant dense<0.000000e+00> : vector<16x256xf32>
    %81 = tpu.matmul %0, %80, %cst_23 {dimension_numbers = #tpu.dot_dimension_numbers<[1], [0], [0], [1], [0, 0, 1, 1], [], []>} : vector<16x144xbf16>, vector<144x256xbf16>, vector<16x256xf32> -> vector<16x256xf32>
    %82 = vector.broadcast %1 : vector<16x1xf32> to vector<16x256xf32>
    %83 = arith.addf %81, %82 : vector<16x256xf32>
    %c0_24 = arith.constant 0 : index
    %c0_25 = arith.constant 0 : index
    %c0_26 = arith.constant 0 : index
    %84 = vector.load %arg4[%c0_24, %c0_25, %c0_26] : memref<1x16x256xf32, #tpu.memory_space<vmem>>, vector<1x16x256xf32>
    %85 = vector.shape_cast %84 : vector<1x16x256xf32> to vector<16x256xf32>
    %86 = vector.shape_cast %83 : vector<16x256xf32> to vector<1x16x256xf32>
    tpu.vector_store %arg4[%c0_24, %c0_25, %c0_26], %86 {strides = array<i32>} : memref<1x16x256xf32, #tpu.memory_space<vmem>>, vector<1x16x256xf32>,
    return
  }
  func.func @transform_0(%arg0: i32) -> (i32, i32, i32) {
    %c0_i32 = arith.constant 0 : i32
    %c0_i32_0 = arith.constant 0 : i32
    %c0_i32_1 = arith.constant 0 : i32
    return %arg0, %c0_i32, %c0_i32_0 : i32, i32, i32
  }
  func.func @transform_1(%arg0: i32) -> (i32, i32) {
    %c0_i32 = arith.constant 0 : i32
    %c0_i32_0 = arith.constant 0 : i32
    %c0_i32_1 = arith.constant 0 : i32
    return %c0_i32, %c0_i32_0 : i32, i32
  }
  func.func @transform_2(%arg0: i32) -> (i32, i32) {
    %c0_i32 = arith.constant 0 : i32
    %c0_i32_0 = arith.constant 0 : i32
    %c0_i32_1 = arith.constant 0 : i32
    return %c0_i32, %c0_i32_0 : i32, i32
  }
  func.func @transform_3(%arg0: i32) -> (i32, i32, i32) {
    %c0_i32 = arith.constant 0 : i32
    %c0_i32_0 = arith.constant 0 : i32
    %c0_i32_1 = arith.constant 0 : i32
    return %arg0, %c0_i32, %c0_i32_0 : i32, i32, i32
  }
}

module attributes {stable_mosaic.version = 11 : i64} {
  func.func @_conv_kernel(%arg0: i32, %arg1: memref<1x1x256xf32, #tpu.memory_space<vmem>>, %arg2: memref<16x9xbf16, #tpu.memory_space<vmem>>, %arg3: memref<16x1xf32, #tpu.memory_space<vmem>>, %arg4: memref<1x16x256xf32, #tpu.memory_space<vmem>>) attributes {dimension_semantics = [#tpu.dimension_semantics<parallel>], iteration_bounds = array<i64: 2>, scalar_prefetch = 0 : i64, scratch_operands = 0 : i64, tpu.core_type = #tpu.core_type<tc>, window_params = [{transform_indices = @transform_0, window_bounds = array<i64: 1, 1, 256>}, {pipeline_mode = #tpu.pipeline_mode<synchronous>, transform_indices = @transform_1, window_bounds = array<i64: 16, 9>}, {pipeline_mode = #tpu.pipeline_mode<synchronous>, transform_indices = @transform_2, window_bounds = array<i64: 16, 1>}, {transform_indices = @transform_3, window_bounds = array<i64: 1, 16, 256>}]} {
    %c0 = arith.constant 0 : index
    %c0_0 = arith.constant 0 : index
    %0 = vector.load %arg2[%c0, %c0_0] : memref<16x9xbf16, #tpu.memory_space<vmem>>, vector<16x9xbf16>
    %c0_1 = arith.constant 0 : index
    %c0_2 = arith.constant 0 : index
    %1 = vector.load %arg3[%c0_1, %c0_2] : memref<16x1xf32, #tpu.memory_space<vmem>>, vector<16x1xf32>
    %2 = tpu.iota {dimensions = array<i32: 1>} : vector<1x256xi32>
    %c16_i32 = arith.constant 16 : i32
    %c0_i32 = arith.constant 0 : i32
    %3 = arith.cmpi eq, %c16_i32, %c0_i32 : i32
    %c1_i32 = arith.constant 1 : i32
    %4 = arith.select %3, %c1_i32, %c16_i32 : i32
    %5 = vector.broadcast %4 : i32 to vector<1x256xi32>
    %6 = arith.remsi %2, %5 : vector<1x256xi32>
    %c0_i32_3 = arith.constant 0 : i32
    %7 = vector.broadcast %c0_i32_3 : i32 to vector<1x256xi32>
    %8 = arith.cmpi ne, %6, %7 : vector<1x256xi32>
    %c0_i32_4 = arith.constant 0 : i32
    %9 = vector.broadcast %c0_i32_4 : i32 to vector<1x256xi32>
    %10 = arith.cmpi slt, %6, %9 : vector<1x256xi32>
    %c0_i32_5 = arith.constant 0 : i32
    %11 = arith.cmpi slt, %4, %c0_i32_5 : i32
    %12 = vector.broadcast %11 : i1 to vector<1x256xi1>
    %13 = vector.broadcast %12 : vector<1x256xi1> to vector<1x256xi1>
    %14 = arith.xori %10, %13 : vector<1x256xi1>
    %15 = arith.andi %14, %8 : vector<1x256xi1>
    %16 = vector.broadcast %4 : i32 to vector<1x256xi32>
    %17 = arith.addi %6, %16 : vector<1x256xi32>
    %18 = arith.select %15, %17, %6 : vector<1x256xi1>, vector<1x256xi32>
    %c1_i32_6 = arith.constant 1 : i32
    %19 = vector.broadcast %c1_i32_6 : i32 to vector<1x256xi32>
    %20 = arith.cmpi sge, %18, %19 : vector<1x256xi32>
    %c15_i32 = arith.constant 15 : i32
    %21 = vector.broadcast %c15_i32 : i32 to vector<1x256xi32>
    %22 = arith.cmpi slt, %18, %21 : vector<1x256xi32>
    %c0_7 = arith.constant 0 : index
    %c0_8 = arith.constant 0 : index
    %c0_9 = arith.constant 0 : index
    %23 = vector.load %arg1[%c0_7, %c0_8, %c0_9] : memref<1x1x256xf32, #tpu.memory_space<vmem>>, vector<1x1x256xf32>
    %24 = vector.shape_cast %23 : vector<1x1x256xf32> to vector<1x256xf32>
    %25 = arith.truncf %24 : vector<1x256xf32> to vector<1x256xbf16>
    %cst = arith.constant 0.000000e+00 : bf16
    %26 = vector.broadcast %cst : bf16 to vector<1x17xbf16>
    %27 = vector.extract_strided_slice %25 {offsets = [0, 0], sizes = [1, 239], strides = [1, 1]} : vector<1x256xbf16> to vector<1x239xbf16>
    %28 = tpu.concatenate %26, %27 in 1 : vector<1x17xbf16>, vector<1x239xbf16> -> vector<1x256xbf16>
    %c0_i32_10 = arith.constant 0 : i32
    %29 = arith.sitofp %c0_i32_10 : i32 to bf16
    %30 = vector.broadcast %29 : bf16 to vector<1x256xbf16>
    %31 = arith.select %20, %28, %30 : vector<1x256xi1>, vector<1x256xbf16>
    %cst_11 = arith.constant 0.000000e+00 : bf16
    %32 = vector.broadcast %cst_11 : bf16 to vector<1x16xbf16>
    %33 = vector.extract_strided_slice %25 {offsets = [0, 0], sizes = [1, 240], strides = [1, 1]} : vector<1x256xbf16> to vector<1x240xbf16>
    %34 = tpu.concatenate %32, %33 in 1 : vector<1x16xbf16>, vector<1x240xbf16> -> vector<1x256xbf16>
    %cst_12 = arith.constant 0.000000e+00 : bf16
    %35 = vector.broadcast %cst_12 : bf16 to vector<1x15xbf16>
    %36 = vector.extract_strided_slice %25 {offsets = [0, 0], sizes = [1, 241], strides = [1, 1]} : vector<1x256xbf16> to vector<1x241xbf16>
    %37 = tpu.concatenate %35, %36 in 1 : vector<1x15xbf16>, vector<1x241xbf16> -> vector<1x256xbf16>
    %c0_i32_13 = arith.constant 0 : i32
    %38 = arith.sitofp %c0_i32_13 : i32 to bf16
    %39 = vector.broadcast %38 : bf16 to vector<1x256xbf16>
    %40 = arith.select %22, %37, %39 : vector<1x256xi1>, vector<1x256xbf16>
    %cst_14 = arith.constant 0.000000e+00 : bf16
    %41 = vector.broadcast %cst_14 : bf16 to vector<1x1xbf16>
    %42 = vector.extract_strided_slice %25 {offsets = [0, 0], sizes = [1, 255], strides = [1, 1]} : vector<1x256xbf16> to vector<1x255xbf16>
    %43 = tpu.concatenate %41, %42 in 1 : vector<1x1xbf16>, vector<1x255xbf16> -> vector<1x256xbf16>
    %c0_i32_15 = arith.constant 0 : i32
    %44 = arith.sitofp %c0_i32_15 : i32 to bf16
    %45 = vector.broadcast %44 : bf16 to vector<1x256xbf16>
    %46 = arith.select %20, %43, %45 : vector<1x256xi1>, vector<1x256xbf16>
    %47 = vector.extract_strided_slice %25 {offsets = [0, 1], sizes = [1, 255], strides = [1, 1]} : vector<1x256xbf16> to vector<1x255xbf16>
    %cst_16 = arith.constant 0.000000e+00 : bf16
    %48 = vector.broadcast %cst_16 : bf16 to vector<1x1xbf16>
    %49 = tpu.concatenate %47, %48 in 1 : vector<1x255xbf16>, vector<1x1xbf16> -> vector<1x256xbf16>
    %c0_i32_17 = arith.constant 0 : i32
    %50 = arith.sitofp %c0_i32_17 : i32 to bf16
    %51 = vector.broadcast %50 : bf16 to vector<1x256xbf16>
    %52 = arith.select %22, %49, %51 : vector<1x256xi1>, vector<1x256xbf16>
    %53 = vector.extract_strided_slice %25 {offsets = [0, 15], sizes = [1, 241], strides = [1, 1]} : vector<1x256xbf16> to vector<1x241xbf16>
    %cst_18 = arith.constant 0.000000e+00 : bf16
    %54 = vector.broadcast %cst_18 : bf16 to vector<1x15xbf16>
    %55 = tpu.concatenate %53, %54 in 1 : vector<1x241xbf16>, vector<1x15xbf16> -> vector<1x256xbf16>
    %c0_i32_19 = arith.constant 0 : i32
    %56 = arith.sitofp %c0_i32_19 : i32 to bf16
    %57 = vector.broadcast %56 : bf16 to vector<1x256xbf16>
    %58 = arith.select %20, %55, %57 : vector<1x256xi1>, vector<1x256xbf16>
    %59 = vector.extract_strided_slice %25 {offsets = [0, 16], sizes = [1, 240], strides = [1, 1]} : vector<1x256xbf16> to vector<1x240xbf16>
    %cst_20 = arith.constant 0.000000e+00 : bf16
    %60 = vector.broadcast %cst_20 : bf16 to vector<1x16xbf16>
    %61 = tpu.concatenate %59, %60 in 1 : vector<1x240xbf16>, vector<1x16xbf16> -> vector<1x256xbf16>
    %62 = vector.extract_strided_slice %25 {offsets = [0, 17], sizes = [1, 239], strides = [1, 1]} : vector<1x256xbf16> to vector<1x239xbf16>
    %cst_21 = arith.constant 0.000000e+00 : bf16
    %63 = vector.broadcast %cst_21 : bf16 to vector<1x17xbf16>
    %64 = tpu.concatenate %62, %63 in 1 : vector<1x239xbf16>, vector<1x17xbf16> -> vector<1x256xbf16>
    %c0_i32_22 = arith.constant 0 : i32
    %65 = arith.sitofp %c0_i32_22 : i32 to bf16
    %66 = vector.broadcast %65 : bf16 to vector<1x256xbf16>
    %67 = arith.select %22, %64, %66 : vector<1x256xi1>, vector<1x256xbf16>
    %68 = tpu.concatenate %31, %34, %40, %46, %25, %52, %58, %61, %67 in 0 : vector<1x256xbf16>, vector<1x256xbf16>, vector<1x256xbf16>, vector<1x256xbf16>, vector<1x256xbf16>, vector<1x256xbf16>, vector<1x256xbf16>, vector<1x256xbf16>, vector<1x256xbf16> -> vector<9x256xbf16>
    %cst_23 = arith.constant dense<0.000000e+00> : vector<16x256xf32>
    %69 = tpu.matmul %0, %68, %cst_23 {dimension_numbers = #tpu.dot_dimension_numbers<[1], [0], [0], [1], [0, 0, 1, 1], [], []>} : vector<16x9xbf16>, vector<9x256xbf16>, vector<16x256xf32> -> vector<16x256xf32>
    %70 = vector.broadcast %1 : vector<16x1xf32> to vector<16x256xf32>
    %71 = arith.addf %69, %70 : vector<16x256xf32>
    %c0_24 = arith.constant 0 : index
    %c0_25 = arith.constant 0 : index
    %c0_26 = arith.constant 0 : index
    %72 = vector.load %arg4[%c0_24, %c0_25, %c0_26] : memref<1x16x256xf32, #tpu.memory_space<vmem>>, vector<1x16x256xf32>
    %73 = vector.shape_cast %72 : vector<1x16x256xf32> to vector<16x256xf32>
    %74 = vector.shape_cast %71 : vector<16x256xf32> to vector<1x16x256xf32>
    tpu.vector_store %arg4[%c0_24, %c0_25, %c0_26], %74 {strides = array<i32>} : memref<1x16x256xf32, #tpu.memory_space<vmem>>, vector<1x16x256xf32>,
    return
  }
  func.func @transform_0(%arg0: i32) -> (i32, i32, i32) {
    %c0_i32 = arith.constant 0 : i32
    %c0_i32_0 = arith.constant 0 : i32
    %c0_i32_1 = arith.constant 0 : i32
    return %arg0, %c0_i32, %c0_i32_0 : i32, i32, i32
  }
  func.func @transform_1(%arg0: i32) -> (i32, i32) {
    %c0_i32 = arith.constant 0 : i32
    %c0_i32_0 = arith.constant 0 : i32
    %c0_i32_1 = arith.constant 0 : i32
    return %c0_i32, %c0_i32_0 : i32, i32
  }
  func.func @transform_2(%arg0: i32) -> (i32, i32) {
    %c0_i32 = arith.constant 0 : i32
    %c0_i32_0 = arith.constant 0 : i32
    %c0_i32_1 = arith.constant 0 : i32
    return %c0_i32, %c0_i32_0 : i32, i32
  }
  func.func @transform_3(%arg0: i32) -> (i32, i32, i32) {
    %c0_i32 = arith.constant 0 : i32
    %c0_i32_0 = arith.constant 0 : i32
    %c0_i32_1 = arith.constant 0 : i32
    return %arg0, %c0_i32, %c0_i32_0 : i32, i32, i32
  }
}

module attributes {stable_mosaic.version = 11 : i64} {
  func.func @_conv_kernel(%arg0: i32, %arg1: memref<1x16x256xf32, #tpu.memory_space<vmem>>, %arg2: memref<8x144xbf16, #tpu.memory_space<vmem>>, %arg3: memref<8x1xf32, #tpu.memory_space<vmem>>, %arg4: memref<1x8x256xf32, #tpu.memory_space<vmem>>) attributes {dimension_semantics = [#tpu.dimension_semantics<parallel>], iteration_bounds = array<i64: 2>, scalar_prefetch = 0 : i64, scratch_operands = 0 : i64, tpu.core_type = #tpu.core_type<tc>, window_params = [{transform_indices = @transform_0, window_bounds = array<i64: 1, 16, 256>}, {pipeline_mode = #tpu.pipeline_mode<synchronous>, transform_indices = @transform_1, window_bounds = array<i64: 8, 144>}, {pipeline_mode = #tpu.pipeline_mode<synchronous>, transform_indices = @transform_2, window_bounds = array<i64: 8, 1>}, {transform_indices = @transform_3, window_bounds = array<i64: 1, 8, 256>}]} {
    %c0 = arith.constant 0 : index
    %c0_0 = arith.constant 0 : index
    %0 = vector.load %arg2[%c0, %c0_0] : memref<8x144xbf16, #tpu.memory_space<vmem>>, vector<8x144xbf16>
    %c0_1 = arith.constant 0 : index
    %c0_2 = arith.constant 0 : index
    %1 = vector.load %arg3[%c0_1, %c0_2] : memref<8x1xf32, #tpu.memory_space<vmem>>, vector<8x1xf32>
    %2 = tpu.iota {dimensions = array<i32: 1>} : vector<1x256xi32>
    %c16_i32 = arith.constant 16 : i32
    %c0_i32 = arith.constant 0 : i32
    %3 = arith.cmpi eq, %c16_i32, %c0_i32 : i32
    %c1_i32 = arith.constant 1 : i32
    %4 = arith.select %3, %c1_i32, %c16_i32 : i32
    %5 = vector.broadcast %4 : i32 to vector<1x256xi32>
    %6 = arith.remsi %2, %5 : vector<1x256xi32>
    %c0_i32_3 = arith.constant 0 : i32
    %7 = vector.broadcast %c0_i32_3 : i32 to vector<1x256xi32>
    %8 = arith.cmpi ne, %6, %7 : vector<1x256xi32>
    %c0_i32_4 = arith.constant 0 : i32
    %9 = vector.broadcast %c0_i32_4 : i32 to vector<1x256xi32>
    %10 = arith.cmpi slt, %6, %9 : vector<1x256xi32>
    %c0_i32_5 = arith.constant 0 : i32
    %11 = arith.cmpi slt, %4, %c0_i32_5 : i32
    %12 = vector.broadcast %11 : i1 to vector<1x256xi1>
    %13 = vector.broadcast %12 : vector<1x256xi1> to vector<1x256xi1>
    %14 = arith.xori %10, %13 : vector<1x256xi1>
    %15 = arith.andi %14, %8 : vector<1x256xi1>
    %16 = vector.broadcast %4 : i32 to vector<1x256xi32>
    %17 = arith.addi %6, %16 : vector<1x256xi32>
    %18 = arith.select %15, %17, %6 : vector<1x256xi1>, vector<1x256xi32>
    %c1_i32_6 = arith.constant 1 : i32
    %19 = vector.broadcast %c1_i32_6 : i32 to vector<1x256xi32>
    %20 = arith.cmpi sge, %18, %19 : vector<1x256xi32>
    %c15_i32 = arith.constant 15 : i32
    %21 = vector.broadcast %c15_i32 : i32 to vector<1x256xi32>
    %22 = arith.cmpi slt, %18, %21 : vector<1x256xi32>
    %c0_7 = arith.constant 0 : index
    %c0_8 = arith.constant 0 : index
    %c0_9 = arith.constant 0 : index
    %23 = vector.load %arg1[%c0_7, %c0_8, %c0_9] : memref<1x16x256xf32, #tpu.memory_space<vmem>>, vector<1x16x256xf32>
    %24 = vector.shape_cast %23 : vector<1x16x256xf32> to vector<16x256xf32>
    %25 = arith.truncf %24 : vector<16x256xf32> to vector<16x256xbf16>
    %cst = arith.constant 0.000000e+00 : bf16
    %26 = vector.broadcast %cst : bf16 to vector<16x17xbf16>
    %27 = vector.extract_strided_slice %25 {offsets = [0, 0], sizes = [16, 239], strides = [1, 1]} : vector<16x256xbf16> to vector<16x239xbf16>
    %28 = tpu.concatenate %26, %27 in 1 : vector<16x17xbf16>, vector<16x239xbf16> -> vector<16x256xbf16>
    %c0_i32_10 = arith.constant 0 : i32
    %29 = arith.sitofp %c0_i32_10 : i32 to bf16
    %30 = vector.shape_cast %20 : vector<1x256xi1> to vector<1x256xi1>
    %31 = vector.broadcast %30 : vector<1x256xi1> to vector<16x256xi1>
    %32 = vector.broadcast %29 : bf16 to vector<16x256xbf16>
    %33 = arith.select %31, %28, %32 : vector<16x256xi1>, vector<16x256xbf16>
    %cst_11 = arith.constant 0.000000e+00 : bf16
    %34 = vector.broadcast %cst_11 : bf16 to vector<16x16xbf16>
    %35 = vector.extract_strided_slice %25 {offsets = [0, 0], sizes = [16, 240], strides = [1, 1]} : vector<16x256xbf16> to vector<16x240xbf16>
    %36 = tpu.concatenate %34, %35 in 1 : vector<16x16xbf16>, vector<16x240xbf16> -> vector<16x256xbf16>
    %cst_12 = arith.constant 0.000000e+00 : bf16
    %37 = vector.broadcast %cst_12 : bf16 to vector<16x15xbf16>
    %38 = vector.extract_strided_slice %25 {offsets = [0, 0], sizes = [16, 241], strides = [1, 1]} : vector<16x256xbf16> to vector<16x241xbf16>
    %39 = tpu.concatenate %37, %38 in 1 : vector<16x15xbf16>, vector<16x241xbf16> -> vector<16x256xbf16>
    %c0_i32_13 = arith.constant 0 : i32
    %40 = arith.sitofp %c0_i32_13 : i32 to bf16
    %41 = vector.shape_cast %22 : vector<1x256xi1> to vector<1x256xi1>
    %42 = vector.broadcast %41 : vector<1x256xi1> to vector<16x256xi1>
    %43 = vector.broadcast %40 : bf16 to vector<16x256xbf16>
    %44 = arith.select %42, %39, %43 : vector<16x256xi1>, vector<16x256xbf16>
    %cst_14 = arith.constant 0.000000e+00 : bf16
    %45 = vector.broadcast %cst_14 : bf16 to vector<16x1xbf16>
    %46 = vector.extract_strided_slice %25 {offsets = [0, 0], sizes = [16, 255], strides = [1, 1]} : vector<16x256xbf16> to vector<16x255xbf16>
    %47 = tpu.concatenate %45, %46 in 1 : vector<16x1xbf16>, vector<16x255xbf16> -> vector<16x256xbf16>
    %c0_i32_15 = arith.constant 0 : i32
    %48 = arith.sitofp %c0_i32_15 : i32 to bf16
    %49 = vector.shape_cast %20 : vector<1x256xi1> to vector<1x256xi1>
    %50 = vector.broadcast %49 : vector<1x256xi1> to vector<16x256xi1>
    %51 = vector.broadcast %48 : bf16 to vector<16x256xbf16>
    %52 = arith.select %50, %47, %51 : vector<16x256xi1>, vector<16x256xbf16>
    %53 = vector.extract_strided_slice %25 {offsets = [0, 1], sizes = [16, 255], strides = [1, 1]} : vector<16x256xbf16> to vector<16x255xbf16>
    %cst_16 = arith.constant 0.000000e+00 : bf16
    %54 = vector.broadcast %cst_16 : bf16 to vector<16x1xbf16>
    %55 = tpu.concatenate %53, %54 in 1 : vector<16x255xbf16>, vector<16x1xbf16> -> vector<16x256xbf16>
    %c0_i32_17 = arith.constant 0 : i32
    %56 = arith.sitofp %c0_i32_17 : i32 to bf16
    %57 = vector.shape_cast %22 : vector<1x256xi1> to vector<1x256xi1>
    %58 = vector.broadcast %57 : vector<1x256xi1> to vector<16x256xi1>
    %59 = vector.broadcast %56 : bf16 to vector<16x256xbf16>
    %60 = arith.select %58, %55, %59 : vector<16x256xi1>, vector<16x256xbf16>
    %61 = vector.extract_strided_slice %25 {offsets = [0, 15], sizes = [16, 241], strides = [1, 1]} : vector<16x256xbf16> to vector<16x241xbf16>
    %cst_18 = arith.constant 0.000000e+00 : bf16
    %62 = vector.broadcast %cst_18 : bf16 to vector<16x15xbf16>
    %63 = tpu.concatenate %61, %62 in 1 : vector<16x241xbf16>, vector<16x15xbf16> -> vector<16x256xbf16>
    %c0_i32_19 = arith.constant 0 : i32
    %64 = arith.sitofp %c0_i32_19 : i32 to bf16
    %65 = vector.shape_cast %20 : vector<1x256xi1> to vector<1x256xi1>
    %66 = vector.broadcast %65 : vector<1x256xi1> to vector<16x256xi1>
    %67 = vector.broadcast %64 : bf16 to vector<16x256xbf16>
    %68 = arith.select %66, %63, %67 : vector<16x256xi1>, vector<16x256xbf16>
    %69 = vector.extract_strided_slice %25 {offsets = [0, 16], sizes = [16, 240], strides = [1, 1]} : vector<16x256xbf16> to vector<16x240xbf16>
    %cst_20 = arith.constant 0.000000e+00 : bf16
    %70 = vector.broadcast %cst_20 : bf16 to vector<16x16xbf16>
    %71 = tpu.concatenate %69, %70 in 1 : vector<16x240xbf16>, vector<16x16xbf16> -> vector<16x256xbf16>
    %72 = vector.extract_strided_slice %25 {offsets = [0, 17], sizes = [16, 239], strides = [1, 1]} : vector<16x256xbf16> to vector<16x239xbf16>
    %cst_21 = arith.constant 0.000000e+00 : bf16
    %73 = vector.broadcast %cst_21 : bf16 to vector<16x17xbf16>
    %74 = tpu.concatenate %72, %73 in 1 : vector<16x239xbf16>, vector<16x17xbf16> -> vector<16x256xbf16>
    %c0_i32_22 = arith.constant 0 : i32
    %75 = arith.sitofp %c0_i32_22 : i32 to bf16
    %76 = vector.shape_cast %22 : vector<1x256xi1> to vector<1x256xi1>
    %77 = vector.broadcast %76 : vector<1x256xi1> to vector<16x256xi1>
    %78 = vector.broadcast %75 : bf16 to vector<16x256xbf16>
    %79 = arith.select %77, %74, %78 : vector<16x256xi1>, vector<16x256xbf16>
    %80 = tpu.concatenate %33, %36, %44, %52, %25, %60, %68, %71, %79 in 0 : vector<16x256xbf16>, vector<16x256xbf16>, vector<16x256xbf16>, vector<16x256xbf16>, vector<16x256xbf16>, vector<16x256xbf16>, vector<16x256xbf16>, vector<16x256xbf16>, vector<16x256xbf16> -> vector<144x256xbf16>
    %cst_23 = arith.constant dense<0.000000e+00> : vector<8x256xf32>
    %81 = tpu.matmul %0, %80, %cst_23 {dimension_numbers = #tpu.dot_dimension_numbers<[1], [0], [0], [1], [0, 0, 1, 1], [], []>} : vector<8x144xbf16>, vector<144x256xbf16>, vector<8x256xf32> -> vector<8x256xf32>
    %82 = vector.broadcast %1 : vector<8x1xf32> to vector<8x256xf32>
    %83 = arith.addf %81, %82 : vector<8x256xf32>
    %cst_24 = arith.constant 0.000000e+00 : f32
    %84 = vector.broadcast %cst_24 : f32 to vector<8x256xf32>
    %85 = arith.maximumf %83, %84 : vector<8x256xf32>
    %c0_25 = arith.constant 0 : index
    %c0_26 = arith.constant 0 : index
    %c0_27 = arith.constant 0 : index
    %86 = vector.load %arg4[%c0_25, %c0_26, %c0_27] : memref<1x8x256xf32, #tpu.memory_space<vmem>>, vector<1x8x256xf32>
    %87 = vector.shape_cast %86 : vector<1x8x256xf32> to vector<8x256xf32>
    %88 = vector.shape_cast %85 : vector<8x256xf32> to vector<1x8x256xf32>
    tpu.vector_store %arg4[%c0_25, %c0_26, %c0_27], %88 {strides = array<i32>} : memref<1x8x256xf32, #tpu.memory_space<vmem>>, vector<1x8x256xf32>,
    return
  }
  func.func @transform_0(%arg0: i32) -> (i32, i32, i32) {
    %c0_i32 = arith.constant 0 : i32
    %c0_i32_0 = arith.constant 0 : i32
    %c0_i32_1 = arith.constant 0 : i32
    return %arg0, %c0_i32, %c0_i32_0 : i32, i32, i32
  }
  func.func @transform_1(%arg0: i32) -> (i32, i32) {
    %c0_i32 = arith.constant 0 : i32
    %c0_i32_0 = arith.constant 0 : i32
    %c0_i32_1 = arith.constant 0 : i32
    return %c0_i32, %c0_i32_0 : i32, i32
  }
  func.func @transform_2(%arg0: i32) -> (i32, i32) {
    %c0_i32 = arith.constant 0 : i32
    %c0_i32_0 = arith.constant 0 : i32
    %c0_i32_1 = arith.constant 0 : i32
    return %c0_i32, %c0_i32_0 : i32, i32
  }
  func.func @transform_3(%arg0: i32) -> (i32, i32, i32) {
    %c0_i32 = arith.constant 0 : i32
    %c0_i32_0 = arith.constant 0 : i32
    %c0_i32_1 = arith.constant 0 : i32
    return %arg0, %c0_i32, %c0_i32_0 : i32, i32, i32
  }
}

module attributes {stable_mosaic.version = 11 : i64} {
  func.func @_conv_kernel(%arg0: i32, %arg1: memref<1x16x256xf32, #tpu.memory_space<vmem>>, %arg2: memref<1x8x256xf32, #tpu.memory_space<vmem>>, %arg3: memref<8x216xbf16, #tpu.memory_space<vmem>>, %arg4: memref<8x1xf32, #tpu.memory_space<vmem>>, %arg5: memref<1x8x256xf32, #tpu.memory_space<vmem>>) attributes {dimension_semantics = [#tpu.dimension_semantics<parallel>], iteration_bounds = array<i64: 2>, scalar_prefetch = 0 : i64, scratch_operands = 0 : i64, tpu.core_type = #tpu.core_type<tc>, window_params = [{transform_indices = @transform_0, window_bounds = array<i64: 1, 16, 256>}, {transform_indices = @transform_1, window_bounds = array<i64: 1, 8, 256>}, {pipeline_mode = #tpu.pipeline_mode<synchronous>, transform_indices = @transform_2, window_bounds = array<i64: 8, 216>}, {pipeline_mode = #tpu.pipeline_mode<synchronous>, transform_indices = @transform_3, window_bounds = array<i64: 8, 1>}, {transform_indices = @transform_4, window_bounds = array<i64: 1, 8, 256>}]} {
    %c0 = arith.constant 0 : index
    %c0_0 = arith.constant 0 : index
    %0 = vector.load %arg3[%c0, %c0_0] : memref<8x216xbf16, #tpu.memory_space<vmem>>, vector<8x216xbf16>
    %c0_1 = arith.constant 0 : index
    %c0_2 = arith.constant 0 : index
    %1 = vector.load %arg4[%c0_1, %c0_2] : memref<8x1xf32, #tpu.memory_space<vmem>>, vector<8x1xf32>
    %2 = tpu.iota {dimensions = array<i32: 1>} : vector<1x256xi32>
    %c16_i32 = arith.constant 16 : i32
    %c0_i32 = arith.constant 0 : i32
    %3 = arith.cmpi eq, %c16_i32, %c0_i32 : i32
    %c1_i32 = arith.constant 1 : i32
    %4 = arith.select %3, %c1_i32, %c16_i32 : i32
    %5 = vector.broadcast %4 : i32 to vector<1x256xi32>
    %6 = arith.remsi %2, %5 : vector<1x256xi32>
    %c0_i32_3 = arith.constant 0 : i32
    %7 = vector.broadcast %c0_i32_3 : i32 to vector<1x256xi32>
    %8 = arith.cmpi ne, %6, %7 : vector<1x256xi32>
    %c0_i32_4 = arith.constant 0 : i32
    %9 = vector.broadcast %c0_i32_4 : i32 to vector<1x256xi32>
    %10 = arith.cmpi slt, %6, %9 : vector<1x256xi32>
    %c0_i32_5 = arith.constant 0 : i32
    %11 = arith.cmpi slt, %4, %c0_i32_5 : i32
    %12 = vector.broadcast %11 : i1 to vector<1x256xi1>
    %13 = vector.broadcast %12 : vector<1x256xi1> to vector<1x256xi1>
    %14 = arith.xori %10, %13 : vector<1x256xi1>
    %15 = arith.andi %14, %8 : vector<1x256xi1>
    %16 = vector.broadcast %4 : i32 to vector<1x256xi32>
    %17 = arith.addi %6, %16 : vector<1x256xi32>
    %18 = arith.select %15, %17, %6 : vector<1x256xi1>, vector<1x256xi32>
    %c1_i32_6 = arith.constant 1 : i32
    %19 = vector.broadcast %c1_i32_6 : i32 to vector<1x256xi32>
    %20 = arith.cmpi sge, %18, %19 : vector<1x256xi32>
    %c15_i32 = arith.constant 15 : i32
    %21 = vector.broadcast %c15_i32 : i32 to vector<1x256xi32>
    %22 = arith.cmpi slt, %18, %21 : vector<1x256xi32>
    %c0_7 = arith.constant 0 : index
    %c0_8 = arith.constant 0 : index
    %c0_9 = arith.constant 0 : index
    %23 = vector.load %arg1[%c0_7, %c0_8, %c0_9] : memref<1x16x256xf32, #tpu.memory_space<vmem>>, vector<1x16x256xf32>
    %24 = vector.shape_cast %23 : vector<1x16x256xf32> to vector<16x256xf32>
    %25 = arith.truncf %24 : vector<16x256xf32> to vector<16x256xbf16>
    %cst = arith.constant 0.000000e+00 : bf16
    %26 = vector.broadcast %cst : bf16 to vector<16x17xbf16>
    %27 = vector.extract_strided_slice %25 {offsets = [0, 0], sizes = [16, 239], strides = [1, 1]} : vector<16x256xbf16> to vector<16x239xbf16>
    %28 = tpu.concatenate %26, %27 in 1 : vector<16x17xbf16>, vector<16x239xbf16> -> vector<16x256xbf16>
    %c0_i32_10 = arith.constant 0 : i32
    %29 = arith.sitofp %c0_i32_10 : i32 to bf16
    %30 = vector.shape_cast %20 : vector<1x256xi1> to vector<1x256xi1>
    %31 = vector.broadcast %30 : vector<1x256xi1> to vector<16x256xi1>
    %32 = vector.broadcast %29 : bf16 to vector<16x256xbf16>
    %33 = arith.select %31, %28, %32 : vector<16x256xi1>, vector<16x256xbf16>
    %cst_11 = arith.constant 0.000000e+00 : bf16
    %34 = vector.broadcast %cst_11 : bf16 to vector<16x16xbf16>
    %35 = vector.extract_strided_slice %25 {offsets = [0, 0], sizes = [16, 240], strides = [1, 1]} : vector<16x256xbf16> to vector<16x240xbf16>
    %36 = tpu.concatenate %34, %35 in 1 : vector<16x16xbf16>, vector<16x240xbf16> -> vector<16x256xbf16>
    %cst_12 = arith.constant 0.000000e+00 : bf16
    %37 = vector.broadcast %cst_12 : bf16 to vector<16x15xbf16>
    %38 = vector.extract_strided_slice %25 {offsets = [0, 0], sizes = [16, 241], strides = [1, 1]} : vector<16x256xbf16> to vector<16x241xbf16>
    %39 = tpu.concatenate %37, %38 in 1 : vector<16x15xbf16>, vector<16x241xbf16> -> vector<16x256xbf16>
    %c0_i32_13 = arith.constant 0 : i32
    %40 = arith.sitofp %c0_i32_13 : i32 to bf16
    %41 = vector.shape_cast %22 : vector<1x256xi1> to vector<1x256xi1>
    %42 = vector.broadcast %41 : vector<1x256xi1> to vector<16x256xi1>
    %43 = vector.broadcast %40 : bf16 to vector<16x256xbf16>
    %44 = arith.select %42, %39, %43 : vector<16x256xi1>, vector<16x256xbf16>
    %cst_14 = arith.constant 0.000000e+00 : bf16
    %45 = vector.broadcast %cst_14 : bf16 to vector<16x1xbf16>
    %46 = vector.extract_strided_slice %25 {offsets = [0, 0], sizes = [16, 255], strides = [1, 1]} : vector<16x256xbf16> to vector<16x255xbf16>
    %47 = tpu.concatenate %45, %46 in 1 : vector<16x1xbf16>, vector<16x255xbf16> -> vector<16x256xbf16>
    %c0_i32_15 = arith.constant 0 : i32
    %48 = arith.sitofp %c0_i32_15 : i32 to bf16
    %49 = vector.shape_cast %20 : vector<1x256xi1> to vector<1x256xi1>
    %50 = vector.broadcast %49 : vector<1x256xi1> to vector<16x256xi1>
    %51 = vector.broadcast %48 : bf16 to vector<16x256xbf16>
    %52 = arith.select %50, %47, %51 : vector<16x256xi1>, vector<16x256xbf16>
    %53 = vector.extract_strided_slice %25 {offsets = [0, 1], sizes = [16, 255], strides = [1, 1]} : vector<16x256xbf16> to vector<16x255xbf16>
    %cst_16 = arith.constant 0.000000e+00 : bf16
    %54 = vector.broadcast %cst_16 : bf16 to vector<16x1xbf16>
    %55 = tpu.concatenate %53, %54 in 1 : vector<16x255xbf16>, vector<16x1xbf16> -> vector<16x256xbf16>
    %c0_i32_17 = arith.constant 0 : i32
    %56 = arith.sitofp %c0_i32_17 : i32 to bf16
    %57 = vector.shape_cast %22 : vector<1x256xi1> to vector<1x256xi1>
    %58 = vector.broadcast %57 : vector<1x256xi1> to vector<16x256xi1>
    %59 = vector.broadcast %56 : bf16 to vector<16x256xbf16>
    %60 = arith.select %58, %55, %59 : vector<16x256xi1>, vector<16x256xbf16>
    %61 = vector.extract_strided_slice %25 {offsets = [0, 15], sizes = [16, 241], strides = [1, 1]} : vector<16x256xbf16> to vector<16x241xbf16>
    %cst_18 = arith.constant 0.000000e+00 : bf16
    %62 = vector.broadcast %cst_18 : bf16 to vector<16x15xbf16>
    %63 = tpu.concatenate %61, %62 in 1 : vector<16x241xbf16>, vector<16x15xbf16> -> vector<16x256xbf16>
    %c0_i32_19 = arith.constant 0 : i32
    %64 = arith.sitofp %c0_i32_19 : i32 to bf16
    %65 = vector.shape_cast %20 : vector<1x256xi1> to vector<1x256xi1>
    %66 = vector.broadcast %65 : vector<1x256xi1> to vector<16x256xi1>
    %67 = vector.broadcast %64 : bf16 to vector<16x256xbf16>
    %68 = arith.select %66, %63, %67 : vector<16x256xi1>, vector<16x256xbf16>
    %69 = vector.extract_strided_slice %25 {offsets = [0, 16], sizes = [16, 240], strides = [1, 1]} : vector<16x256xbf16> to vector<16x240xbf16>
    %cst_20 = arith.constant 0.000000e+00 : bf16
    %70 = vector.broadcast %cst_20 : bf16 to vector<16x16xbf16>
    %71 = tpu.concatenate %69, %70 in 1 : vector<16x240xbf16>, vector<16x16xbf16> -> vector<16x256xbf16>
    %72 = vector.extract_strided_slice %25 {offsets = [0, 17], sizes = [16, 239], strides = [1, 1]} : vector<16x256xbf16> to vector<16x239xbf16>
    %cst_21 = arith.constant 0.000000e+00 : bf16
    %73 = vector.broadcast %cst_21 : bf16 to vector<16x17xbf16>
    %74 = tpu.concatenate %72, %73 in 1 : vector<16x239xbf16>, vector<16x17xbf16> -> vector<16x256xbf16>
    %c0_i32_22 = arith.constant 0 : i32
    %75 = arith.sitofp %c0_i32_22 : i32 to bf16
    %76 = vector.shape_cast %22 : vector<1x256xi1> to vector<1x256xi1>
    %77 = vector.broadcast %76 : vector<1x256xi1> to vector<16x256xi1>
    %78 = vector.broadcast %75 : bf16 to vector<16x256xbf16>
    %79 = arith.select %77, %74, %78 : vector<16x256xi1>, vector<16x256xbf16>
    %c0_23 = arith.constant 0 : index
    %c0_24 = arith.constant 0 : index
    %c0_25 = arith.constant 0 : index
    %80 = vector.load %arg2[%c0_23, %c0_24, %c0_25] : memref<1x8x256xf32, #tpu.memory_space<vmem>>, vector<1x8x256xf32>
    %81 = vector.shape_cast %80 : vector<1x8x256xf32> to vector<8x256xf32>
    %82 = arith.truncf %81 : vector<8x256xf32> to vector<8x256xbf16>
    %cst_26 = arith.constant 0.000000e+00 : bf16
    %83 = vector.broadcast %cst_26 : bf16 to vector<8x17xbf16>
    %84 = vector.extract_strided_slice %82 {offsets = [0, 0], sizes = [8, 239], strides = [1, 1]} : vector<8x256xbf16> to vector<8x239xbf16>
    %85 = tpu.concatenate %83, %84 in 1 : vector<8x17xbf16>, vector<8x239xbf16> -> vector<8x256xbf16>
    %c0_i32_27 = arith.constant 0 : i32
    %86 = arith.sitofp %c0_i32_27 : i32 to bf16
    %87 = vector.shape_cast %20 : vector<1x256xi1> to vector<1x256xi1>
    %88 = vector.broadcast %87 : vector<1x256xi1> to vector<8x256xi1>
    %89 = vector.broadcast %86 : bf16 to vector<8x256xbf16>
    %90 = arith.select %88, %85, %89 : vector<8x256xi1>, vector<8x256xbf16>
    %cst_28 = arith.constant 0.000000e+00 : bf16
    %91 = vector.broadcast %cst_28 : bf16 to vector<8x16xbf16>
    %92 = vector.extract_strided_slice %82 {offsets = [0, 0], sizes = [8, 240], strides = [1, 1]} : vector<8x256xbf16> to vector<8x240xbf16>
    %93 = tpu.concatenate %91, %92 in 1 : vector<8x16xbf16>, vector<8x240xbf16> -> vector<8x256xbf16>
    %cst_29 = arith.constant 0.000000e+00 : bf16
    %94 = vector.broadcast %cst_29 : bf16 to vector<8x15xbf16>
    %95 = vector.extract_strided_slice %82 {offsets = [0, 0], sizes = [8, 241], strides = [1, 1]} : vector<8x256xbf16> to vector<8x241xbf16>
    %96 = tpu.concatenate %94, %95 in 1 : vector<8x15xbf16>, vector<8x241xbf16> -> vector<8x256xbf16>
    %c0_i32_30 = arith.constant 0 : i32
    %97 = arith.sitofp %c0_i32_30 : i32 to bf16
    %98 = vector.shape_cast %22 : vector<1x256xi1> to vector<1x256xi1>
    %99 = vector.broadcast %98 : vector<1x256xi1> to vector<8x256xi1>
    %100 = vector.broadcast %97 : bf16 to vector<8x256xbf16>
    %101 = arith.select %99, %96, %100 : vector<8x256xi1>, vector<8x256xbf16>
    %cst_31 = arith.constant 0.000000e+00 : bf16
    %102 = vector.broadcast %cst_31 : bf16 to vector<8x1xbf16>
    %103 = vector.extract_strided_slice %82 {offsets = [0, 0], sizes = [8, 255], strides = [1, 1]} : vector<8x256xbf16> to vector<8x255xbf16>
    %104 = tpu.concatenate %102, %103 in 1 : vector<8x1xbf16>, vector<8x255xbf16> -> vector<8x256xbf16>
    %c0_i32_32 = arith.constant 0 : i32
    %105 = arith.sitofp %c0_i32_32 : i32 to bf16
    %106 = vector.shape_cast %20 : vector<1x256xi1> to vector<1x256xi1>
    %107 = vector.broadcast %106 : vector<1x256xi1> to vector<8x256xi1>
    %108 = vector.broadcast %105 : bf16 to vector<8x256xbf16>
    %109 = arith.select %107, %104, %108 : vector<8x256xi1>, vector<8x256xbf16>
    %110 = vector.extract_strided_slice %82 {offsets = [0, 1], sizes = [8, 255], strides = [1, 1]} : vector<8x256xbf16> to vector<8x255xbf16>
    %cst_33 = arith.constant 0.000000e+00 : bf16
    %111 = vector.broadcast %cst_33 : bf16 to vector<8x1xbf16>
    %112 = tpu.concatenate %110, %111 in 1 : vector<8x255xbf16>, vector<8x1xbf16> -> vector<8x256xbf16>
    %c0_i32_34 = arith.constant 0 : i32
    %113 = arith.sitofp %c0_i32_34 : i32 to bf16
    %114 = vector.shape_cast %22 : vector<1x256xi1> to vector<1x256xi1>
    %115 = vector.broadcast %114 : vector<1x256xi1> to vector<8x256xi1>
    %116 = vector.broadcast %113 : bf16 to vector<8x256xbf16>
    %117 = arith.select %115, %112, %116 : vector<8x256xi1>, vector<8x256xbf16>
    %118 = vector.extract_strided_slice %82 {offsets = [0, 15], sizes = [8, 241], strides = [1, 1]} : vector<8x256xbf16> to vector<8x241xbf16>
    %cst_35 = arith.constant 0.000000e+00 : bf16
    %119 = vector.broadcast %cst_35 : bf16 to vector<8x15xbf16>
    %120 = tpu.concatenate %118, %119 in 1 : vector<8x241xbf16>, vector<8x15xbf16> -> vector<8x256xbf16>
    %c0_i32_36 = arith.constant 0 : i32
    %121 = arith.sitofp %c0_i32_36 : i32 to bf16
    %122 = vector.shape_cast %20 : vector<1x256xi1> to vector<1x256xi1>
    %123 = vector.broadcast %122 : vector<1x256xi1> to vector<8x256xi1>
    %124 = vector.broadcast %121 : bf16 to vector<8x256xbf16>
    %125 = arith.select %123, %120, %124 : vector<8x256xi1>, vector<8x256xbf16>
    %126 = vector.extract_strided_slice %82 {offsets = [0, 16], sizes = [8, 240], strides = [1, 1]} : vector<8x256xbf16> to vector<8x240xbf16>
    %cst_37 = arith.constant 0.000000e+00 : bf16
    %127 = vector.broadcast %cst_37 : bf16 to vector<8x16xbf16>
    %128 = tpu.concatenate %126, %127 in 1 : vector<8x240xbf16>, vector<8x16xbf16> -> vector<8x256xbf16>
    %129 = vector.extract_strided_slice %82 {offsets = [0, 17], sizes = [8, 239], strides = [1, 1]} : vector<8x256xbf16> to vector<8x239xbf16>
    %cst_38 = arith.constant 0.000000e+00 : bf16
    %130 = vector.broadcast %cst_38 : bf16 to vector<8x17xbf16>
    %131 = tpu.concatenate %129, %130 in 1 : vector<8x239xbf16>, vector<8x17xbf16> -> vector<8x256xbf16>
    %c0_i32_39 = arith.constant 0 : i32
    %132 = arith.sitofp %c0_i32_39 : i32 to bf16
    %133 = vector.shape_cast %22 : vector<1x256xi1> to vector<1x256xi1>
    %134 = vector.broadcast %133 : vector<1x256xi1> to vector<8x256xi1>
    %135 = vector.broadcast %132 : bf16 to vector<8x256xbf16>
    %136 = arith.select %134, %131, %135 : vector<8x256xi1>, vector<8x256xbf16>
    %137 = tpu.concatenate %33, %36, %44, %52, %25, %60, %68, %71, %79, %90, %93, %101, %109, %82, %117, %125 in 0 : vector<16x256xbf16>, vector<16x256xbf16>, vector<16x256xbf16>, vector<16x256xbf16>, vector<16x256xbf16>, vector<16x256xbf16>, vector<16x256xbf16>, vector<16x256xbf16>, vector<16x256xbf16>, vector<8x256xbf16>, vector<8x256xbf16>, vector<8x256xbf16>, vector<8x256xbf16>, vector<8x256xbf16>, vector<8x256xbf16>, vector<8x256xbf16> -> vector<200x256xbf16>
    %138 = tpu.concatenate %128, %136 in 0 : vector<8x256xbf16>, vector<8x256xbf16> -> vector<16x256xbf16>
    %139 = tpu.concatenate %137, %138 in 0 : vector<200x256xbf16>, vector<16x256xbf16> -> vector<216x256xbf16>
    %cst_40 = arith.constant dense<0.000000e+00> : vector<8x256xf32>
    %140 = tpu.matmul %0, %139, %cst_40 {dimension_numbers = #tpu.dot_dimension_numbers<[1], [0], [0], [1], [0, 0, 1, 1], [], []>} : vector<8x216xbf16>, vector<216x256xbf16>, vector<8x256xf32> -> vector<8x256xf32>
    %141 = vector.broadcast %1 : vector<8x1xf32> to vector<8x256xf32>
    %142 = arith.addf %140, %141 : vector<8x256xf32>
    %cst_41 = arith.constant 0.000000e+00 : f32
    %143 = vector.broadcast %cst_41 : f32 to vector<8x256xf32>
    %144 = arith.maximumf %142, %143 : vector<8x256xf32>
    %c0_42 = arith.constant 0 : index
    %c0_43 = arith.constant 0 : index
    %c0_44 = arith.constant 0 : index
    %145 = vector.load %arg5[%c0_42, %c0_43, %c0_44] : memref<1x8x256xf32, #tpu.memory_space<vmem>>, vector<1x8x256xf32>
    %146 = vector.shape_cast %145 : vector<1x8x256xf32> to vector<8x256xf32>
    %147 = vector.shape_cast %144 : vector<8x256xf32> to vector<1x8x256xf32>
    tpu.vector_store %arg5[%c0_42, %c0_43, %c0_44], %147 {strides = array<i32>} : memref<1x8x256xf32, #tpu.memory_space<vmem>>, vector<1x8x256xf32>,
    return
  }
  func.func @transform_0(%arg0: i32) -> (i32, i32, i32) {
    %c0_i32 = arith.constant 0 : i32
    %c0_i32_0 = arith.constant 0 : i32
    %c0_i32_1 = arith.constant 0 : i32
    return %arg0, %c0_i32, %c0_i32_0 : i32, i32, i32
  }
  func.func @transform_1(%arg0: i32) -> (i32, i32, i32) {
    %c0_i32 = arith.constant 0 : i32
    %c0_i32_0 = arith.constant 0 : i32
    %c0_i32_1 = arith.constant 0 : i32
    return %arg0, %c0_i32, %c0_i32_0 : i32, i32, i32
  }
  func.func @transform_2(%arg0: i32) -> (i32, i32) {
    %c0_i32 = arith.constant 0 : i32
    %c0_i32_0 = arith.constant 0 : i32
    %c0_i32_1 = arith.constant 0 : i32
    return %c0_i32, %c0_i32_0 : i32, i32
  }
  func.func @transform_3(%arg0: i32) -> (i32, i32) {
    %c0_i32 = arith.constant 0 : i32
    %c0_i32_0 = arith.constant 0 : i32
    %c0_i32_1 = arith.constant 0 : i32
    return %c0_i32, %c0_i32_0 : i32, i32
  }
  func.func @transform_4(%arg0: i32) -> (i32, i32, i32) {
    %c0_i32 = arith.constant 0 : i32
    %c0_i32_0 = arith.constant 0 : i32
    %c0_i32_1 = arith.constant 0 : i32
    return %arg0, %c0_i32, %c0_i32_0 : i32, i32, i32
  }
}

module attributes {stable_mosaic.version = 11 : i64} {
  func.func @_conv_kernel(%arg0: i32, %arg1: memref<1x16x256xf32, #tpu.memory_space<vmem>>, %arg2: memref<1x8x256xf32, #tpu.memory_space<vmem>>, %arg3: memref<1x8x256xf32, #tpu.memory_space<vmem>>, %arg4: memref<8x32xbf16, #tpu.memory_space<vmem>>, %arg5: memref<8x1xf32, #tpu.memory_space<vmem>>, %arg6: memref<1x8x256xf32, #tpu.memory_space<vmem>>) attributes {dimension_semantics = [#tpu.dimension_semantics<parallel>], iteration_bounds = array<i64: 2>, scalar_prefetch = 0 : i64, scratch_operands = 0 : i64, tpu.core_type = #tpu.core_type<tc>, window_params = [{transform_indices = @transform_0, window_bounds = array<i64: 1, 16, 256>}, {transform_indices = @transform_1, window_bounds = array<i64: 1, 8, 256>}, {transform_indices = @transform_2, window_bounds = array<i64: 1, 8, 256>}, {pipeline_mode = #tpu.pipeline_mode<synchronous>, transform_indices = @transform_3, window_bounds = array<i64: 8, 32>}, {pipeline_mode = #tpu.pipeline_mode<synchronous>, transform_indices = @transform_4, window_bounds = array<i64: 8, 1>}, {transform_indices = @transform_5, window_bounds = array<i64: 1, 8, 256>}]} {
    %c0 = arith.constant 0 : index
    %c0_0 = arith.constant 0 : index
    %0 = vector.load %arg4[%c0, %c0_0] : memref<8x32xbf16, #tpu.memory_space<vmem>>, vector<8x32xbf16>
    %c0_1 = arith.constant 0 : index
    %c0_2 = arith.constant 0 : index
    %1 = vector.load %arg5[%c0_1, %c0_2] : memref<8x1xf32, #tpu.memory_space<vmem>>, vector<8x1xf32>
    %c0_3 = arith.constant 0 : index
    %c0_4 = arith.constant 0 : index
    %c0_5 = arith.constant 0 : index
    %2 = vector.load %arg1[%c0_3, %c0_4, %c0_5] : memref<1x16x256xf32, #tpu.memory_space<vmem>>, vector<1x16x256xf32>
    %3 = vector.shape_cast %2 : vector<1x16x256xf32> to vector<16x256xf32>
    %4 = arith.truncf %3 : vector<16x256xf32> to vector<16x256xbf16>
    %c0_6 = arith.constant 0 : index
    %c0_7 = arith.constant 0 : index
    %c0_8 = arith.constant 0 : index
    %5 = vector.load %arg2[%c0_6, %c0_7, %c0_8] : memref<1x8x256xf32, #tpu.memory_space<vmem>>, vector<1x8x256xf32>
    %6 = vector.shape_cast %5 : vector<1x8x256xf32> to vector<8x256xf32>
    %7 = arith.truncf %6 : vector<8x256xf32> to vector<8x256xbf16>
    %c0_9 = arith.constant 0 : index
    %c0_10 = arith.constant 0 : index
    %c0_11 = arith.constant 0 : index
    %8 = vector.load %arg3[%c0_9, %c0_10, %c0_11] : memref<1x8x256xf32, #tpu.memory_space<vmem>>, vector<1x8x256xf32>
    %9 = vector.shape_cast %8 : vector<1x8x256xf32> to vector<8x256xf32>
    %10 = arith.truncf %9 : vector<8x256xf32> to vector<8x256xbf16>
    %11 = tpu.concatenate %4, %7, %10 in 0 : vector<16x256xbf16>, vector<8x256xbf16>, vector<8x256xbf16> -> vector<32x256xbf16>
    %cst = arith.constant dense<0.000000e+00> : vector<8x256xf32>
    %12 = tpu.matmul %0, %11, %cst {dimension_numbers = #tpu.dot_dimension_numbers<[1], [0], [0], [1], [0, 0, 1, 1], [], []>} : vector<8x32xbf16>, vector<32x256xbf16>, vector<8x256xf32> -> vector<8x256xf32>
    %13 = vector.broadcast %1 : vector<8x1xf32> to vector<8x256xf32>
    %14 = arith.addf %12, %13 : vector<8x256xf32>
    %c0_12 = arith.constant 0 : index
    %c0_13 = arith.constant 0 : index
    %c0_14 = arith.constant 0 : index
    %15 = vector.load %arg6[%c0_12, %c0_13, %c0_14] : memref<1x8x256xf32, #tpu.memory_space<vmem>>, vector<1x8x256xf32>
    %16 = vector.shape_cast %15 : vector<1x8x256xf32> to vector<8x256xf32>
    %17 = vector.shape_cast %14 : vector<8x256xf32> to vector<1x8x256xf32>
    tpu.vector_store %arg6[%c0_12, %c0_13, %c0_14], %17 {strides = array<i32>} : memref<1x8x256xf32, #tpu.memory_space<vmem>>, vector<1x8x256xf32>,
    return
  }
  func.func @transform_0(%arg0: i32) -> (i32, i32, i32) {
    %c0_i32 = arith.constant 0 : i32
    %c0_i32_0 = arith.constant 0 : i32
    %c0_i32_1 = arith.constant 0 : i32
    return %arg0, %c0_i32, %c0_i32_0 : i32, i32, i32
  }
  func.func @transform_1(%arg0: i32) -> (i32, i32, i32) {
    %c0_i32 = arith.constant 0 : i32
    %c0_i32_0 = arith.constant 0 : i32
    %c0_i32_1 = arith.constant 0 : i32
    return %arg0, %c0_i32, %c0_i32_0 : i32, i32, i32
  }
  func.func @transform_2(%arg0: i32) -> (i32, i32, i32) {
    %c0_i32 = arith.constant 0 : i32
    %c0_i32_0 = arith.constant 0 : i32
    %c0_i32_1 = arith.constant 0 : i32
    return %arg0, %c0_i32, %c0_i32_0 : i32, i32, i32
  }
  func.func @transform_3(%arg0: i32) -> (i32, i32) {
    %c0_i32 = arith.constant 0 : i32
    %c0_i32_0 = arith.constant 0 : i32
    %c0_i32_1 = arith.constant 0 : i32
    return %c0_i32, %c0_i32_0 : i32, i32
  }
  func.func @transform_4(%arg0: i32) -> (i32, i32) {
    %c0_i32 = arith.constant 0 : i32
    %c0_i32_0 = arith.constant 0 : i32
    %c0_i32_1 = arith.constant 0 : i32
    return %c0_i32, %c0_i32_0 : i32, i32
  }
  func.func @transform_5(%arg0: i32) -> (i32, i32, i32) {
    %c0_i32 = arith.constant 0 : i32
    %c0_i32_0 = arith.constant 0 : i32
    %c0_i32_1 = arith.constant 0 : i32
    return %arg0, %c0_i32, %c0_i32_0 : i32, i32, i32
  }
}

module attributes {stable_mosaic.version = 11 : i64} {
  func.func @_conv_kernel(%arg0: i32, %arg1: memref<1x8x256xf32, #tpu.memory_space<vmem>>, %arg2: memref<8x72xbf16, #tpu.memory_space<vmem>>, %arg3: memref<8x1xf32, #tpu.memory_space<vmem>>, %arg4: memref<1x8x256xf32, #tpu.memory_space<vmem>>) attributes {dimension_semantics = [#tpu.dimension_semantics<parallel>], iteration_bounds = array<i64: 2>, scalar_prefetch = 0 : i64, scratch_operands = 0 : i64, tpu.core_type = #tpu.core_type<tc>, window_params = [{transform_indices = @transform_0, window_bounds = array<i64: 1, 8, 256>}, {pipeline_mode = #tpu.pipeline_mode<synchronous>, transform_indices = @transform_1, window_bounds = array<i64: 8, 72>}, {pipeline_mode = #tpu.pipeline_mode<synchronous>, transform_indices = @transform_2, window_bounds = array<i64: 8, 1>}, {transform_indices = @transform_3, window_bounds = array<i64: 1, 8, 256>}]} {
    %c0 = arith.constant 0 : index
    %c0_0 = arith.constant 0 : index
    %0 = vector.load %arg2[%c0, %c0_0] : memref<8x72xbf16, #tpu.memory_space<vmem>>, vector<8x72xbf16>
    %c0_1 = arith.constant 0 : index
    %c0_2 = arith.constant 0 : index
    %1 = vector.load %arg3[%c0_1, %c0_2] : memref<8x1xf32, #tpu.memory_space<vmem>>, vector<8x1xf32>
    %2 = tpu.iota {dimensions = array<i32: 1>} : vector<1x256xi32>
    %c16_i32 = arith.constant 16 : i32
    %c0_i32 = arith.constant 0 : i32
    %3 = arith.cmpi eq, %c16_i32, %c0_i32 : i32
    %c1_i32 = arith.constant 1 : i32
    %4 = arith.select %3, %c1_i32, %c16_i32 : i32
    %5 = vector.broadcast %4 : i32 to vector<1x256xi32>
    %6 = arith.remsi %2, %5 : vector<1x256xi32>
    %c0_i32_3 = arith.constant 0 : i32
    %7 = vector.broadcast %c0_i32_3 : i32 to vector<1x256xi32>
    %8 = arith.cmpi ne, %6, %7 : vector<1x256xi32>
    %c0_i32_4 = arith.constant 0 : i32
    %9 = vector.broadcast %c0_i32_4 : i32 to vector<1x256xi32>
    %10 = arith.cmpi slt, %6, %9 : vector<1x256xi32>
    %c0_i32_5 = arith.constant 0 : i32
    %11 = arith.cmpi slt, %4, %c0_i32_5 : i32
    %12 = vector.broadcast %11 : i1 to vector<1x256xi1>
    %13 = vector.broadcast %12 : vector<1x256xi1> to vector<1x256xi1>
    %14 = arith.xori %10, %13 : vector<1x256xi1>
    %15 = arith.andi %14, %8 : vector<1x256xi1>
    %16 = vector.broadcast %4 : i32 to vector<1x256xi32>
    %17 = arith.addi %6, %16 : vector<1x256xi32>
    %18 = arith.select %15, %17, %6 : vector<1x256xi1>, vector<1x256xi32>
    %c1_i32_6 = arith.constant 1 : i32
    %19 = vector.broadcast %c1_i32_6 : i32 to vector<1x256xi32>
    %20 = arith.cmpi sge, %18, %19 : vector<1x256xi32>
    %c15_i32 = arith.constant 15 : i32
    %21 = vector.broadcast %c15_i32 : i32 to vector<1x256xi32>
    %22 = arith.cmpi slt, %18, %21 : vector<1x256xi32>
    %c0_7 = arith.constant 0 : index
    %c0_8 = arith.constant 0 : index
    %c0_9 = arith.constant 0 : index
    %23 = vector.load %arg1[%c0_7, %c0_8, %c0_9] : memref<1x8x256xf32, #tpu.memory_space<vmem>>, vector<1x8x256xf32>
    %24 = vector.shape_cast %23 : vector<1x8x256xf32> to vector<8x256xf32>
    %25 = arith.truncf %24 : vector<8x256xf32> to vector<8x256xbf16>
    %cst = arith.constant 0.000000e+00 : bf16
    %26 = vector.broadcast %cst : bf16 to vector<8x17xbf16>
    %27 = vector.extract_strided_slice %25 {offsets = [0, 0], sizes = [8, 239], strides = [1, 1]} : vector<8x256xbf16> to vector<8x239xbf16>
    %28 = tpu.concatenate %26, %27 in 1 : vector<8x17xbf16>, vector<8x239xbf16> -> vector<8x256xbf16>
    %c0_i32_10 = arith.constant 0 : i32
    %29 = arith.sitofp %c0_i32_10 : i32 to bf16
    %30 = vector.shape_cast %20 : vector<1x256xi1> to vector<1x256xi1>
    %31 = vector.broadcast %30 : vector<1x256xi1> to vector<8x256xi1>
    %32 = vector.broadcast %29 : bf16 to vector<8x256xbf16>
    %33 = arith.select %31, %28, %32 : vector<8x256xi1>, vector<8x256xbf16>
    %cst_11 = arith.constant 0.000000e+00 : bf16
    %34 = vector.broadcast %cst_11 : bf16 to vector<8x16xbf16>
    %35 = vector.extract_strided_slice %25 {offsets = [0, 0], sizes = [8, 240], strides = [1, 1]} : vector<8x256xbf16> to vector<8x240xbf16>
    %36 = tpu.concatenate %34, %35 in 1 : vector<8x16xbf16>, vector<8x240xbf16> -> vector<8x256xbf16>
    %cst_12 = arith.constant 0.000000e+00 : bf16
    %37 = vector.broadcast %cst_12 : bf16 to vector<8x15xbf16>
    %38 = vector.extract_strided_slice %25 {offsets = [0, 0], sizes = [8, 241], strides = [1, 1]} : vector<8x256xbf16> to vector<8x241xbf16>
    %39 = tpu.concatenate %37, %38 in 1 : vector<8x15xbf16>, vector<8x241xbf16> -> vector<8x256xbf16>
    %c0_i32_13 = arith.constant 0 : i32
    %40 = arith.sitofp %c0_i32_13 : i32 to bf16
    %41 = vector.shape_cast %22 : vector<1x256xi1> to vector<1x256xi1>
    %42 = vector.broadcast %41 : vector<1x256xi1> to vector<8x256xi1>
    %43 = vector.broadcast %40 : bf16 to vector<8x256xbf16>
    %44 = arith.select %42, %39, %43 : vector<8x256xi1>, vector<8x256xbf16>
    %cst_14 = arith.constant 0.000000e+00 : bf16
    %45 = vector.broadcast %cst_14 : bf16 to vector<8x1xbf16>
    %46 = vector.extract_strided_slice %25 {offsets = [0, 0], sizes = [8, 255], strides = [1, 1]} : vector<8x256xbf16> to vector<8x255xbf16>
    %47 = tpu.concatenate %45, %46 in 1 : vector<8x1xbf16>, vector<8x255xbf16> -> vector<8x256xbf16>
    %c0_i32_15 = arith.constant 0 : i32
    %48 = arith.sitofp %c0_i32_15 : i32 to bf16
    %49 = vector.shape_cast %20 : vector<1x256xi1> to vector<1x256xi1>
    %50 = vector.broadcast %49 : vector<1x256xi1> to vector<8x256xi1>
    %51 = vector.broadcast %48 : bf16 to vector<8x256xbf16>
    %52 = arith.select %50, %47, %51 : vector<8x256xi1>, vector<8x256xbf16>
    %53 = vector.extract_strided_slice %25 {offsets = [0, 1], sizes = [8, 255], strides = [1, 1]} : vector<8x256xbf16> to vector<8x255xbf16>
    %cst_16 = arith.constant 0.000000e+00 : bf16
    %54 = vector.broadcast %cst_16 : bf16 to vector<8x1xbf16>
    %55 = tpu.concatenate %53, %54 in 1 : vector<8x255xbf16>, vector<8x1xbf16> -> vector<8x256xbf16>
    %c0_i32_17 = arith.constant 0 : i32
    %56 = arith.sitofp %c0_i32_17 : i32 to bf16
    %57 = vector.shape_cast %22 : vector<1x256xi1> to vector<1x256xi1>
    %58 = vector.broadcast %57 : vector<1x256xi1> to vector<8x256xi1>
    %59 = vector.broadcast %56 : bf16 to vector<8x256xbf16>
    %60 = arith.select %58, %55, %59 : vector<8x256xi1>, vector<8x256xbf16>
    %61 = vector.extract_strided_slice %25 {offsets = [0, 15], sizes = [8, 241], strides = [1, 1]} : vector<8x256xbf16> to vector<8x241xbf16>
    %cst_18 = arith.constant 0.000000e+00 : bf16
    %62 = vector.broadcast %cst_18 : bf16 to vector<8x15xbf16>
    %63 = tpu.concatenate %61, %62 in 1 : vector<8x241xbf16>, vector<8x15xbf16> -> vector<8x256xbf16>
    %c0_i32_19 = arith.constant 0 : i32
    %64 = arith.sitofp %c0_i32_19 : i32 to bf16
    %65 = vector.shape_cast %20 : vector<1x256xi1> to vector<1x256xi1>
    %66 = vector.broadcast %65 : vector<1x256xi1> to vector<8x256xi1>
    %67 = vector.broadcast %64 : bf16 to vector<8x256xbf16>
    %68 = arith.select %66, %63, %67 : vector<8x256xi1>, vector<8x256xbf16>
    %69 = vector.extract_strided_slice %25 {offsets = [0, 16], sizes = [8, 240], strides = [1, 1]} : vector<8x256xbf16> to vector<8x240xbf16>
    %cst_20 = arith.constant 0.000000e+00 : bf16
    %70 = vector.broadcast %cst_20 : bf16 to vector<8x16xbf16>
    %71 = tpu.concatenate %69, %70 in 1 : vector<8x240xbf16>, vector<8x16xbf16> -> vector<8x256xbf16>
    %72 = vector.extract_strided_slice %25 {offsets = [0, 17], sizes = [8, 239], strides = [1, 1]} : vector<8x256xbf16> to vector<8x239xbf16>
    %cst_21 = arith.constant 0.000000e+00 : bf16
    %73 = vector.broadcast %cst_21 : bf16 to vector<8x17xbf16>
    %74 = tpu.concatenate %72, %73 in 1 : vector<8x239xbf16>, vector<8x17xbf16> -> vector<8x256xbf16>
    %c0_i32_22 = arith.constant 0 : i32
    %75 = arith.sitofp %c0_i32_22 : i32 to bf16
    %76 = vector.shape_cast %22 : vector<1x256xi1> to vector<1x256xi1>
    %77 = vector.broadcast %76 : vector<1x256xi1> to vector<8x256xi1>
    %78 = vector.broadcast %75 : bf16 to vector<8x256xbf16>
    %79 = arith.select %77, %74, %78 : vector<8x256xi1>, vector<8x256xbf16>
    %80 = tpu.concatenate %33, %36, %44, %52, %25, %60, %68, %71, %79 in 0 : vector<8x256xbf16>, vector<8x256xbf16>, vector<8x256xbf16>, vector<8x256xbf16>, vector<8x256xbf16>, vector<8x256xbf16>, vector<8x256xbf16>, vector<8x256xbf16>, vector<8x256xbf16> -> vector<72x256xbf16>
    %cst_23 = arith.constant dense<0.000000e+00> : vector<8x256xf32>
    %81 = tpu.matmul %0, %80, %cst_23 {dimension_numbers = #tpu.dot_dimension_numbers<[1], [0], [0], [1], [0, 0, 1, 1], [], []>} : vector<8x72xbf16>, vector<72x256xbf16>, vector<8x256xf32> -> vector<8x256xf32>
    %82 = vector.broadcast %1 : vector<8x1xf32> to vector<8x256xf32>
    %83 = arith.addf %81, %82 : vector<8x256xf32>
    %cst_24 = arith.constant 0.000000e+00 : f32
    %84 = vector.broadcast %cst_24 : f32 to vector<8x256xf32>
    %85 = arith.maximumf %83, %84 : vector<8x256xf32>
    %c0_25 = arith.constant 0 : index
    %c0_26 = arith.constant 0 : index
    %c0_27 = arith.constant 0 : index
    %86 = vector.load %arg4[%c0_25, %c0_26, %c0_27] : memref<1x8x256xf32, #tpu.memory_space<vmem>>, vector<1x8x256xf32>
    %87 = vector.shape_cast %86 : vector<1x8x256xf32> to vector<8x256xf32>
    %88 = vector.shape_cast %85 : vector<8x256xf32> to vector<1x8x256xf32>
    tpu.vector_store %arg4[%c0_25, %c0_26, %c0_27], %88 {strides = array<i32>} : memref<1x8x256xf32, #tpu.memory_space<vmem>>, vector<1x8x256xf32>,
    return
  }
  func.func @transform_0(%arg0: i32) -> (i32, i32, i32) {
    %c0_i32 = arith.constant 0 : i32
    %c0_i32_0 = arith.constant 0 : i32
    %c0_i32_1 = arith.constant 0 : i32
    return %arg0, %c0_i32, %c0_i32_0 : i32, i32, i32
  }
  func.func @transform_1(%arg0: i32) -> (i32, i32) {
    %c0_i32 = arith.constant 0 : i32
    %c0_i32_0 = arith.constant 0 : i32
    %c0_i32_1 = arith.constant 0 : i32
    return %c0_i32, %c0_i32_0 : i32, i32
  }
  func.func @transform_2(%arg0: i32) -> (i32, i32) {
    %c0_i32 = arith.constant 0 : i32
    %c0_i32_0 = arith.constant 0 : i32
    %c0_i32_1 = arith.constant 0 : i32
    return %c0_i32, %c0_i32_0 : i32, i32
  }
  func.func @transform_3(%arg0: i32) -> (i32, i32, i32) {
    %c0_i32 = arith.constant 0 : i32
    %c0_i32_0 = arith.constant 0 : i32
    %c0_i32_1 = arith.constant 0 : i32
    return %arg0, %c0_i32, %c0_i32_0 : i32, i32, i32
  }
}

module attributes {stable_mosaic.version = 11 : i64} {
  func.func @_conv_kernel(%arg0: i32, %arg1: memref<1x8x256xf32, #tpu.memory_space<vmem>>, %arg2: memref<1x8x256xf32, #tpu.memory_space<vmem>>, %arg3: memref<8x144xbf16, #tpu.memory_space<vmem>>, %arg4: memref<8x1xf32, #tpu.memory_space<vmem>>, %arg5: memref<1x8x256xf32, #tpu.memory_space<vmem>>) attributes {dimension_semantics = [#tpu.dimension_semantics<parallel>], iteration_bounds = array<i64: 2>, scalar_prefetch = 0 : i64, scratch_operands = 0 : i64, tpu.core_type = #tpu.core_type<tc>, window_params = [{transform_indices = @transform_0, window_bounds = array<i64: 1, 8, 256>}, {transform_indices = @transform_1, window_bounds = array<i64: 1, 8, 256>}, {pipeline_mode = #tpu.pipeline_mode<synchronous>, transform_indices = @transform_2, window_bounds = array<i64: 8, 144>}, {pipeline_mode = #tpu.pipeline_mode<synchronous>, transform_indices = @transform_3, window_bounds = array<i64: 8, 1>}, {transform_indices = @transform_4, window_bounds = array<i64: 1, 8, 256>}]} {
    %c0 = arith.constant 0 : index
    %c0_0 = arith.constant 0 : index
    %0 = vector.load %arg3[%c0, %c0_0] : memref<8x144xbf16, #tpu.memory_space<vmem>>, vector<8x144xbf16>
    %c0_1 = arith.constant 0 : index
    %c0_2 = arith.constant 0 : index
    %1 = vector.load %arg4[%c0_1, %c0_2] : memref<8x1xf32, #tpu.memory_space<vmem>>, vector<8x1xf32>
    %2 = tpu.iota {dimensions = array<i32: 1>} : vector<1x256xi32>
    %c16_i32 = arith.constant 16 : i32
    %c0_i32 = arith.constant 0 : i32
    %3 = arith.cmpi eq, %c16_i32, %c0_i32 : i32
    %c1_i32 = arith.constant 1 : i32
    %4 = arith.select %3, %c1_i32, %c16_i32 : i32
    %5 = vector.broadcast %4 : i32 to vector<1x256xi32>
    %6 = arith.remsi %2, %5 : vector<1x256xi32>
    %c0_i32_3 = arith.constant 0 : i32
    %7 = vector.broadcast %c0_i32_3 : i32 to vector<1x256xi32>
    %8 = arith.cmpi ne, %6, %7 : vector<1x256xi32>
    %c0_i32_4 = arith.constant 0 : i32
    %9 = vector.broadcast %c0_i32_4 : i32 to vector<1x256xi32>
    %10 = arith.cmpi slt, %6, %9 : vector<1x256xi32>
    %c0_i32_5 = arith.constant 0 : i32
    %11 = arith.cmpi slt, %4, %c0_i32_5 : i32
    %12 = vector.broadcast %11 : i1 to vector<1x256xi1>
    %13 = vector.broadcast %12 : vector<1x256xi1> to vector<1x256xi1>
    %14 = arith.xori %10, %13 : vector<1x256xi1>
    %15 = arith.andi %14, %8 : vector<1x256xi1>
    %16 = vector.broadcast %4 : i32 to vector<1x256xi32>
    %17 = arith.addi %6, %16 : vector<1x256xi32>
    %18 = arith.select %15, %17, %6 : vector<1x256xi1>, vector<1x256xi32>
    %c1_i32_6 = arith.constant 1 : i32
    %19 = vector.broadcast %c1_i32_6 : i32 to vector<1x256xi32>
    %20 = arith.cmpi sge, %18, %19 : vector<1x256xi32>
    %c15_i32 = arith.constant 15 : i32
    %21 = vector.broadcast %c15_i32 : i32 to vector<1x256xi32>
    %22 = arith.cmpi slt, %18, %21 : vector<1x256xi32>
    %c0_7 = arith.constant 0 : index
    %c0_8 = arith.constant 0 : index
    %c0_9 = arith.constant 0 : index
    %23 = vector.load %arg1[%c0_7, %c0_8, %c0_9] : memref<1x8x256xf32, #tpu.memory_space<vmem>>, vector<1x8x256xf32>
    %24 = vector.shape_cast %23 : vector<1x8x256xf32> to vector<8x256xf32>
    %25 = arith.truncf %24 : vector<8x256xf32> to vector<8x256xbf16>
    %cst = arith.constant 0.000000e+00 : bf16
    %26 = vector.broadcast %cst : bf16 to vector<8x17xbf16>
    %27 = vector.extract_strided_slice %25 {offsets = [0, 0], sizes = [8, 239], strides = [1, 1]} : vector<8x256xbf16> to vector<8x239xbf16>
    %28 = tpu.concatenate %26, %27 in 1 : vector<8x17xbf16>, vector<8x239xbf16> -> vector<8x256xbf16>
    %c0_i32_10 = arith.constant 0 : i32
    %29 = arith.sitofp %c0_i32_10 : i32 to bf16
    %30 = vector.shape_cast %20 : vector<1x256xi1> to vector<1x256xi1>
    %31 = vector.broadcast %30 : vector<1x256xi1> to vector<8x256xi1>
    %32 = vector.broadcast %29 : bf16 to vector<8x256xbf16>
    %33 = arith.select %31, %28, %32 : vector<8x256xi1>, vector<8x256xbf16>
    %cst_11 = arith.constant 0.000000e+00 : bf16
    %34 = vector.broadcast %cst_11 : bf16 to vector<8x16xbf16>
    %35 = vector.extract_strided_slice %25 {offsets = [0, 0], sizes = [8, 240], strides = [1, 1]} : vector<8x256xbf16> to vector<8x240xbf16>
    %36 = tpu.concatenate %34, %35 in 1 : vector<8x16xbf16>, vector<8x240xbf16> -> vector<8x256xbf16>
    %cst_12 = arith.constant 0.000000e+00 : bf16
    %37 = vector.broadcast %cst_12 : bf16 to vector<8x15xbf16>
    %38 = vector.extract_strided_slice %25 {offsets = [0, 0], sizes = [8, 241], strides = [1, 1]} : vector<8x256xbf16> to vector<8x241xbf16>
    %39 = tpu.concatenate %37, %38 in 1 : vector<8x15xbf16>, vector<8x241xbf16> -> vector<8x256xbf16>
    %c0_i32_13 = arith.constant 0 : i32
    %40 = arith.sitofp %c0_i32_13 : i32 to bf16
    %41 = vector.shape_cast %22 : vector<1x256xi1> to vector<1x256xi1>
    %42 = vector.broadcast %41 : vector<1x256xi1> to vector<8x256xi1>
    %43 = vector.broadcast %40 : bf16 to vector<8x256xbf16>
    %44 = arith.select %42, %39, %43 : vector<8x256xi1>, vector<8x256xbf16>
    %cst_14 = arith.constant 0.000000e+00 : bf16
    %45 = vector.broadcast %cst_14 : bf16 to vector<8x1xbf16>
    %46 = vector.extract_strided_slice %25 {offsets = [0, 0], sizes = [8, 255], strides = [1, 1]} : vector<8x256xbf16> to vector<8x255xbf16>
    %47 = tpu.concatenate %45, %46 in 1 : vector<8x1xbf16>, vector<8x255xbf16> -> vector<8x256xbf16>
    %c0_i32_15 = arith.constant 0 : i32
    %48 = arith.sitofp %c0_i32_15 : i32 to bf16
    %49 = vector.shape_cast %20 : vector<1x256xi1> to vector<1x256xi1>
    %50 = vector.broadcast %49 : vector<1x256xi1> to vector<8x256xi1>
    %51 = vector.broadcast %48 : bf16 to vector<8x256xbf16>
    %52 = arith.select %50, %47, %51 : vector<8x256xi1>, vector<8x256xbf16>
    %53 = vector.extract_strided_slice %25 {offsets = [0, 1], sizes = [8, 255], strides = [1, 1]} : vector<8x256xbf16> to vector<8x255xbf16>
    %cst_16 = arith.constant 0.000000e+00 : bf16
    %54 = vector.broadcast %cst_16 : bf16 to vector<8x1xbf16>
    %55 = tpu.concatenate %53, %54 in 1 : vector<8x255xbf16>, vector<8x1xbf16> -> vector<8x256xbf16>
    %c0_i32_17 = arith.constant 0 : i32
    %56 = arith.sitofp %c0_i32_17 : i32 to bf16
    %57 = vector.shape_cast %22 : vector<1x256xi1> to vector<1x256xi1>
    %58 = vector.broadcast %57 : vector<1x256xi1> to vector<8x256xi1>
    %59 = vector.broadcast %56 : bf16 to vector<8x256xbf16>
    %60 = arith.select %58, %55, %59 : vector<8x256xi1>, vector<8x256xbf16>
    %61 = vector.extract_strided_slice %25 {offsets = [0, 15], sizes = [8, 241], strides = [1, 1]} : vector<8x256xbf16> to vector<8x241xbf16>
    %cst_18 = arith.constant 0.000000e+00 : bf16
    %62 = vector.broadcast %cst_18 : bf16 to vector<8x15xbf16>
    %63 = tpu.concatenate %61, %62 in 1 : vector<8x241xbf16>, vector<8x15xbf16> -> vector<8x256xbf16>
    %c0_i32_19 = arith.constant 0 : i32
    %64 = arith.sitofp %c0_i32_19 : i32 to bf16
    %65 = vector.shape_cast %20 : vector<1x256xi1> to vector<1x256xi1>
    %66 = vector.broadcast %65 : vector<1x256xi1> to vector<8x256xi1>
    %67 = vector.broadcast %64 : bf16 to vector<8x256xbf16>
    %68 = arith.select %66, %63, %67 : vector<8x256xi1>, vector<8x256xbf16>
    %69 = vector.extract_strided_slice %25 {offsets = [0, 16], sizes = [8, 240], strides = [1, 1]} : vector<8x256xbf16> to vector<8x240xbf16>
    %cst_20 = arith.constant 0.000000e+00 : bf16
    %70 = vector.broadcast %cst_20 : bf16 to vector<8x16xbf16>
    %71 = tpu.concatenate %69, %70 in 1 : vector<8x240xbf16>, vector<8x16xbf16> -> vector<8x256xbf16>
    %72 = vector.extract_strided_slice %25 {offsets = [0, 17], sizes = [8, 239], strides = [1, 1]} : vector<8x256xbf16> to vector<8x239xbf16>
    %cst_21 = arith.constant 0.000000e+00 : bf16
    %73 = vector.broadcast %cst_21 : bf16 to vector<8x17xbf16>
    %74 = tpu.concatenate %72, %73 in 1 : vector<8x239xbf16>, vector<8x17xbf16> -> vector<8x256xbf16>
    %c0_i32_22 = arith.constant 0 : i32
    %75 = arith.sitofp %c0_i32_22 : i32 to bf16
    %76 = vector.shape_cast %22 : vector<1x256xi1> to vector<1x256xi1>
    %77 = vector.broadcast %76 : vector<1x256xi1> to vector<8x256xi1>
    %78 = vector.broadcast %75 : bf16 to vector<8x256xbf16>
    %79 = arith.select %77, %74, %78 : vector<8x256xi1>, vector<8x256xbf16>
    %c0_23 = arith.constant 0 : index
    %c0_24 = arith.constant 0 : index
    %c0_25 = arith.constant 0 : index
    %80 = vector.load %arg2[%c0_23, %c0_24, %c0_25] : memref<1x8x256xf32, #tpu.memory_space<vmem>>, vector<1x8x256xf32>
    %81 = vector.shape_cast %80 : vector<1x8x256xf32> to vector<8x256xf32>
    %82 = arith.truncf %81 : vector<8x256xf32> to vector<8x256xbf16>
    %cst_26 = arith.constant 0.000000e+00 : bf16
    %83 = vector.broadcast %cst_26 : bf16 to vector<8x17xbf16>
    %84 = vector.extract_strided_slice %82 {offsets = [0, 0], sizes = [8, 239], strides = [1, 1]} : vector<8x256xbf16> to vector<8x239xbf16>
    %85 = tpu.concatenate %83, %84 in 1 : vector<8x17xbf16>, vector<8x239xbf16> -> vector<8x256xbf16>
    %c0_i32_27 = arith.constant 0 : i32
    %86 = arith.sitofp %c0_i32_27 : i32 to bf16
    %87 = vector.shape_cast %20 : vector<1x256xi1> to vector<1x256xi1>
    %88 = vector.broadcast %87 : vector<1x256xi1> to vector<8x256xi1>
    %89 = vector.broadcast %86 : bf16 to vector<8x256xbf16>
    %90 = arith.select %88, %85, %89 : vector<8x256xi1>, vector<8x256xbf16>
    %cst_28 = arith.constant 0.000000e+00 : bf16
    %91 = vector.broadcast %cst_28 : bf16 to vector<8x16xbf16>
    %92 = vector.extract_strided_slice %82 {offsets = [0, 0], sizes = [8, 240], strides = [1, 1]} : vector<8x256xbf16> to vector<8x240xbf16>
    %93 = tpu.concatenate %91, %92 in 1 : vector<8x16xbf16>, vector<8x240xbf16> -> vector<8x256xbf16>
    %cst_29 = arith.constant 0.000000e+00 : bf16
    %94 = vector.broadcast %cst_29 : bf16 to vector<8x15xbf16>
    %95 = vector.extract_strided_slice %82 {offsets = [0, 0], sizes = [8, 241], strides = [1, 1]} : vector<8x256xbf16> to vector<8x241xbf16>
    %96 = tpu.concatenate %94, %95 in 1 : vector<8x15xbf16>, vector<8x241xbf16> -> vector<8x256xbf16>
    %c0_i32_30 = arith.constant 0 : i32
    %97 = arith.sitofp %c0_i32_30 : i32 to bf16
    %98 = vector.shape_cast %22 : vector<1x256xi1> to vector<1x256xi1>
    %99 = vector.broadcast %98 : vector<1x256xi1> to vector<8x256xi1>
    %100 = vector.broadcast %97 : bf16 to vector<8x256xbf16>
    %101 = arith.select %99, %96, %100 : vector<8x256xi1>, vector<8x256xbf16>
    %cst_31 = arith.constant 0.000000e+00 : bf16
    %102 = vector.broadcast %cst_31 : bf16 to vector<8x1xbf16>
    %103 = vector.extract_strided_slice %82 {offsets = [0, 0], sizes = [8, 255], strides = [1, 1]} : vector<8x256xbf16> to vector<8x255xbf16>
    %104 = tpu.concatenate %102, %103 in 1 : vector<8x1xbf16>, vector<8x255xbf16> -> vector<8x256xbf16>
    %c0_i32_32 = arith.constant 0 : i32
    %105 = arith.sitofp %c0_i32_32 : i32 to bf16
    %106 = vector.shape_cast %20 : vector<1x256xi1> to vector<1x256xi1>
    %107 = vector.broadcast %106 : vector<1x256xi1> to vector<8x256xi1>
    %108 = vector.broadcast %105 : bf16 to vector<8x256xbf16>
    %109 = arith.select %107, %104, %108 : vector<8x256xi1>, vector<8x256xbf16>
    %110 = vector.extract_strided_slice %82 {offsets = [0, 1], sizes = [8, 255], strides = [1, 1]} : vector<8x256xbf16> to vector<8x255xbf16>
    %cst_33 = arith.constant 0.000000e+00 : bf16
    %111 = vector.broadcast %cst_33 : bf16 to vector<8x1xbf16>
    %112 = tpu.concatenate %110, %111 in 1 : vector<8x255xbf16>, vector<8x1xbf16> -> vector<8x256xbf16>
    %c0_i32_34 = arith.constant 0 : i32
    %113 = arith.sitofp %c0_i32_34 : i32 to bf16
    %114 = vector.shape_cast %22 : vector<1x256xi1> to vector<1x256xi1>
    %115 = vector.broadcast %114 : vector<1x256xi1> to vector<8x256xi1>
    %116 = vector.broadcast %113 : bf16 to vector<8x256xbf16>
    %117 = arith.select %115, %112, %116 : vector<8x256xi1>, vector<8x256xbf16>
    %118 = vector.extract_strided_slice %82 {offsets = [0, 15], sizes = [8, 241], strides = [1, 1]} : vector<8x256xbf16> to vector<8x241xbf16>
    %cst_35 = arith.constant 0.000000e+00 : bf16
    %119 = vector.broadcast %cst_35 : bf16 to vector<8x15xbf16>
    %120 = tpu.concatenate %118, %119 in 1 : vector<8x241xbf16>, vector<8x15xbf16> -> vector<8x256xbf16>
    %c0_i32_36 = arith.constant 0 : i32
    %121 = arith.sitofp %c0_i32_36 : i32 to bf16
    %122 = vector.shape_cast %20 : vector<1x256xi1> to vector<1x256xi1>
    %123 = vector.broadcast %122 : vector<1x256xi1> to vector<8x256xi1>
    %124 = vector.broadcast %121 : bf16 to vector<8x256xbf16>
    %125 = arith.select %123, %120, %124 : vector<8x256xi1>, vector<8x256xbf16>
    %126 = vector.extract_strided_slice %82 {offsets = [0, 16], sizes = [8, 240], strides = [1, 1]} : vector<8x256xbf16> to vector<8x240xbf16>
    %cst_37 = arith.constant 0.000000e+00 : bf16
    %127 = vector.broadcast %cst_37 : bf16 to vector<8x16xbf16>
    %128 = tpu.concatenate %126, %127 in 1 : vector<8x240xbf16>, vector<8x16xbf16> -> vector<8x256xbf16>
    %129 = vector.extract_strided_slice %82 {offsets = [0, 17], sizes = [8, 239], strides = [1, 1]} : vector<8x256xbf16> to vector<8x239xbf16>
    %cst_38 = arith.constant 0.000000e+00 : bf16
    %130 = vector.broadcast %cst_38 : bf16 to vector<8x17xbf16>
    %131 = tpu.concatenate %129, %130 in 1 : vector<8x239xbf16>, vector<8x17xbf16> -> vector<8x256xbf16>
    %c0_i32_39 = arith.constant 0 : i32
    %132 = arith.sitofp %c0_i32_39 : i32 to bf16
    %133 = vector.shape_cast %22 : vector<1x256xi1> to vector<1x256xi1>
    %134 = vector.broadcast %133 : vector<1x256xi1> to vector<8x256xi1>
    %135 = vector.broadcast %132 : bf16 to vector<8x256xbf16>
    %136 = arith.select %134, %131, %135 : vector<8x256xi1>, vector<8x256xbf16>
    %137 = tpu.concatenate %33, %36, %44, %52, %25, %60, %68, %71, %79, %90, %93, %101, %109, %82, %117, %125 in 0 : vector<8x256xbf16>, vector<8x256xbf16>, vector<8x256xbf16>, vector<8x256xbf16>, vector<8x256xbf16>, vector<8x256xbf16>, vector<8x256xbf16>, vector<8x256xbf16>, vector<8x256xbf16>, vector<8x256xbf16>, vector<8x256xbf16>, vector<8x256xbf16>, vector<8x256xbf16>, vector<8x256xbf16>, vector<8x256xbf16>, vector<8x256xbf16> -> vector<128x256xbf16>
    %138 = tpu.concatenate %128, %136 in 0 : vector<8x256xbf16>, vector<8x256xbf16> -> vector<16x256xbf16>
    %139 = tpu.concatenate %137, %138 in 0 : vector<128x256xbf16>, vector<16x256xbf16> -> vector<144x256xbf16>
    %cst_40 = arith.constant dense<0.000000e+00> : vector<8x256xf32>
    %140 = tpu.matmul %0, %139, %cst_40 {dimension_numbers = #tpu.dot_dimension_numbers<[1], [0], [0], [1], [0, 0, 1, 1], [], []>} : vector<8x144xbf16>, vector<144x256xbf16>, vector<8x256xf32> -> vector<8x256xf32>
    %141 = vector.broadcast %1 : vector<8x1xf32> to vector<8x256xf32>
    %142 = arith.addf %140, %141 : vector<8x256xf32>
    %cst_41 = arith.constant 0.000000e+00 : f32
    %143 = vector.broadcast %cst_41 : f32 to vector<8x256xf32>
    %144 = arith.maximumf %142, %143 : vector<8x256xf32>
    %c0_42 = arith.constant 0 : index
    %c0_43 = arith.constant 0 : index
    %c0_44 = arith.constant 0 : index
    %145 = vector.load %arg5[%c0_42, %c0_43, %c0_44] : memref<1x8x256xf32, #tpu.memory_space<vmem>>, vector<1x8x256xf32>
    %146 = vector.shape_cast %145 : vector<1x8x256xf32> to vector<8x256xf32>
    %147 = vector.shape_cast %144 : vector<8x256xf32> to vector<1x8x256xf32>
    tpu.vector_store %arg5[%c0_42, %c0_43, %c0_44], %147 {strides = array<i32>} : memref<1x8x256xf32, #tpu.memory_space<vmem>>, vector<1x8x256xf32>,
    return
  }
  func.func @transform_0(%arg0: i32) -> (i32, i32, i32) {
    %c0_i32 = arith.constant 0 : i32
    %c0_i32_0 = arith.constant 0 : i32
    %c0_i32_1 = arith.constant 0 : i32
    return %arg0, %c0_i32, %c0_i32_0 : i32, i32, i32
  }
  func.func @transform_1(%arg0: i32) -> (i32, i32, i32) {
    %c0_i32 = arith.constant 0 : i32
    %c0_i32_0 = arith.constant 0 : i32
    %c0_i32_1 = arith.constant 0 : i32
    return %arg0, %c0_i32, %c0_i32_0 : i32, i32, i32
  }
  func.func @transform_2(%arg0: i32) -> (i32, i32) {
    %c0_i32 = arith.constant 0 : i32
    %c0_i32_0 = arith.constant 0 : i32
    %c0_i32_1 = arith.constant 0 : i32
    return %c0_i32, %c0_i32_0 : i32, i32
  }
  func.func @transform_3(%arg0: i32) -> (i32, i32) {
    %c0_i32 = arith.constant 0 : i32
    %c0_i32_0 = arith.constant 0 : i32
    %c0_i32_1 = arith.constant 0 : i32
    return %c0_i32, %c0_i32_0 : i32, i32
  }
  func.func @transform_4(%arg0: i32) -> (i32, i32, i32) {
    %c0_i32 = arith.constant 0 : i32
    %c0_i32_0 = arith.constant 0 : i32
    %c0_i32_1 = arith.constant 0 : i32
    return %arg0, %c0_i32, %c0_i32_0 : i32, i32, i32
  }
}

module attributes {stable_mosaic.version = 11 : i64} {
  func.func @_conv_kernel(%arg0: i32, %arg1: memref<1x8x256xf32, #tpu.memory_space<vmem>>, %arg2: memref<1x8x256xf32, #tpu.memory_space<vmem>>, %arg3: memref<1x8x256xf32, #tpu.memory_space<vmem>>, %arg4: memref<8x24xbf16, #tpu.memory_space<vmem>>, %arg5: memref<8x1xf32, #tpu.memory_space<vmem>>, %arg6: memref<1x8x256xf32, #tpu.memory_space<vmem>>) attributes {dimension_semantics = [#tpu.dimension_semantics<parallel>], iteration_bounds = array<i64: 2>, scalar_prefetch = 0 : i64, scratch_operands = 0 : i64, tpu.core_type = #tpu.core_type<tc>, window_params = [{transform_indices = @transform_0, window_bounds = array<i64: 1, 8, 256>}, {transform_indices = @transform_1, window_bounds = array<i64: 1, 8, 256>}, {transform_indices = @transform_2, window_bounds = array<i64: 1, 8, 256>}, {pipeline_mode = #tpu.pipeline_mode<synchronous>, transform_indices = @transform_3, window_bounds = array<i64: 8, 24>}, {pipeline_mode = #tpu.pipeline_mode<synchronous>, transform_indices = @transform_4, window_bounds = array<i64: 8, 1>}, {transform_indices = @transform_5, window_bounds = array<i64: 1, 8, 256>}]} {
    %c0 = arith.constant 0 : index
    %c0_0 = arith.constant 0 : index
    %0 = vector.load %arg4[%c0, %c0_0] : memref<8x24xbf16, #tpu.memory_space<vmem>>, vector<8x24xbf16>
    %c0_1 = arith.constant 0 : index
    %c0_2 = arith.constant 0 : index
    %1 = vector.load %arg5[%c0_1, %c0_2] : memref<8x1xf32, #tpu.memory_space<vmem>>, vector<8x1xf32>
    %c0_3 = arith.constant 0 : index
    %c0_4 = arith.constant 0 : index
    %c0_5 = arith.constant 0 : index
    %2 = vector.load %arg1[%c0_3, %c0_4, %c0_5] : memref<1x8x256xf32, #tpu.memory_space<vmem>>, vector<1x8x256xf32>
    %3 = vector.shape_cast %2 : vector<1x8x256xf32> to vector<8x256xf32>
    %4 = arith.truncf %3 : vector<8x256xf32> to vector<8x256xbf16>
    %c0_6 = arith.constant 0 : index
    %c0_7 = arith.constant 0 : index
    %c0_8 = arith.constant 0 : index
    %5 = vector.load %arg2[%c0_6, %c0_7, %c0_8] : memref<1x8x256xf32, #tpu.memory_space<vmem>>, vector<1x8x256xf32>
    %6 = vector.shape_cast %5 : vector<1x8x256xf32> to vector<8x256xf32>
    %7 = arith.truncf %6 : vector<8x256xf32> to vector<8x256xbf16>
    %c0_9 = arith.constant 0 : index
    %c0_10 = arith.constant 0 : index
    %c0_11 = arith.constant 0 : index
    %8 = vector.load %arg3[%c0_9, %c0_10, %c0_11] : memref<1x8x256xf32, #tpu.memory_space<vmem>>, vector<1x8x256xf32>
    %9 = vector.shape_cast %8 : vector<1x8x256xf32> to vector<8x256xf32>
    %10 = arith.truncf %9 : vector<8x256xf32> to vector<8x256xbf16>
    %11 = tpu.concatenate %4, %7, %10 in 0 : vector<8x256xbf16>, vector<8x256xbf16>, vector<8x256xbf16> -> vector<24x256xbf16>
    %cst = arith.constant dense<0.000000e+00> : vector<8x256xf32>
    %12 = tpu.matmul %0, %11, %cst {dimension_numbers = #tpu.dot_dimension_numbers<[1], [0], [0], [1], [0, 0, 1, 1], [], []>} : vector<8x24xbf16>, vector<24x256xbf16>, vector<8x256xf32> -> vector<8x256xf32>
    %13 = vector.broadcast %1 : vector<8x1xf32> to vector<8x256xf32>
    %14 = arith.addf %12, %13 : vector<8x256xf32>
    %c0_12 = arith.constant 0 : index
    %c0_13 = arith.constant 0 : index
    %c0_14 = arith.constant 0 : index
    %15 = vector.load %arg6[%c0_12, %c0_13, %c0_14] : memref<1x8x256xf32, #tpu.memory_space<vmem>>, vector<1x8x256xf32>
    %16 = vector.shape_cast %15 : vector<1x8x256xf32> to vector<8x256xf32>
    %17 = vector.shape_cast %14 : vector<8x256xf32> to vector<1x8x256xf32>
    tpu.vector_store %arg6[%c0_12, %c0_13, %c0_14], %17 {strides = array<i32>} : memref<1x8x256xf32, #tpu.memory_space<vmem>>, vector<1x8x256xf32>,
    return
  }
  func.func @transform_0(%arg0: i32) -> (i32, i32, i32) {
    %c0_i32 = arith.constant 0 : i32
    %c0_i32_0 = arith.constant 0 : i32
    %c0_i32_1 = arith.constant 0 : i32
    return %arg0, %c0_i32, %c0_i32_0 : i32, i32, i32
  }
  func.func @transform_1(%arg0: i32) -> (i32, i32, i32) {
    %c0_i32 = arith.constant 0 : i32
    %c0_i32_0 = arith.constant 0 : i32
    %c0_i32_1 = arith.constant 0 : i32
    return %arg0, %c0_i32, %c0_i32_0 : i32, i32, i32
  }
  func.func @transform_2(%arg0: i32) -> (i32, i32, i32) {
    %c0_i32 = arith.constant 0 : i32
    %c0_i32_0 = arith.constant 0 : i32
    %c0_i32_1 = arith.constant 0 : i32
    return %arg0, %c0_i32, %c0_i32_0 : i32, i32, i32
  }
  func.func @transform_3(%arg0: i32) -> (i32, i32) {
    %c0_i32 = arith.constant 0 : i32
    %c0_i32_0 = arith.constant 0 : i32
    %c0_i32_1 = arith.constant 0 : i32
    return %c0_i32, %c0_i32_0 : i32, i32
  }
  func.func @transform_4(%arg0: i32) -> (i32, i32) {
    %c0_i32 = arith.constant 0 : i32
    %c0_i32_0 = arith.constant 0 : i32
    %c0_i32_1 = arith.constant 0 : i32
    return %c0_i32, %c0_i32_0 : i32, i32
  }
  func.func @transform_5(%arg0: i32) -> (i32, i32, i32) {
    %c0_i32 = arith.constant 0 : i32
    %c0_i32_0 = arith.constant 0 : i32
    %c0_i32_1 = arith.constant 0 : i32
    return %arg0, %c0_i32, %c0_i32_0 : i32, i32, i32
  }
}

module attributes {stable_mosaic.version = 11 : i64} {
  func.func @_conv_kernel(%arg0: i32, %arg1: memref<1x8x256xf32, #tpu.memory_space<vmem>>, %arg2: memref<1x8x256xf32, #tpu.memory_space<vmem>>, %arg3: memref<16x16xbf16, #tpu.memory_space<vmem>>, %arg4: memref<16x1xf32, #tpu.memory_space<vmem>>, %arg5: memref<1x16x256xf32, #tpu.memory_space<vmem>>) attributes {dimension_semantics = [#tpu.dimension_semantics<parallel>], iteration_bounds = array<i64: 2>, scalar_prefetch = 0 : i64, scratch_operands = 0 : i64, tpu.core_type = #tpu.core_type<tc>, window_params = [{transform_indices = @transform_0, window_bounds = array<i64: 1, 8, 256>}, {transform_indices = @transform_1, window_bounds = array<i64: 1, 8, 256>}, {pipeline_mode = #tpu.pipeline_mode<synchronous>, transform_indices = @transform_2, window_bounds = array<i64: 16, 16>}, {pipeline_mode = #tpu.pipeline_mode<synchronous>, transform_indices = @transform_3, window_bounds = array<i64: 16, 1>}, {transform_indices = @transform_4, window_bounds = array<i64: 1, 16, 256>}]} {
    %c0 = arith.constant 0 : index
    %c0_0 = arith.constant 0 : index
    %0 = vector.load %arg3[%c0, %c0_0] : memref<16x16xbf16, #tpu.memory_space<vmem>>, vector<16x16xbf16>
    %c0_1 = arith.constant 0 : index
    %c0_2 = arith.constant 0 : index
    %1 = vector.load %arg4[%c0_1, %c0_2] : memref<16x1xf32, #tpu.memory_space<vmem>>, vector<16x1xf32>
    %c0_3 = arith.constant 0 : index
    %c0_4 = arith.constant 0 : index
    %c0_5 = arith.constant 0 : index
    %2 = vector.load %arg1[%c0_3, %c0_4, %c0_5] : memref<1x8x256xf32, #tpu.memory_space<vmem>>, vector<1x8x256xf32>
    %3 = vector.shape_cast %2 : vector<1x8x256xf32> to vector<8x256xf32>
    %4 = arith.truncf %3 : vector<8x256xf32> to vector<8x256xbf16>
    %c0_6 = arith.constant 0 : index
    %c0_7 = arith.constant 0 : index
    %c0_8 = arith.constant 0 : index
    %5 = vector.load %arg2[%c0_6, %c0_7, %c0_8] : memref<1x8x256xf32, #tpu.memory_space<vmem>>, vector<1x8x256xf32>
    %6 = vector.shape_cast %5 : vector<1x8x256xf32> to vector<8x256xf32>
    %7 = arith.truncf %6 : vector<8x256xf32> to vector<8x256xbf16>
    %8 = tpu.concatenate %4, %7 in 0 : vector<8x256xbf16>, vector<8x256xbf16> -> vector<16x256xbf16>
    %cst = arith.constant dense<0.000000e+00> : vector<16x256xf32>
    %9 = tpu.matmul %0, %8, %cst {dimension_numbers = #tpu.dot_dimension_numbers<[1], [0], [0], [1], [0, 0, 1, 1], [], []>} : vector<16x16xbf16>, vector<16x256xbf16>, vector<16x256xf32> -> vector<16x256xf32>
    %10 = vector.broadcast %1 : vector<16x1xf32> to vector<16x256xf32>
    %11 = arith.addf %9, %10 : vector<16x256xf32>
    %c0_9 = arith.constant 0 : index
    %c0_10 = arith.constant 0 : index
    %c0_11 = arith.constant 0 : index
    %12 = vector.load %arg5[%c0_9, %c0_10, %c0_11] : memref<1x16x256xf32, #tpu.memory_space<vmem>>, vector<1x16x256xf32>
    %13 = vector.shape_cast %12 : vector<1x16x256xf32> to vector<16x256xf32>
    %14 = vector.shape_cast %11 : vector<16x256xf32> to vector<1x16x256xf32>
    tpu.vector_store %arg5[%c0_9, %c0_10, %c0_11], %14 {strides = array<i32>} : memref<1x16x256xf32, #tpu.memory_space<vmem>>, vector<1x16x256xf32>,
    return
  }
  func.func @transform_0(%arg0: i32) -> (i32, i32, i32) {
    %c0_i32 = arith.constant 0 : i32
    %c0_i32_0 = arith.constant 0 : i32
    %c0_i32_1 = arith.constant 0 : i32
    return %arg0, %c0_i32, %c0_i32_0 : i32, i32, i32
  }
  func.func @transform_1(%arg0: i32) -> (i32, i32, i32) {
    %c0_i32 = arith.constant 0 : i32
    %c0_i32_0 = arith.constant 0 : i32
    %c0_i32_1 = arith.constant 0 : i32
    return %arg0, %c0_i32, %c0_i32_0 : i32, i32, i32
  }
  func.func @transform_2(%arg0: i32) -> (i32, i32) {
    %c0_i32 = arith.constant 0 : i32
    %c0_i32_0 = arith.constant 0 : i32
    %c0_i32_1 = arith.constant 0 : i32
    return %c0_i32, %c0_i32_0 : i32, i32
  }
  func.func @transform_3(%arg0: i32) -> (i32, i32) {
    %c0_i32 = arith.constant 0 : i32
    %c0_i32_0 = arith.constant 0 : i32
    %c0_i32_1 = arith.constant 0 : i32
    return %c0_i32, %c0_i32_0 : i32, i32
  }
  func.func @transform_4(%arg0: i32) -> (i32, i32, i32) {
    %c0_i32 = arith.constant 0 : i32
    %c0_i32_0 = arith.constant 0 : i32
    %c0_i32_1 = arith.constant 0 : i32
    return %arg0, %c0_i32, %c0_i32_0 : i32, i32, i32
  }
}

module attributes {stable_mosaic.version = 11 : i64} {
  func.func @_conv_kernel(%arg0: i32, %arg1: memref<1x16x256xf32, #tpu.memory_space<vmem>>, %arg2: memref<16x144xbf16, #tpu.memory_space<vmem>>, %arg3: memref<16x1xf32, #tpu.memory_space<vmem>>, %arg4: memref<1x16x256xf32, #tpu.memory_space<vmem>>, %arg5: memref<1x16x256xf32, #tpu.memory_space<vmem>>) attributes {dimension_semantics = [#tpu.dimension_semantics<parallel>], iteration_bounds = array<i64: 2>, scalar_prefetch = 0 : i64, scratch_operands = 0 : i64, tpu.core_type = #tpu.core_type<tc>, window_params = [{transform_indices = @transform_0, window_bounds = array<i64: 1, 16, 256>}, {pipeline_mode = #tpu.pipeline_mode<synchronous>, transform_indices = @transform_1, window_bounds = array<i64: 16, 144>}, {pipeline_mode = #tpu.pipeline_mode<synchronous>, transform_indices = @transform_2, window_bounds = array<i64: 16, 1>}, {transform_indices = @transform_3, window_bounds = array<i64: 1, 16, 256>}, {transform_indices = @transform_4, window_bounds = array<i64: 1, 16, 256>}]} {
    %c0 = arith.constant 0 : index
    %c0_0 = arith.constant 0 : index
    %0 = vector.load %arg2[%c0, %c0_0] : memref<16x144xbf16, #tpu.memory_space<vmem>>, vector<16x144xbf16>
    %c0_1 = arith.constant 0 : index
    %c0_2 = arith.constant 0 : index
    %1 = vector.load %arg3[%c0_1, %c0_2] : memref<16x1xf32, #tpu.memory_space<vmem>>, vector<16x1xf32>
    %2 = tpu.iota {dimensions = array<i32: 1>} : vector<1x256xi32>
    %c16_i32 = arith.constant 16 : i32
    %c0_i32 = arith.constant 0 : i32
    %3 = arith.cmpi eq, %c16_i32, %c0_i32 : i32
    %c1_i32 = arith.constant 1 : i32
    %4 = arith.select %3, %c1_i32, %c16_i32 : i32
    %5 = vector.broadcast %4 : i32 to vector<1x256xi32>
    %6 = arith.remsi %2, %5 : vector<1x256xi32>
    %c0_i32_3 = arith.constant 0 : i32
    %7 = vector.broadcast %c0_i32_3 : i32 to vector<1x256xi32>
    %8 = arith.cmpi ne, %6, %7 : vector<1x256xi32>
    %c0_i32_4 = arith.constant 0 : i32
    %9 = vector.broadcast %c0_i32_4 : i32 to vector<1x256xi32>
    %10 = arith.cmpi slt, %6, %9 : vector<1x256xi32>
    %c0_i32_5 = arith.constant 0 : i32
    %11 = arith.cmpi slt, %4, %c0_i32_5 : i32
    %12 = vector.broadcast %11 : i1 to vector<1x256xi1>
    %13 = vector.broadcast %12 : vector<1x256xi1> to vector<1x256xi1>
    %14 = arith.xori %10, %13 : vector<1x256xi1>
    %15 = arith.andi %14, %8 : vector<1x256xi1>
    %16 = vector.broadcast %4 : i32 to vector<1x256xi32>
    %17 = arith.addi %6, %16 : vector<1x256xi32>
    %18 = arith.select %15, %17, %6 : vector<1x256xi1>, vector<1x256xi32>
    %c1_i32_6 = arith.constant 1 : i32
    %19 = vector.broadcast %c1_i32_6 : i32 to vector<1x256xi32>
    %20 = arith.cmpi sge, %18, %19 : vector<1x256xi32>
    %c15_i32 = arith.constant 15 : i32
    %21 = vector.broadcast %c15_i32 : i32 to vector<1x256xi32>
    %22 = arith.cmpi slt, %18, %21 : vector<1x256xi32>
    %c0_7 = arith.constant 0 : index
    %c0_8 = arith.constant 0 : index
    %c0_9 = arith.constant 0 : index
    %23 = vector.load %arg1[%c0_7, %c0_8, %c0_9] : memref<1x16x256xf32, #tpu.memory_space<vmem>>, vector<1x16x256xf32>
    %24 = vector.shape_cast %23 : vector<1x16x256xf32> to vector<16x256xf32>
    %25 = arith.truncf %24 : vector<16x256xf32> to vector<16x256xbf16>
    %cst = arith.constant 0.000000e+00 : bf16
    %26 = vector.broadcast %cst : bf16 to vector<16x17xbf16>
    %27 = vector.extract_strided_slice %25 {offsets = [0, 0], sizes = [16, 239], strides = [1, 1]} : vector<16x256xbf16> to vector<16x239xbf16>
    %28 = tpu.concatenate %26, %27 in 1 : vector<16x17xbf16>, vector<16x239xbf16> -> vector<16x256xbf16>
    %c0_i32_10 = arith.constant 0 : i32
    %29 = arith.sitofp %c0_i32_10 : i32 to bf16
    %30 = vector.shape_cast %20 : vector<1x256xi1> to vector<1x256xi1>
    %31 = vector.broadcast %30 : vector<1x256xi1> to vector<16x256xi1>
    %32 = vector.broadcast %29 : bf16 to vector<16x256xbf16>
    %33 = arith.select %31, %28, %32 : vector<16x256xi1>, vector<16x256xbf16>
    %cst_11 = arith.constant 0.000000e+00 : bf16
    %34 = vector.broadcast %cst_11 : bf16 to vector<16x16xbf16>
    %35 = vector.extract_strided_slice %25 {offsets = [0, 0], sizes = [16, 240], strides = [1, 1]} : vector<16x256xbf16> to vector<16x240xbf16>
    %36 = tpu.concatenate %34, %35 in 1 : vector<16x16xbf16>, vector<16x240xbf16> -> vector<16x256xbf16>
    %cst_12 = arith.constant 0.000000e+00 : bf16
    %37 = vector.broadcast %cst_12 : bf16 to vector<16x15xbf16>
    %38 = vector.extract_strided_slice %25 {offsets = [0, 0], sizes = [16, 241], strides = [1, 1]} : vector<16x256xbf16> to vector<16x241xbf16>
    %39 = tpu.concatenate %37, %38 in 1 : vector<16x15xbf16>, vector<16x241xbf16> -> vector<16x256xbf16>
    %c0_i32_13 = arith.constant 0 : i32
    %40 = arith.sitofp %c0_i32_13 : i32 to bf16
    %41 = vector.shape_cast %22 : vector<1x256xi1> to vector<1x256xi1>
    %42 = vector.broadcast %41 : vector<1x256xi1> to vector<16x256xi1>
    %43 = vector.broadcast %40 : bf16 to vector<16x256xbf16>
    %44 = arith.select %42, %39, %43 : vector<16x256xi1>, vector<16x256xbf16>
    %cst_14 = arith.constant 0.000000e+00 : bf16
    %45 = vector.broadcast %cst_14 : bf16 to vector<16x1xbf16>
    %46 = vector.extract_strided_slice %25 {offsets = [0, 0], sizes = [16, 255], strides = [1, 1]} : vector<16x256xbf16> to vector<16x255xbf16>
    %47 = tpu.concatenate %45, %46 in 1 : vector<16x1xbf16>, vector<16x255xbf16> -> vector<16x256xbf16>
    %c0_i32_15 = arith.constant 0 : i32
    %48 = arith.sitofp %c0_i32_15 : i32 to bf16
    %49 = vector.shape_cast %20 : vector<1x256xi1> to vector<1x256xi1>
    %50 = vector.broadcast %49 : vector<1x256xi1> to vector<16x256xi1>
    %51 = vector.broadcast %48 : bf16 to vector<16x256xbf16>
    %52 = arith.select %50, %47, %51 : vector<16x256xi1>, vector<16x256xbf16>
    %53 = vector.extract_strided_slice %25 {offsets = [0, 1], sizes = [16, 255], strides = [1, 1]} : vector<16x256xbf16> to vector<16x255xbf16>
    %cst_16 = arith.constant 0.000000e+00 : bf16
    %54 = vector.broadcast %cst_16 : bf16 to vector<16x1xbf16>
    %55 = tpu.concatenate %53, %54 in 1 : vector<16x255xbf16>, vector<16x1xbf16> -> vector<16x256xbf16>
    %c0_i32_17 = arith.constant 0 : i32
    %56 = arith.sitofp %c0_i32_17 : i32 to bf16
    %57 = vector.shape_cast %22 : vector<1x256xi1> to vector<1x256xi1>
    %58 = vector.broadcast %57 : vector<1x256xi1> to vector<16x256xi1>
    %59 = vector.broadcast %56 : bf16 to vector<16x256xbf16>
    %60 = arith.select %58, %55, %59 : vector<16x256xi1>, vector<16x256xbf16>
    %61 = vector.extract_strided_slice %25 {offsets = [0, 15], sizes = [16, 241], strides = [1, 1]} : vector<16x256xbf16> to vector<16x241xbf16>
    %cst_18 = arith.constant 0.000000e+00 : bf16
    %62 = vector.broadcast %cst_18 : bf16 to vector<16x15xbf16>
    %63 = tpu.concatenate %61, %62 in 1 : vector<16x241xbf16>, vector<16x15xbf16> -> vector<16x256xbf16>
    %c0_i32_19 = arith.constant 0 : i32
    %64 = arith.sitofp %c0_i32_19 : i32 to bf16
    %65 = vector.shape_cast %20 : vector<1x256xi1> to vector<1x256xi1>
    %66 = vector.broadcast %65 : vector<1x256xi1> to vector<16x256xi1>
    %67 = vector.broadcast %64 : bf16 to vector<16x256xbf16>
    %68 = arith.select %66, %63, %67 : vector<16x256xi1>, vector<16x256xbf16>
    %69 = vector.extract_strided_slice %25 {offsets = [0, 16], sizes = [16, 240], strides = [1, 1]} : vector<16x256xbf16> to vector<16x240xbf16>
    %cst_20 = arith.constant 0.000000e+00 : bf16
    %70 = vector.broadcast %cst_20 : bf16 to vector<16x16xbf16>
    %71 = tpu.concatenate %69, %70 in 1 : vector<16x240xbf16>, vector<16x16xbf16> -> vector<16x256xbf16>
    %72 = vector.extract_strided_slice %25 {offsets = [0, 17], sizes = [16, 239], strides = [1, 1]} : vector<16x256xbf16> to vector<16x239xbf16>
    %cst_21 = arith.constant 0.000000e+00 : bf16
    %73 = vector.broadcast %cst_21 : bf16 to vector<16x17xbf16>
    %74 = tpu.concatenate %72, %73 in 1 : vector<16x239xbf16>, vector<16x17xbf16> -> vector<16x256xbf16>
    %c0_i32_22 = arith.constant 0 : i32
    %75 = arith.sitofp %c0_i32_22 : i32 to bf16
    %76 = vector.shape_cast %22 : vector<1x256xi1> to vector<1x256xi1>
    %77 = vector.broadcast %76 : vector<1x256xi1> to vector<16x256xi1>
    %78 = vector.broadcast %75 : bf16 to vector<16x256xbf16>
    %79 = arith.select %77, %74, %78 : vector<16x256xi1>, vector<16x256xbf16>
    %80 = tpu.concatenate %33, %36, %44, %52, %25, %60, %68, %71, %79 in 0 : vector<16x256xbf16>, vector<16x256xbf16>, vector<16x256xbf16>, vector<16x256xbf16>, vector<16x256xbf16>, vector<16x256xbf16>, vector<16x256xbf16>, vector<16x256xbf16>, vector<16x256xbf16> -> vector<144x256xbf16>
    %cst_23 = arith.constant dense<0.000000e+00> : vector<16x256xf32>
    %81 = tpu.matmul %0, %80, %cst_23 {dimension_numbers = #tpu.dot_dimension_numbers<[1], [0], [0], [1], [0, 0, 1, 1], [], []>} : vector<16x144xbf16>, vector<144x256xbf16>, vector<16x256xf32> -> vector<16x256xf32>
    %82 = vector.broadcast %1 : vector<16x1xf32> to vector<16x256xf32>
    %83 = arith.addf %81, %82 : vector<16x256xf32>
    %c0_24 = arith.constant 0 : index
    %c0_25 = arith.constant 0 : index
    %c0_26 = arith.constant 0 : index
    %84 = vector.load %arg4[%c0_24, %c0_25, %c0_26] : memref<1x16x256xf32, #tpu.memory_space<vmem>>, vector<1x16x256xf32>
    %85 = vector.shape_cast %84 : vector<1x16x256xf32> to vector<16x256xf32>
    %86 = arith.addf %83, %85 : vector<16x256xf32>
    %c0_27 = arith.constant 0 : index
    %c0_28 = arith.constant 0 : index
    %c0_29 = arith.constant 0 : index
    %87 = vector.load %arg5[%c0_27, %c0_28, %c0_29] : memref<1x16x256xf32, #tpu.memory_space<vmem>>, vector<1x16x256xf32>
    %88 = vector.shape_cast %87 : vector<1x16x256xf32> to vector<16x256xf32>
    %89 = vector.shape_cast %86 : vector<16x256xf32> to vector<1x16x256xf32>
    tpu.vector_store %arg5[%c0_27, %c0_28, %c0_29], %89 {strides = array<i32>} : memref<1x16x256xf32, #tpu.memory_space<vmem>>, vector<1x16x256xf32>,
    return
  }
  func.func @transform_0(%arg0: i32) -> (i32, i32, i32) {
    %c0_i32 = arith.constant 0 : i32
    %c0_i32_0 = arith.constant 0 : i32
    %c0_i32_1 = arith.constant 0 : i32
    return %arg0, %c0_i32, %c0_i32_0 : i32, i32, i32
  }
  func.func @transform_1(%arg0: i32) -> (i32, i32) {
    %c0_i32 = arith.constant 0 : i32
    %c0_i32_0 = arith.constant 0 : i32
    %c0_i32_1 = arith.constant 0 : i32
    return %c0_i32, %c0_i32_0 : i32, i32
  }
  func.func @transform_2(%arg0: i32) -> (i32, i32) {
    %c0_i32 = arith.constant 0 : i32
    %c0_i32_0 = arith.constant 0 : i32
    %c0_i32_1 = arith.constant 0 : i32
    return %c0_i32, %c0_i32_0 : i32, i32
  }
  func.func @transform_3(%arg0: i32) -> (i32, i32, i32) {
    %c0_i32 = arith.constant 0 : i32
    %c0_i32_0 = arith.constant 0 : i32
    %c0_i32_1 = arith.constant 0 : i32
    return %arg0, %c0_i32, %c0_i32_0 : i32, i32, i32
  }
  func.func @transform_4(%arg0: i32) -> (i32, i32, i32) {
    %c0_i32 = arith.constant 0 : i32
    %c0_i32_0 = arith.constant 0 : i32
    %c0_i32_1 = arith.constant 0 : i32
    return %arg0, %c0_i32, %c0_i32_0 : i32, i32, i32
  }
}

module attributes {stable_mosaic.version = 11 : i64} {
  func.func @_conv_kernel(%arg0: i32, %arg1: memref<1x16x256xf32, #tpu.memory_space<vmem>>, %arg2: memref<1x144xbf16, #tpu.memory_space<vmem>>, %arg3: memref<1x1xf32, #tpu.memory_space<vmem>>, %arg4: memref<1x1x256xf32, #tpu.memory_space<vmem>>, %arg5: memref<1x1x256xf32, #tpu.memory_space<vmem>>) attributes {dimension_semantics = [#tpu.dimension_semantics<parallel>], iteration_bounds = array<i64: 2>, scalar_prefetch = 0 : i64, scratch_operands = 0 : i64, tpu.core_type = #tpu.core_type<tc>, window_params = [{transform_indices = @transform_0, window_bounds = array<i64: 1, 16, 256>}, {pipeline_mode = #tpu.pipeline_mode<synchronous>, transform_indices = @transform_1, window_bounds = array<i64: 1, 144>}, {pipeline_mode = #tpu.pipeline_mode<synchronous>, transform_indices = @transform_2, window_bounds = array<i64: 1, 1>}, {transform_indices = @transform_3, window_bounds = array<i64: 1, 1, 256>}, {transform_indices = @transform_4, window_bounds = array<i64: 1, 1, 256>}]} {
    %c0 = arith.constant 0 : index
    %c0_0 = arith.constant 0 : index
    %0 = vector.load %arg2[%c0, %c0_0] : memref<1x144xbf16, #tpu.memory_space<vmem>>, vector<1x144xbf16>
    %c0_1 = arith.constant 0 : index
    %c0_2 = arith.constant 0 : index
    %1 = vector.load %arg3[%c0_1, %c0_2] : memref<1x1xf32, #tpu.memory_space<vmem>>, vector<1x1xf32>
    %2 = tpu.iota {dimensions = array<i32: 1>} : vector<1x256xi32>
    %c16_i32 = arith.constant 16 : i32
    %c0_i32 = arith.constant 0 : i32
    %3 = arith.cmpi eq, %c16_i32, %c0_i32 : i32
    %c1_i32 = arith.constant 1 : i32
    %4 = arith.select %3, %c1_i32, %c16_i32 : i32
    %5 = vector.broadcast %4 : i32 to vector<1x256xi32>
    %6 = arith.remsi %2, %5 : vector<1x256xi32>
    %c0_i32_3 = arith.constant 0 : i32
    %7 = vector.broadcast %c0_i32_3 : i32 to vector<1x256xi32>
    %8 = arith.cmpi ne, %6, %7 : vector<1x256xi32>
    %c0_i32_4 = arith.constant 0 : i32
    %9 = vector.broadcast %c0_i32_4 : i32 to vector<1x256xi32>
    %10 = arith.cmpi slt, %6, %9 : vector<1x256xi32>
    %c0_i32_5 = arith.constant 0 : i32
    %11 = arith.cmpi slt, %4, %c0_i32_5 : i32
    %12 = vector.broadcast %11 : i1 to vector<1x256xi1>
    %13 = vector.broadcast %12 : vector<1x256xi1> to vector<1x256xi1>
    %14 = arith.xori %10, %13 : vector<1x256xi1>
    %15 = arith.andi %14, %8 : vector<1x256xi1>
    %16 = vector.broadcast %4 : i32 to vector<1x256xi32>
    %17 = arith.addi %6, %16 : vector<1x256xi32>
    %18 = arith.select %15, %17, %6 : vector<1x256xi1>, vector<1x256xi32>
    %c1_i32_6 = arith.constant 1 : i32
    %19 = vector.broadcast %c1_i32_6 : i32 to vector<1x256xi32>
    %20 = arith.cmpi sge, %18, %19 : vector<1x256xi32>
    %c15_i32 = arith.constant 15 : i32
    %21 = vector.broadcast %c15_i32 : i32 to vector<1x256xi32>
    %22 = arith.cmpi slt, %18, %21 : vector<1x256xi32>
    %c0_7 = arith.constant 0 : index
    %c0_8 = arith.constant 0 : index
    %c0_9 = arith.constant 0 : index
    %23 = vector.load %arg1[%c0_7, %c0_8, %c0_9] : memref<1x16x256xf32, #tpu.memory_space<vmem>>, vector<1x16x256xf32>
    %24 = vector.shape_cast %23 : vector<1x16x256xf32> to vector<16x256xf32>
    %25 = arith.truncf %24 : vector<16x256xf32> to vector<16x256xbf16>
    %cst = arith.constant 0.000000e+00 : bf16
    %26 = vector.broadcast %cst : bf16 to vector<16x17xbf16>
    %27 = vector.extract_strided_slice %25 {offsets = [0, 0], sizes = [16, 239], strides = [1, 1]} : vector<16x256xbf16> to vector<16x239xbf16>
    %28 = tpu.concatenate %26, %27 in 1 : vector<16x17xbf16>, vector<16x239xbf16> -> vector<16x256xbf16>
    %c0_i32_10 = arith.constant 0 : i32
    %29 = arith.sitofp %c0_i32_10 : i32 to bf16
    %30 = vector.shape_cast %20 : vector<1x256xi1> to vector<1x256xi1>
    %31 = vector.broadcast %30 : vector<1x256xi1> to vector<16x256xi1>
    %32 = vector.broadcast %29 : bf16 to vector<16x256xbf16>
    %33 = arith.select %31, %28, %32 : vector<16x256xi1>, vector<16x256xbf16>
    %cst_11 = arith.constant 0.000000e+00 : bf16
    %34 = vector.broadcast %cst_11 : bf16 to vector<16x16xbf16>
    %35 = vector.extract_strided_slice %25 {offsets = [0, 0], sizes = [16, 240], strides = [1, 1]} : vector<16x256xbf16> to vector<16x240xbf16>
    %36 = tpu.concatenate %34, %35 in 1 : vector<16x16xbf16>, vector<16x240xbf16> -> vector<16x256xbf16>
    %cst_12 = arith.constant 0.000000e+00 : bf16
    %37 = vector.broadcast %cst_12 : bf16 to vector<16x15xbf16>
    %38 = vector.extract_strided_slice %25 {offsets = [0, 0], sizes = [16, 241], strides = [1, 1]} : vector<16x256xbf16> to vector<16x241xbf16>
    %39 = tpu.concatenate %37, %38 in 1 : vector<16x15xbf16>, vector<16x241xbf16> -> vector<16x256xbf16>
    %c0_i32_13 = arith.constant 0 : i32
    %40 = arith.sitofp %c0_i32_13 : i32 to bf16
    %41 = vector.shape_cast %22 : vector<1x256xi1> to vector<1x256xi1>
    %42 = vector.broadcast %41 : vector<1x256xi1> to vector<16x256xi1>
    %43 = vector.broadcast %40 : bf16 to vector<16x256xbf16>
    %44 = arith.select %42, %39, %43 : vector<16x256xi1>, vector<16x256xbf16>
    %cst_14 = arith.constant 0.000000e+00 : bf16
    %45 = vector.broadcast %cst_14 : bf16 to vector<16x1xbf16>
    %46 = vector.extract_strided_slice %25 {offsets = [0, 0], sizes = [16, 255], strides = [1, 1]} : vector<16x256xbf16> to vector<16x255xbf16>
    %47 = tpu.concatenate %45, %46 in 1 : vector<16x1xbf16>, vector<16x255xbf16> -> vector<16x256xbf16>
    %c0_i32_15 = arith.constant 0 : i32
    %48 = arith.sitofp %c0_i32_15 : i32 to bf16
    %49 = vector.shape_cast %20 : vector<1x256xi1> to vector<1x256xi1>
    %50 = vector.broadcast %49 : vector<1x256xi1> to vector<16x256xi1>
    %51 = vector.broadcast %48 : bf16 to vector<16x256xbf16>
    %52 = arith.select %50, %47, %51 : vector<16x256xi1>, vector<16x256xbf16>
    %53 = vector.extract_strided_slice %25 {offsets = [0, 1], sizes = [16, 255], strides = [1, 1]} : vector<16x256xbf16> to vector<16x255xbf16>
    %cst_16 = arith.constant 0.000000e+00 : bf16
    %54 = vector.broadcast %cst_16 : bf16 to vector<16x1xbf16>
    %55 = tpu.concatenate %53, %54 in 1 : vector<16x255xbf16>, vector<16x1xbf16> -> vector<16x256xbf16>
    %c0_i32_17 = arith.constant 0 : i32
    %56 = arith.sitofp %c0_i32_17 : i32 to bf16
    %57 = vector.shape_cast %22 : vector<1x256xi1> to vector<1x256xi1>
    %58 = vector.broadcast %57 : vector<1x256xi1> to vector<16x256xi1>
    %59 = vector.broadcast %56 : bf16 to vector<16x256xbf16>
    %60 = arith.select %58, %55, %59 : vector<16x256xi1>, vector<16x256xbf16>
    %61 = vector.extract_strided_slice %25 {offsets = [0, 15], sizes = [16, 241], strides = [1, 1]} : vector<16x256xbf16> to vector<16x241xbf16>
    %cst_18 = arith.constant 0.000000e+00 : bf16
    %62 = vector.broadcast %cst_18 : bf16 to vector<16x15xbf16>
    %63 = tpu.concatenate %61, %62 in 1 : vector<16x241xbf16>, vector<16x15xbf16> -> vector<16x256xbf16>
    %c0_i32_19 = arith.constant 0 : i32
    %64 = arith.sitofp %c0_i32_19 : i32 to bf16
    %65 = vector.shape_cast %20 : vector<1x256xi1> to vector<1x256xi1>
    %66 = vector.broadcast %65 : vector<1x256xi1> to vector<16x256xi1>
    %67 = vector.broadcast %64 : bf16 to vector<16x256xbf16>
    %68 = arith.select %66, %63, %67 : vector<16x256xi1>, vector<16x256xbf16>
    %69 = vector.extract_strided_slice %25 {offsets = [0, 16], sizes = [16, 240], strides = [1, 1]} : vector<16x256xbf16> to vector<16x240xbf16>
    %cst_20 = arith.constant 0.000000e+00 : bf16
    %70 = vector.broadcast %cst_20 : bf16 to vector<16x16xbf16>
    %71 = tpu.concatenate %69, %70 in 1 : vector<16x240xbf16>, vector<16x16xbf16> -> vector<16x256xbf16>
    %72 = vector.extract_strided_slice %25 {offsets = [0, 17], sizes = [16, 239], strides = [1, 1]} : vector<16x256xbf16> to vector<16x239xbf16>
    %cst_21 = arith.constant 0.000000e+00 : bf16
    %73 = vector.broadcast %cst_21 : bf16 to vector<16x17xbf16>
    %74 = tpu.concatenate %72, %73 in 1 : vector<16x239xbf16>, vector<16x17xbf16> -> vector<16x256xbf16>
    %c0_i32_22 = arith.constant 0 : i32
    %75 = arith.sitofp %c0_i32_22 : i32 to bf16
    %76 = vector.shape_cast %22 : vector<1x256xi1> to vector<1x256xi1>
    %77 = vector.broadcast %76 : vector<1x256xi1> to vector<16x256xi1>
    %78 = vector.broadcast %75 : bf16 to vector<16x256xbf16>
    %79 = arith.select %77, %74, %78 : vector<16x256xi1>, vector<16x256xbf16>
    %80 = tpu.concatenate %33, %36, %44, %52, %25, %60, %68, %71, %79 in 0 : vector<16x256xbf16>, vector<16x256xbf16>, vector<16x256xbf16>, vector<16x256xbf16>, vector<16x256xbf16>, vector<16x256xbf16>, vector<16x256xbf16>, vector<16x256xbf16>, vector<16x256xbf16> -> vector<144x256xbf16>
    %cst_23 = arith.constant dense<0.000000e+00> : vector<1x256xf32>
    %81 = tpu.matmul %0, %80, %cst_23 {dimension_numbers = #tpu.dot_dimension_numbers<[1], [0], [0], [1], [0, 0, 1, 1], [], []>} : vector<1x144xbf16>, vector<144x256xbf16>, vector<1x256xf32> -> vector<1x256xf32>
    %82 = vector.broadcast %1 : vector<1x1xf32> to vector<1x256xf32>
    %83 = arith.addf %81, %82 : vector<1x256xf32>
    %c0_24 = arith.constant 0 : index
    %c0_25 = arith.constant 0 : index
    %c0_26 = arith.constant 0 : index
    %84 = vector.load %arg4[%c0_24, %c0_25, %c0_26] : memref<1x1x256xf32, #tpu.memory_space<vmem>>, vector<1x1x256xf32>
    %85 = vector.shape_cast %84 : vector<1x1x256xf32> to vector<1x256xf32>
    %86 = arith.addf %83, %85 : vector<1x256xf32>
    %c0_27 = arith.constant 0 : index
    %c0_28 = arith.constant 0 : index
    %c0_29 = arith.constant 0 : index
    %87 = vector.load %arg5[%c0_27, %c0_28, %c0_29] : memref<1x1x256xf32, #tpu.memory_space<vmem>>, vector<1x1x256xf32>
    %88 = vector.shape_cast %87 : vector<1x1x256xf32> to vector<1x256xf32>
    %89 = vector.shape_cast %86 : vector<1x256xf32> to vector<1x1x256xf32>
    tpu.vector_store %arg5[%c0_27, %c0_28, %c0_29], %89 {strides = array<i32>} : memref<1x1x256xf32, #tpu.memory_space<vmem>>, vector<1x1x256xf32>,
    return
  }
  func.func @transform_0(%arg0: i32) -> (i32, i32, i32) {
    %c0_i32 = arith.constant 0 : i32
    %c0_i32_0 = arith.constant 0 : i32
    %c0_i32_1 = arith.constant 0 : i32
    return %arg0, %c0_i32, %c0_i32_0 : i32, i32, i32
  }
  func.func @transform_1(%arg0: i32) -> (i32, i32) {
    %c0_i32 = arith.constant 0 : i32
    %c0_i32_0 = arith.constant 0 : i32
    %c0_i32_1 = arith.constant 0 : i32
    return %c0_i32, %c0_i32_0 : i32, i32
  }
  func.func @transform_2(%arg0: i32) -> (i32, i32) {
    %c0_i32 = arith.constant 0 : i32
    %c0_i32_0 = arith.constant 0 : i32
    %c0_i32_1 = arith.constant 0 : i32
    return %c0_i32, %c0_i32_0 : i32, i32
  }
  func.func @transform_3(%arg0: i32) -> (i32, i32, i32) {
    %c0_i32 = arith.constant 0 : i32
    %c0_i32_0 = arith.constant 0 : i32
    %c0_i32_1 = arith.constant 0 : i32
    return %arg0, %c0_i32, %c0_i32_0 : i32, i32, i32
  }
  func.func @transform_4(%arg0: i32) -> (i32, i32, i32) {
    %c0_i32 = arith.constant 0 : i32
    %c0_i32_0 = arith.constant 0 : i32
    %c0_i32_1 = arith.constant 0 : i32
    return %arg0, %c0_i32, %c0_i32_0 : i32, i32, i32
  }
}

</mosaic_0001>

<bundles_post_ra>
// kernel: _lambda_.11
= control target key start
LH: loop header
LB: loop body
LE: loop exit
PB: predicated region body
PF: predicated region fallthrough
CT: control target
= control target key end

     0   :  { %s645_s12 = smov 0   ;;  %s777_s0 = inlined_call_operand.vmem [shape: f32[2,1,256], index: 0, kind: input, shape index: {}]   ;;  %s778_s1 = inlined_call_operand.vmem [shape: bf16[16,9], index: 1, kind: input, shape index: {}]   ;;  %s779_s2 = inlined_call_operand.vmem [shape: f32[16,1], index: 2, kind: input, shape index: {}]   ;;  %s780_s3 = inlined_call_operand.vmem [shape: f32[2,16,256], index: 3, kind: output, shape index: {}]  }
   0x1 LB: > { %s568_s13 = sadd.s32 4294967295, %s613_s12   ;;  %p572_p0 = scmp.ge.s32.totalorder %s613_s12, 1  ;;  %s613_s12 = sphi %s645_s12, %s13_s12  }
   0x2   : > { %p136_p1 = scmp.lt.s32.totalorder %s613_s12, 3 }
   0x4   : > { %p137_p2 = pnand %p572_p0, %p136_p1 }
   0x5   : > { %p159_p3 = scmp.lt.s32.totalorder (!%p137_p2), %s568_s13, 1  ;;  %s615_s18 = smov (!%p137_p2), 16  }
   0x6   : > { %140 = sbr.rel (%p137_p2) target bundleno = 326 (0x146), region = 32  ;;  %s616_s19 = smov (!%p137_p2), 1  }
   0x7   : > { %s617_s20 = smov (!%p137_p2), 15   ;;  %s619_s21 = smov (!%p137_p2), 17  }
   0x8   : > { %s620_s22 = smov (!%p137_p2), 127   ;;  %s621_s23 = smov (!%p137_p2), 113  }
   0x9   : > { %s622_s24 = smov (!%p137_p2), 112   ;;  %s623_s25 = smov (!%p137_p2), 111  }
   0xb   : > { %s794_s13 = smov (!%p159_p3, %s568_s13), 1  ;;  %v618_v8 = vmov 0   ;;  %v175_v9 = vlaneseq  ;;  %vm263_vm6 = vcmask 121856   ;;  %vm254_vm9 = vcmask 130048   ;;  %v173_v39 = vld [vmem:[%s779_s2] sm:$0xff]  ;;  %v174_v40 = vld [vmem:[%s779_s2 + $0x8] sm:$0xff] }
   0xc   : > { %s573_s14 = sshll.u32 %s794_s13, 1  ;;  %604 = vset.pattern.permute.xlu1 %v618_v8  ;;  %605 = vset.pattern.permute.xlu2 %v618_v8  ;;  %v236_v28 = vunpack.c.l.b16 %v618_v8  ;;  %v237_v29 = vunpack.c.h.b16 %v618_v8  ;;  %vm294_vm12 = vcmask 7168   ;;  %vm222_vm13 = vcmask 138240   ;;  %v585_v51 = vld [vmem:[%s778_s1] sm:$0xff]  ;;  %s584_s5 = sshll.u32 %s794_s13, 5 }
   0xd   : > { %s162_s17 = scalar_lea.vmem %s777_s0, %s573_s14  ;;  %606 = vset.pattern.permute.xlu0 %v618_v8  ;;  %v176_v10 = vand.u32 127, %v175_v9  ;;  %s167_s8 = scalar_lea.vmem %s780_s3, %s584_s5 }
   0xe   : > { %v206_v0 = vld [vmem:[%s162_s17] sm:$0x3] }
   0xf   : > { %v208_v1 = vperm.slane %v206_v0, 0  ;;  %v209_v2 = vperm.slane %v206_v0, 1  ;;  %v177_v11 = vadd.s32 128, %v176_v10  ;;  %v182_v12 = vand.u32 15, %v176_v10 }
  0x11   : > { %v212_v3 = vpack.c.bf16 %v209_v2, %v208_v1  ;;  %v189_v13 = vand.u32 15, %v177_v11  ;;  %vm204_vm0 = vcmp.lt.s32.totalorder %v182_v12, 15  ;;  %vm202_vm2 = vcmp.ge.s32.totalorder %v182_v12, 1 }
  0x13   : > { %v214_v4 = vunpack.c.l.b16 %v212_v3  ;;  %v215_v6 = vunpack.c.h.b16 %v212_v3  ;;  %vm205_vm1 = vcmp.lt.s32.totalorder %v189_v13, 15  ;;  %vm203_vm3 = vcmp.ge.s32.totalorder %v189_v13, 1 }
  0x14   : > { %vm270_vm4 = vmpackc.low %vm205_vm1, %vm204_vm0 }
  0x15   : > { %v659_v5 = vpack.c.b16 %v214_v4, %v214_v4  ;;  %v664_v7 = vpack.c.b16 %v215_v6, %v215_v6  ;;  %vm230_vm5 = vmpackc.low %vm203_vm3, %vm202_vm2  ;;  %v271_v17 = vsel %vm270_vm4, 65537, %v618_v8  ;;  %vm401_vm3 = vcmask 1040384  }
  0x16   : > { %v231_v18 = vsel %vm230_vm5, 65537, %v618_v8  ;;  %v272_v21 = vperm.slane %v271_v17, 0  ;;  %v273_v25 = vperm.slane %v271_v17, 4  ;;  %vm402_vm5 = vsmask.f32 256 }
  0x17   : > { %250 = vrot.lane.b32.xlu1 %v659_v5, %s615_s18  ;;  %290 = vrot.lane.b32.xlu0 %v659_v5, %s616_s19  ;;  %v232_v23 = vperm.slane %v231_v18, 0  ;;  %v233_v24 = vperm.slane %v231_v18, 4 }
  0x18   : > { %259 = vrot.lane.b32.xlu2 %v659_v5, %s617_s20  ;;  %v274_v26 = vunpack.c.l.b16 %v272_v21  ;;  %v275_v27 = vunpack.c.h.b16 %v272_v21  ;;  %v281_v36 = vunpack.c.l.b16 %v273_v25  ;;  %v282_v37 = vunpack.c.h.b16 %v273_v25 }
  0x19   : > { %v234_v30 = vunpack.c.l.b16 %v232_v23  ;;  %v235_v31 = vunpack.c.h.b16 %v232_v23  ;;  %v241_v32 = vunpack.c.l.b16 %v233_v24  ;;  %v242_v33 = vunpack.c.h.b16 %v233_v24 }
  0x1a   : > { %vm278_vm7 = vcmp.ne.s32.totalorder %v274_v26, %v236_v28  ;;  %vm279_vm8 = vcmp.ne.s32.totalorder %v275_v27, %v237_v29  ;;  %vm285_vm1 = vcmp.ne.s32.totalorder %v281_v36, %v236_v28  ;;  %vm286_vm2 = vcmp.ne.s32.totalorder %v282_v37, %v237_v29 }
  0x1b   : > { %vm238_vm10 = vcmp.ne.s32.totalorder %v234_v30, %v236_v28  ;;  %vm239_vm11 = vcmp.ne.s32.totalorder %v235_v31, %v237_v29  ;;  %vm245_vm14 = vcmp.ne.s32.totalorder %v241_v32, %v236_v28  ;;  %vm246_vm15 = vcmp.ne.s32.totalorder %v242_v33, %v237_v29  ;;  %vm685_vm0 = vmpackc.low %vm279_vm8, %vm278_vm7 }
  0x1c   : > { %vm693_vm4 = vmpackc.low %vm239_vm11, %vm238_vm10  ;;  %vm307_vm8 = vcmask 1039360  }
  0x1d   : > { %vm699_vm7 = vmpackc.low %vm246_vm15, %vm245_vm14  ;;  %vm429_vm15 = vcmask 1042432  }
  0x1e   : > { %vm707_vm10 = vmpackc.low %vm286_vm2, %vm285_vm1  ;;  %vm430_vm1 = vsmask.f32 2304 }
  0x1f   : > { %252 = vrot.lane.b32.xlu1 %v664_v7, %s615_s18  ;;  %292 = vrot.lane.b32.xlu0 %v664_v7, %s616_s19  ;;  %vm716_vm11 = vmand %vm401_vm3, %vm402_vm5  ;;  %vm443_vm5 = vcmask 1043456  }
  0x20   : > { %261 = vrot.lane.b32.xlu2 %v664_v7, %s617_s20  ;;  %vm431_vm2 = vmand %vm429_vm15, %vm430_vm1 }
  0x27   : > { %220 = vrot.lane.b32.xlu1 %v664_v7, %s619_s21  ;;  %218 = vrot.lane.b32.xlu0 %v659_v5, %s619_s21 }
  0x28   : > { %303 = vrot.lane.b32.xlu2 %v659_v5, %s620_s22 }
  0x2f   : > { %316 = vrot.lane.b32.xlu1 %v659_v5, %s621_s23  ;;  %305 = vrot.lane.b32.xlu0 %v664_v7, %s620_s22 }
  0x30   : > { %318 = vrot.lane.b32.xlu2 %v664_v7, %s621_s23 }
  0x37   : > { %331 = vrot.lane.b32.xlu1 %v664_v7, %s622_s24  ;;  %329 = vrot.lane.b32.xlu0 %v659_v5, %s622_s24 }
  0x38   : > { %338 = vrot.lane.b32.xlu2 %v659_v5, %s623_s25 }
  0x3f   : > { %340 = vrot.lane.b32.xlu0 %v664_v7, %s623_s25  ;;  %457 = vperm.xlu1 %604, %v173_v39  }
  0x40   : > { %462 = vperm.xlu2 %605, %v174_v40  }
  0x72   : > { %v260_v14 = vpop.permute.xlu2 %259 }
  0x73   : > { %v268_v42 = vsel %vm263_vm6, 0, %v260_v14 }
  0x74   : > { %v288_v50 = vsel %vm685_vm0, %v268_v42, 0 }
  0x75   : > { %v360_v0 = vrot.slane %v288_v50, 7 }
  0x7a   : > { %v262_v22 = vpop.permute.xlu2 %261 }
  0x7b   : > { %v264_v52 = vsel %vm263_vm6, %v260_v14, %v262_v22  ;;  %vm415_vm6 = vcmask 1041408  }
  0x7c   : > { %v289_v1 = vsel %vm707_vm10, %v264_v52, 0 }
  0x7d   : > { %v361_v12 = vrot.slane %v289_v1, 7 }
  0x82   : > { %v304_v38 = vpop.permute.xlu2 %303 }
  0x89   : > { %v251_v15 = vpop.permute.xlu1 %250  ;;  %v291_v16 = vpop.permute.xlu0 %290 }
  0x8a   : > { %v258_v43 = vsel %vm254_vm9, 0, %v251_v15  ;;  %v299_v45 = vsel %vm294_vm12, 0, %v291_v16  ;;  %v319_v6 = vpop.permute.xlu2 %318 }
  0x8b   : > { %v351_v56 = vshll.u32 %v258_v43, 16  ;;  %v301_v57 = vsel %vm693_vm4, %v299_v45, 0 }
  0x8c   : > { %v363_v3 = vshll.u32 %v301_v57, 16 }
  0x8e   : > { %v365_v23 = vrot.slane %v363_v3, 7 }
  0x91   : > { %v253_v19 = vpop.permute.xlu1 %252  ;;  %v293_v20 = vpop.permute.xlu0 %292 }
  0x92   : > { %v295_v48 = vsel %vm294_vm12, %v291_v16, %v293_v20  ;;  %v255_v53 = vsel %vm254_vm9, %v251_v15, %v253_v19  ;;  %vm416_vm9 = vsmask.f32 1280  ;;  %vm320_vm12 = vcmask 924672   ;;  %v339_v36 = vpop.permute.xlu2 %338 }
  0x93   : > { %v302_v60 = vsel %vm699_vm7, %v295_v48, 0  ;;  %v354_v2 = vshll.u32 %v255_v53, 16  ;;  %v325_v14 = vsel %vm320_vm12, %v319_v6, 0  ;;  %v372_v15 = vrot.slane %v659_v5, 6  ;;  %vm739_vm14 = vmand %vm415_vm6, %vm416_vm9 }
  0x94   : > { %v367_v8 = vshll.u32 %v302_v60, 16  ;;  %v328_v27 = vsel %vm699_vm7, %v325_v14, 0  ;;  %v373_v5 = vrot.slane %v664_v7, 6 }
  0x96   : > { %v369_v24 = vrot.slane %v367_v8, 7 }
  0x99   : > { %v221_v34 = vpop.permute.xlu1 %220  ;;  %v219_v35 = vpop.permute.xlu0 %218 }
  0x9a   : > { %v228_v46 = vsel %vm222_vm13, 0, %v219_v35  ;;  %v223_v49 = vsel %vm222_vm13, %v219_v35, %v221_v34  ;;  %vm333_vm13 = vcmask 916480   ;;  %v387_v35 = vrot.slane %v328_v27, 5  ;;  %v463_v3 = vpop.permute.xlu2 %462 }
  0x9b   : > { %v248_v59 = vsel %vm693_vm4, %v228_v46, 0  ;;  %v249_v61 = vsel %vm699_vm7, %v223_v49, 0  ;;  %vm444_vm7 = vsmask.f32 3328 }
  0x9c   : > { %v404_v4 = vsel %vm716_vm11, %v248_v59, %v351_v56  ;;  %v405_v9 = vsel %vm716_vm11, %v249_v61, %v354_v2 }
  0x9d   : > { %v409_v13 = vsel %vm401_vm3, %v404_v4, %v360_v0  ;;  %v413_v17 = vsel %vm401_vm3, %v405_v9, %v361_v12  ;;  %vm342_vm3 = vcmask 908288  }
  0x9e   : > { %v418_v28 = vsel %vm739_vm14, %v409_v13, %v365_v23  ;;  %v419_v29 = vsel %vm739_vm14, %v413_v17, %v369_v24 }
  0x9f   : > { %v423_v37 = vsel %vm415_vm6, %v418_v28, %v372_v15  ;;  %v427_v40 = vsel %vm415_vm6, %v419_v29, %v373_v5 }
  0xa1   : > { %v317_v54 = vpop.permute.xlu1 %316  ;;  %v306_v55 = vpop.permute.xlu0 %305 }
  0xa2   : > { %v308_v62 = vsel %vm307_vm8, %v304_v38, %v306_v55  ;;  %v312_v63 = vsel %vm307_vm8, %v306_v55, 0  ;;  %v321_v20 = vsel %vm320_vm12, %v317_v54, %v319_v6  ;;  %vm474_vm8 = vcmask 1044480  }
  0xa3   : > { %v314_v10 = vsel %vm685_vm0, %v308_v62, 0  ;;  %v315_v11 = vsel %vm707_vm10, %v312_v63, 0  ;;  %v327_v30 = vsel %vm693_vm4, %v321_v20, 0  ;;  %v624_v38 = vmov 65535   ;;  %vm445_vm4 = vmand %vm443_vm5, %vm444_vm7 }
  0xa4   : > { %v375_v18 = vshll.u32 %v314_v10, 16  ;;  %v379_v19 = vshll.u32 %v315_v11, 16  ;;  %v386_v7 = vrot.slane %v327_v30, 5  ;;  %v475_v39 = vsel %vm443_vm5, 4294967295, %v624_v38 }
  0xa5   : > { %v476_v52 = vsel %vm474_vm8, %v475_v39, 0 }
  0xa6   : > { %v377_v31 = vrot.slane %v375_v18, 6  ;;  %v381_v32 = vrot.slane %v379_v19, 6 }
  0xa8   : > { %v432_v45 = vsel %vm431_vm2, %v423_v37, %v377_v31  ;;  %v433_v46 = vsel %vm431_vm2, %v427_v40, %v381_v32 }
  0xa9   : > { %v332_v21 = vpop.permute.xlu1 %331  ;;  %v330_v22 = vpop.permute.xlu0 %329  ;;  %v437_v55 = vsel %vm429_vm15, %v432_v45, %v386_v7  ;;  %v441_v56 = vsel %vm429_vm15, %v433_v46, %v387_v35 }
  0xaa   : > { %v337_v25 = vsel %vm333_vm13, %v332_v21, 0  ;;  %v334_v26 = vsel %vm333_vm13, %v330_v22, %v332_v21 }
  0xab   : > { %v392_v33 = vshll.u32 %v337_v25, 16  ;;  %v389_v34 = vshll.u32 %v334_v26, 16 }
  0xad   : > { %v394_v42 = vrot.slane %v392_v33, 5  ;;  %v391_v43 = vrot.slane %v389_v34, 5 }
  0xaf   : > { %v446_v57 = vsel %vm445_vm4, %v437_v55, %v391_v43  ;;  %v447_v58 = vsel %vm445_vm4, %v441_v56, %v394_v42 }
  0xb1   : > { %v341_v44 = vpop.permute.xlu0 %340  ;;  %v458_v62 = vpop.permute.xlu1 %457 }
  0xb2   : > { %v343_v47 = vsel %vm342_vm3, %v339_v36, %v341_v44  ;;  %v347_v48 = vsel %vm342_vm3, %v341_v44, 0 }
  0xb3   : > { %v349_v49 = vsel %vm685_vm0, %v343_v47, 0  ;;  %v350_v50 = vsel %vm707_vm10, %v347_v48, 0  ;;  %vm470_vm0 = vcmask 72704  }
  0xb4   : > { %v399_v53 = vrot.slane %v349_v49, 4  ;;  %v400_v54 = vrot.slane %v350_v50, 4 }
  0xb6   : > { %v451_v59 = vsel %vm443_vm5, %v446_v57, %v399_v53  ;;  %v454_v60 = vsel %vm443_vm5, %v447_v58, %v400_v54 }
  0xb7   : > { %v477_v41 = vand.u32 %v476_v52, %v451_v59  ;;  %v479_v61 = vand.u32 %v476_v52, %v454_v60 }
  0xb9   : > { %488 = vmatpush.bf16.msra.mxu0 %v477_v41  ;;  %502 = vmatpush.bf16.msra.mxu1 %v479_v61 }
  0xbc   : > { %580 = vmatmul.msk.bf16.vlgmr.msra.gmra.mxu0 %vm470_vm0, %v585_v51  ;;  %581 = vmatmul.msk.bf16.vlgmr.msra.gmra.mxu1 %vm470_vm0, %v585_v51 }
 0x139   : > { %v490_v63 = vpop.f32.mrf.mxu0  ;;  %v504_v0 = vpop.f32.mrf.mxu1 }
 0x13a   : > { %v491_v1 = vadd.f32 %v490_v63, %v458_v62  ;;  %v505_v2 = vadd.f32 %v504_v0, %v458_v62 }
 0x13c   : > { %509 = vst [vmem:[%s167_s8] sm:$0xff] %v491_v1 }
 0x13d   : > { %510 = vst [vmem:[%s167_s8 + $0x8] sm:$0xff] %v505_v2 }
 0x141   : > { %v492_v4 = vpop.f32.mrf.mxu0  ;;  %v506_v6 = vpop.f32.mrf.mxu1 }
 0x142   : > { %v493_v8 = vadd.f32 %v492_v4, %v463_v3  ;;  %v507_v9 = vadd.f32 %v506_v6, %v463_v3 }
 0x144   : > { %511 = vst [vmem:[%s167_s8 + $0x10] sm:$0xff] %v493_v8 }
 0x145   : > { %512 = vst [vmem:[%s167_s8 + $0x18] sm:$0xff] %v507_v9 }
 0x146 PF: > { %s13_s12 = sadd.s32 1, %s613_s12  }
 0x147   : > { %p10_p4 = scmp.ge.s32.totalorder %s13_s12, 4  }
 0x149   :  { %12 = sbr.rel (!%p10_p4) target bundleno = 1 (0x1), region = 62 }

// kernel: _lambda_.12
= control target key start
LH: loop header
LB: loop body
LE: loop exit
PB: predicated region body
PF: predicated region fallthrough
CT: control target
= control target key end

     0   :  { %s591_s12 = smov 0   ;;  %s715_s0 = inlined_call_operand.vmem [shape: f32[2,16,256], index: 0, kind: input, shape index: {}]   ;;  %s716_s1 = inlined_call_operand.vmem [shape: bf16[16,144], index: 1, kind: input, shape index: {}]   ;;  %s717_s2 = inlined_call_operand.vmem [shape: f32[16,1], index: 2, kind: input, shape index: {}]   ;;  %s718_s3 = inlined_call_operand.vmem [shape: f32[2,16,256], index: 3, kind: output, shape index: {}]  }
   0x1 LB: > { %s507_s13 = sadd.s32 4294967295, %s560_s12   ;;  %p511_p0 = scmp.ge.s32.totalorder %s560_s12, 1  ;;  %s560_s12 = sphi %s591_s12, %s13_s12  }
   0x2   : > { %p137_p1 = scmp.lt.s32.totalorder %s560_s12, 3 }
   0x4   : > { %p138_p2 = pnand %p511_p0, %p137_p1 }
   0x5   : > { %p161_p3 = scmp.lt.s32.totalorder (!%p138_p2), %s507_s13, 1  ;;  %s562_s18 = smov (!%p138_p2), 112  }
   0x6   : > { %141 = sbr.rel (%p138_p2) target bundleno = 320 (0x140), region = 32  ;;  %s563_s19 = smov (!%p138_p2), 113  }
   0x7   : > { %s564_s20 = smov (!%p138_p2), 127   ;;  %s565_s21 = smov (!%p138_p2), 1  }
   0x8   : > { %s566_s22 = smov (!%p138_p2), 15   ;;  %s567_s23 = smov (!%p138_p2), 16  }
   0x9   : > { %s568_s24 = smov (!%p138_p2), 17   ;;  %s569_s25 = smov (!%p138_p2), 111  }
   0xb   : > { %s728_s13 = smov (!%p161_p3, %s507_s13), 1  ;;  %v178_v12 = vlaneseq  ;;  %v570_v13 = vmov 0   ;;  %vm348_vm6 = vcmask 916480   ;;  %vm335_vm12 = vcmask 924672   ;;  %v532_v49 = vld [vmem:[%s716_s1 + $0x4] sm:$0xf] }
   0xc   : > { %s530_s14 = sshll.u32 %s728_s13, 5  ;;  %551 = vset.pattern.permute.xlu1 %v570_v13  ;;  %552 = vset.pattern.permute.xlu2 %v570_v13  ;;  %v245_v28 = vunpack.c.l.b16 %v570_v13  ;;  %v246_v29 = vunpack.c.h.b16 %v570_v13  ;;  %v520_v50 = vld [vmem:[%s716_s1 + $0x8] sm:$0xf0]  ;;  %v176_v62 = vld [vmem:[%s717_s2] sm:$0xff] }
   0xd   : > { %s165_s17 = scalar_lea.vmem %s715_s0, %s530_s14  ;;  %553 = vset.pattern.permute.xlu0 %v570_v13  ;;  %v179_v14 = vand.u32 127, %v178_v12  ;;  %v523_v59 = vor.u32 %v532_v49, %v520_v50  ;;  %v177_v63 = vld [vmem:[%s717_s2 + $0x8] sm:$0xff]  ;;  %s170_s16 = scalar_lea.vmem %s718_s3, %s530_s14 }
   0xe   : > { %v209_v0 = vld [vmem:[%s165_s17] sm:$0xff]  ;;  %v210_v1 = vld [vmem:[%s165_s17 + $0x8] sm:$0xff]  ;;  %v211_v2 = vld [vmem:[%s165_s17 + $0x10] sm:$0xff] }
   0xf   : > { %v212_v3 = vld [vmem:[%s165_s17 + $0x18] sm:$0xff]  ;;  %v213_v4 = vpack.c.bf16 %v210_v1, %v209_v0  ;;  %v180_v16 = vadd.s32 128, %v179_v14  ;;  %v185_v17 = vand.u32 15, %v179_v14  ;;  %v533_v14 = vld [vmem:[%s716_s1 + $0x4] sm:$0xf0] }
  0x10   : > { %v214_v5 = vpack.c.bf16 %v212_v3, %v211_v2 }
  0x11   : > { %v218_v6 = vunpack.c.h.b16 %v213_v4  ;;  %v217_v7 = vunpack.c.l.b16 %v213_v4  ;;  %v192_v18 = vand.u32 15, %v180_v16  ;;  %vm205_vm0 = vcmp.ge.s32.totalorder %v185_v17, 1 }
  0x12   : > { %v220_v8 = vunpack.c.h.b16 %v214_v5  ;;  %v219_v9 = vunpack.c.l.b16 %v214_v5  ;;  %vm207_vm3 = vcmp.lt.s32.totalorder %v185_v17, 15 }
  0x13   : > { %vm206_vm1 = vcmp.ge.s32.totalorder %v192_v18, 1  ;;  %vm208_vm4 = vcmp.lt.s32.totalorder %v192_v18, 15 }
  0x14   : > { %v607_v10 = vpack.c.b16 %v220_v8, %v218_v6  ;;  %v609_v11 = vpack.c.b16 %v219_v9, %v217_v7  ;;  %vm239_vm2 = vmpackc.low %vm206_vm1, %vm205_vm0  ;;  %vm322_vm0 = vcmask 1039360  }
  0x15   : > { %v240_v20 = vsel %vm239_vm2, 65537, %v570_v13  ;;  %vm285_vm5 = vmpackc.low %vm208_vm4, %vm207_vm3  ;;  %vm359_vm3 = vcmask 908288  }
  0x16   : > { %346 = vrot.lane.b32.xlu0 %v607_v10, %s562_s18  ;;  %344 = vrot.lane.b32.xlu1 %v609_v11, %s562_s18  ;;  %v241_v22 = vperm.slane %v240_v20, 0  ;;  %v286_v23 = vsel %vm285_vm5, 65537, %v570_v13  ;;  %v242_v24 = vperm.slane %v240_v20, 4  ;;  %v518_v13 = vld [vmem:[%s716_s1] sm:$0xf] }
  0x17   : > { %331 = vrot.lane.b32.xlu2 %v609_v11, %s563_s19  ;;  %v287_v25 = vperm.slane %v286_v23, 0  ;;  %v288_v34 = vperm.slane %v286_v23, 4 }
  0x18   : > { %v243_v26 = vunpack.c.l.b16 %v241_v22  ;;  %v244_v27 = vunpack.c.h.b16 %v241_v22  ;;  %v250_v32 = vunpack.c.l.b16 %v242_v24  ;;  %v251_v33 = vunpack.c.h.b16 %v242_v24 }
  0x19   : > { %v289_v38 = vunpack.c.l.b16 %v287_v25  ;;  %v290_v39 = vunpack.c.h.b16 %v287_v25  ;;  %v296_v40 = vunpack.c.l.b16 %v288_v34  ;;  %v297_v41 = vunpack.c.h.b16 %v288_v34 }
  0x1a   : > { %vm247_vm7 = vcmp.ne.s32.totalorder %v243_v26, %v245_v28  ;;  %vm248_vm8 = vcmp.ne.s32.totalorder %v244_v27, %v246_v29  ;;  %vm254_vm9 = vcmp.ne.s32.totalorder %v250_v32, %v245_v28  ;;  %vm255_vm10 = vcmp.ne.s32.totalorder %v251_v33, %v246_v29 }
  0x1b   : > { %vm631_vm11 = vmpackc.low %vm248_vm8, %vm247_vm7  ;;  %vm293_vm14 = vcmp.ne.s32.totalorder %v289_v38, %v245_v28  ;;  %vm294_vm15 = vcmp.ne.s32.totalorder %v290_v39, %v246_v29  ;;  %vm300_vm1 = vcmp.ne.s32.totalorder %v296_v40, %v245_v28  ;;  %vm301_vm2 = vcmp.ne.s32.totalorder %v297_v41, %v246_v29 }
  0x1c   : > { %vm635_vm13 = vmpackc.low %vm255_vm10, %vm254_vm9  ;;  %vm309_vm7 = vcmask 7168   ;;  %vm274_vm8 = vcmask 121856   ;;  %vm227_vm10 = vcmask 138240  }
  0x1d   : > { %vm652_vm4 = vmpackc.low %vm294_vm15, %vm293_vm14 }
  0x1e   : > { %333 = vrot.lane.b32.xlu0 %v607_v10, %s563_s19  ;;  %320 = vrot.lane.b32.xlu1 %v607_v10, %s564_s20  ;;  %vm657_vm5 = vmpackc.low %vm301_vm2, %vm300_vm1 }
  0x1f   : > { %318 = vrot.lane.b32.xlu2 %v609_v11, %s564_s20 }
  0x26   : > { %305 = vrot.lane.b32.xlu0 %v609_v11, %s565_s21  ;;  %307 = vrot.lane.b32.xlu1 %v607_v10, %s565_s21 }
  0x27   : > { %270 = vrot.lane.b32.xlu2 %v609_v11, %s566_s22 }
  0x2e   : > { %272 = vrot.lane.b32.xlu0 %v607_v10, %s566_s22  ;;  %259 = vrot.lane.b32.xlu1 %v609_v11, %s567_s23 }
  0x2f   : > { %261 = vrot.lane.b32.xlu2 %v607_v10, %s567_s23 }
  0x36   : > { %223 = vrot.lane.b32.xlu0 %v609_v11, %s568_s24  ;;  %225 = vrot.lane.b32.xlu1 %v607_v10, %s568_s24 }
  0x37   : > { %357 = vrot.lane.b32.xlu2 %v607_v10, %s569_s25 }
  0x3e   : > { %355 = vrot.lane.b32.xlu0 %v609_v11, %s569_s25  ;;  %372 = vperm.xlu1 %551, %v176_v62  }
  0x3f   : > { %377 = vperm.xlu2 %552, %v177_v63  }
  0x71   : > { %v332_v15 = vpop.permute.xlu2 %331 }
  0x79   : > { %v319_v19 = vpop.permute.xlu2 %318 }
  0x81   : > { %v627_v21 = vpop.permute.xlu2 %270 }
  0x82   : > { %v279_v6 = vsel %vm274_vm8, 0, %v627_v21 }
  0x88   : > { %v347_v30 = vpop.permute.xlu0 %346  ;;  %v345_v31 = vpop.permute.xlu1 %344 }
  0x89   : > { %v353_v35 = vsel %vm348_vm6, %v347_v30, 0  ;;  %v349_v36 = vsel %vm348_vm6, %v345_v31, %v347_v30  ;;  %v629_v37 = vpop.permute.xlu2 %261  ;;  %vm263_vm6 = vcmask 130048  }
  0x8a   : > { %420 = vmatpush.bf16.msra.mxu2 %v353_v35  ;;  %392 = vmatpush.bf16.msra.mxu0 %v349_v36  ;;  %vm524_vm9 = vmneg %vm263_vm6 }
  0x90   : > { %v334_v44 = vpop.permute.xlu0 %333  ;;  %v321_v45 = vpop.permute.xlu1 %320 }
  0x91   : > { %v336_v46 = vsel %vm335_vm12, %v332_v15, %v334_v44  ;;  %v340_v47 = vsel %vm335_vm12, %v334_v44, 0  ;;  %v639_v48 = vpop.permute.xlu2 %357  ;;  %v323_v54 = vsel %vm322_vm0, %v319_v19, %v321_v45  ;;  %v327_v56 = vsel %vm322_vm0, %v321_v45, 0 }
  0x92   : > { %v342_v51 = vsel %vm631_vm11, %v336_v46, 0  ;;  %v343_v52 = vsel %vm635_vm13, %v340_v47, 0  ;;  %v364_v57 = vsel %vm359_vm3, %v639_v48, 0  ;;  %v329_v60 = vsel %vm652_vm4, %v323_v54, 0 }
  0x93   : > { %393 = vmatpush.bf16.msra.mxu0 %v342_v51  ;;  %421 = vmatpush.bf16.msra.mxu2 %v343_v52  ;;  %v367_v58 = vsel %vm657_vm5, %v364_v57, 0  ;;  %v330_v61 = vsel %vm657_vm5, %v327_v56, 0 }
  0x94   : > { %441 = vmatpush.bf16.msra.mxu3 %v367_v58 }
  0x97   : > { %394 = vmatpush.bf16.msra.mxu0 %v329_v60  ;;  %422 = vmatpush.bf16.msra.mxu2 %v330_v61 }
  0x98   : > { %v306_v0 = vpop.permute.xlu0 %305  ;;  %v308_v1 = vpop.permute.xlu1 %307  ;;  %527 = vmatmul.msk.bf16.vlgmr.msra.gmra.mxu3 %vm263_vm6, %v523_v59 }
  0x99   : > { %v314_v2 = vsel %vm309_vm7, 0, %v306_v0  ;;  %v310_v3 = vsel %vm309_vm7, %v306_v0, %v308_v1  ;;  %v378_v34 = vpop.permute.xlu2 %377 }
  0x9a   : > { %v316_v4 = vsel %vm631_vm11, %v314_v2, 0  ;;  %v317_v5 = vsel %vm635_vm13, %v310_v3, 0 }
  0x9b   : > { %395 = vmatpush.bf16.msra.mxu0 %v609_v11  ;;  %423 = vmatpush.bf16.msra.mxu2 %v607_v10  ;;  %v303_v10 = vsel %vm652_vm4, %v279_v6, 0 }
  0x9f   : > { %396 = vmatpush.bf16.msra.mxu0 %v316_v4  ;;  %424 = vmatpush.bf16.msra.mxu2 %v317_v5 }
  0xa0   : > { %v273_v7 = vpop.permute.xlu0 %272  ;;  %v260_v8 = vpop.permute.xlu1 %259 }
  0xa1   : > { %v275_v9 = vsel %vm274_vm8, %v627_v21, %v273_v7  ;;  %v264_v12 = vsel %vm263_vm6, %v260_v8, %v629_v37  ;;  %v519_v21 = vor.u32 %v533_v14, %v518_v13 }
  0xa2   : > { %v304_v11 = vsel %vm657_vm5, %v275_v9, 0 }
  0xa3   : > { %397 = vmatpush.bf16.msra.mxu0 %v303_v10  ;;  %425 = vmatpush.bf16.msra.mxu2 %v304_v11 }
  0xa7   : > { %525 = vmatpush.bf16.msk.msra.mxu0 %vm524_vm9, %v260_v8  ;;  %426 = vmatpush.bf16.msra.mxu2 %v264_v12 }
  0xa8   : > { %v224_v15 = vpop.permute.xlu0 %223  ;;  %v226_v16 = vpop.permute.xlu1 %225 }
  0xa9   : > { %v233_v17 = vsel %vm227_vm10, 0, %v224_v15  ;;  %v228_v18 = vsel %vm227_vm10, %v224_v15, %v226_v16 }
  0xaa   : > { %v257_v19 = vsel %vm631_vm11, %v233_v17, 0  ;;  %v258_v20 = vsel %vm635_vm13, %v228_v18, 0 }
  0xab   : > { %399 = vmatpush.bf16.msra.mxu0 %v257_v19  ;;  %427 = vmatpush.bf16.msra.mxu2 %v258_v20 }
  0xae   : > { %400 = vmatmul.bf16.vlgmr.msra.gmra.mxu0 %v519_v21  ;;  %428 = vmatmul.bf16.vlgmr.msra.gmra.mxu2 %v519_v21 }
  0xb0   : > { %v356_v22 = vpop.permute.xlu0 %355  ;;  %v373_v26 = vpop.permute.xlu1 %372 }
  0xb1   : > { %v360_v23 = vsel %vm359_vm3, %v356_v22, %v639_v48 }
  0xb2   : > { %v366_v24 = vsel %vm652_vm4, %v360_v23, 0 }
  0xb3   : > { %413 = vmatpush.bf16.msra.mxu1 %v366_v24 }
  0xb6   : > { %526 = vmatmul.msk.bf16.vlgmr.msra.gmra.mxu1 %vm263_vm6, %v523_v59 }
 0x11b   : > { %v443_v28 = vpop.f32.mrf.mxu3 }
 0x123   : > { %v445_v39 = vpop.f32.mrf.mxu3 }
 0x12b   : > { %v401_v25 = vpop.f32.mrf.mxu0 }
 0x12c   : > { %v402_v27 = vadd.f32 %v401_v25, %v373_v26 }
 0x131   : > { %v429_v29 = vpop.f32.mrf.mxu2 }
 0x132   : > { %v430_v30 = vadd.f32 %v429_v29, %v373_v26 }
 0x133   : > { %v415_v31 = vpop.f32.mrf.mxu1  ;;  %v403_v35 = vpop.f32.mrf.mxu0 }
 0x134   : > { %v444_v32 = vadd.f32 %v443_v28, %v430_v30  ;;  %v416_v33 = vadd.f32 %v415_v31, %v402_v27  ;;  %v404_v37 = vadd.f32 %v403_v35, %v378_v34 }
 0x136   : > { %449 = vst [vmem:[%s170_s16 + $0x8] sm:$0xff] %v444_v32 }
 0x137   : > { %448 = vst [vmem:[%s170_s16] sm:$0xff] %v416_v33 }
 0x139   : > { %v431_v36 = vpop.f32.mrf.mxu2 }
 0x13a   : > { %v432_v38 = vadd.f32 %v431_v36, %v378_v34 }
 0x13b   : > { %v417_v40 = vpop.f32.mrf.mxu1 }
 0x13c   : > { %v446_v41 = vadd.f32 %v445_v39, %v432_v38  ;;  %v418_v42 = vadd.f32 %v417_v40, %v404_v37 }
 0x13e   : > { %451 = vst [vmem:[%s170_s16 + $0x18] sm:$0xff] %v446_v41 }
 0x13f   : > { %450 = vst [vmem:[%s170_s16 + $0x10] sm:$0xff] %v418_v42 }
 0x140 PF: > { %s13_s12 = sadd.s32 1, %s560_s12  }
 0x141   : > { %p10_p4 = scmp.ge.s32.totalorder %s13_s12, 4  }
 0x143   :  { %12 = sbr.rel (!%p10_p4) target bundleno = 1 (0x1), region = 62 }

// kernel: _lambda_.13
= control target key start
LH: loop header
LB: loop body
LE: loop exit
PB: predicated region body
PF: predicated region fallthrough
CT: control target
= control target key end

     0   :  { %s566_s12 = smov 0   ;;  %s674_s0 = inlined_call_operand.vmem [shape: f32[2,16,256], index: 0, kind: input, shape index: {}]   ;;  %s675_s1 = inlined_call_operand.vmem [shape: bf16[8,144], index: 1, kind: input, shape index: {}]   ;;  %s676_s2 = inlined_call_operand.vmem [shape: f32[8,1], index: 2, kind: input, shape index: {}]   ;;  %s677_s3 = inlined_call_operand.vmem [shape: f32[2,8,256], index: 3, kind: output, shape index: {}]  }
   0x1 LB: > { %s493_s13 = sadd.s32 4294967295, %s535_s12   ;;  %p497_p0 = scmp.ge.s32.totalorder %s535_s12, 1  ;;  %s535_s12 = sphi %s566_s12, %s13_s12  }
   0x2   : > { %p137_p1 = scmp.lt.s32.totalorder %s535_s12, 3 }
   0x4   : > { %p138_p2 = pnand %p497_p0, %p137_p1 }
   0x5   : > { %p161_p3 = scmp.lt.s32.totalorder (!%p138_p2), %s493_s13, 1  ;;  %s537_s18 = smov (!%p138_p2), 112  }
   0x6   : > { %141 = sbr.rel (%p138_p2) target bundleno = 316 (0x13c), region = 32  ;;  %s538_s19 = smov (!%p138_p2), 113  }
   0x7   : > { %s539_s20 = smov (!%p138_p2), 127   ;;  %s540_s21 = smov (!%p138_p2), 1  }
   0x8   : > { %s541_s22 = smov (!%p138_p2), 15   ;;  %s542_s23 = smov (!%p138_p2), 16  }
   0x9   : > { %s543_s24 = smov (!%p138_p2), 17   ;;  %s544_s25 = smov (!%p138_p2), 111  }
   0xb   : > { %s687_s13 = smov (!%p161_p3, %s493_s13), 1  ;;  %v176_v12 = vlaneseq  ;;  %v545_v13 = vmov 0   ;;  %vm346_vm6 = vcmask 916480   ;;  %v607_v42 = vld [vmem:[%s675_s1] sm:$0xff]  ;;  %vm333_vm12 = vcmask 924672  }
   0xc   : > { %s508_s14 = sshll.u32 %s687_s13, 5  ;;  %527 = vset.pattern.permute.xlu1 %v545_v13  ;;  %528 = vset.pattern.permute.xlu0 %v545_v13  ;;  %v243_v27 = vunpack.c.l.b16 %v545_v13  ;;  %v244_v28 = vunpack.c.h.b16 %v545_v13  ;;  %v375_v47 = vunpack.c.h.b16 %v607_v42  ;;  %v175_v62 = vld [vmem:[%s676_s2] sm:$0xff]  ;;  %s509_s30 = sshll.u32 %s687_s13, 4 }
   0xd   : > { %s165_s17 = scalar_lea.vmem %s674_s0, %s508_s14  ;;  %v177_v14 = vand.u32 127, %v176_v12  ;;  %v374_v12 = vunpack.c.l.b16 %v607_v42  ;;  %s170_s6 = scalar_lea.vmem %s677_s3, %s509_s30 }
   0xe   : > { %v207_v0 = vld [vmem:[%s165_s17] sm:$0xff]  ;;  %v208_v1 = vld [vmem:[%s165_s17 + $0x8] sm:$0xff]  ;;  %v209_v2 = vld [vmem:[%s165_s17 + $0x10] sm:$0xff]  ;;  %v377_v59 = vpack.c.b16 %v375_v47, %v375_v47 }
   0xf   : > { %v210_v3 = vld [vmem:[%s165_s17 + $0x18] sm:$0xff]  ;;  %v211_v4 = vpack.c.bf16 %v208_v1, %v207_v0  ;;  %v178_v16 = vadd.s32 128, %v177_v14  ;;  %v183_v17 = vand.u32 15, %v177_v14 }
  0x10   : > { %v212_v5 = vpack.c.bf16 %v210_v3, %v209_v2 }
  0x11   : > { %v216_v6 = vunpack.c.h.b16 %v211_v4  ;;  %v215_v7 = vunpack.c.l.b16 %v211_v4  ;;  %v190_v18 = vand.u32 15, %v178_v16  ;;  %vm203_vm0 = vcmp.ge.s32.totalorder %v183_v17, 1 }
  0x12   : > { %v218_v8 = vunpack.c.h.b16 %v212_v5  ;;  %v217_v9 = vunpack.c.l.b16 %v212_v5  ;;  %vm205_vm3 = vcmp.lt.s32.totalorder %v183_v17, 15 }
  0x13   : > { %vm204_vm1 = vcmp.ge.s32.totalorder %v190_v18, 1  ;;  %vm206_vm4 = vcmp.lt.s32.totalorder %v190_v18, 15 }
  0x14   : > { %v580_v10 = vpack.c.b16 %v218_v8, %v216_v6  ;;  %v582_v11 = vpack.c.b16 %v217_v9, %v215_v7  ;;  %vm237_vm2 = vmpackc.low %vm204_vm1, %vm203_vm0  ;;  %vm320_vm0 = vcmask 1039360  }
  0x15   : > { %v238_v20 = vsel %vm237_vm2, 65537, %v545_v13  ;;  %vm283_vm5 = vmpackc.low %vm206_vm4, %vm205_vm3  ;;  %vm357_vm3 = vcmask 908288  }
  0x16   : > { %344 = vrot.lane.b32.xlu0 %v580_v10, %s537_s18  ;;  %342 = vrot.lane.b32.xlu1 %v582_v11, %s537_s18  ;;  %v239_v22 = vperm.slane %v238_v20, 0  ;;  %v240_v23 = vperm.slane %v238_v20, 4  ;;  %v284_v24 = vsel %vm283_vm5, 65537, %v545_v13 }
  0x17   : > { %329 = vrot.lane.b32.xlu2 %v582_v11, %s538_s19  ;;  %v285_v29 = vperm.slane %v284_v24, 0  ;;  %v286_v34 = vperm.slane %v284_v24, 4 }
  0x18   : > { %v241_v25 = vunpack.c.l.b16 %v239_v22  ;;  %v242_v26 = vunpack.c.h.b16 %v239_v22  ;;  %v248_v32 = vunpack.c.l.b16 %v240_v23  ;;  %v249_v33 = vunpack.c.h.b16 %v240_v23 }
  0x19   : > { %v287_v38 = vunpack.c.l.b16 %v285_v29  ;;  %v288_v39 = vunpack.c.h.b16 %v285_v29  ;;  %v294_v40 = vunpack.c.l.b16 %v286_v34  ;;  %v295_v41 = vunpack.c.h.b16 %v286_v34 }
  0x1a   : > { %vm245_vm7 = vcmp.ne.s32.totalorder %v241_v25, %v243_v27  ;;  %vm246_vm8 = vcmp.ne.s32.totalorder %v242_v26, %v244_v28  ;;  %vm252_vm9 = vcmp.ne.s32.totalorder %v248_v32, %v243_v27  ;;  %vm253_vm10 = vcmp.ne.s32.totalorder %v249_v33, %v244_v28 }
  0x1b   : > { %vm609_vm11 = vmpackc.low %vm246_vm8, %vm245_vm7  ;;  %vm291_vm14 = vcmp.ne.s32.totalorder %v287_v38, %v243_v27  ;;  %vm292_vm15 = vcmp.ne.s32.totalorder %v288_v39, %v244_v28  ;;  %vm298_vm1 = vcmp.ne.s32.totalorder %v294_v40, %v243_v27  ;;  %vm299_vm2 = vcmp.ne.s32.totalorder %v295_v41, %v244_v28 }
  0x1c   : > { %vm613_vm13 = vmpackc.low %vm253_vm10, %vm252_vm9  ;;  %vm307_vm7 = vcmask 7168   ;;  %vm272_vm8 = vcmask 121856   ;;  %vm225_vm10 = vcmask 138240  }
  0x1d   : > { %vm622_vm4 = vmpackc.low %vm292_vm15, %vm291_vm14 }
  0x1e   : > { %331 = vrot.lane.b32.xlu0 %v580_v10, %s538_s19  ;;  %318 = vrot.lane.b32.xlu1 %v580_v10, %s539_s20  ;;  %vm627_vm5 = vmpackc.low %vm299_vm2, %vm298_vm1 }
  0x1f   : > { %316 = vrot.lane.b32.xlu2 %v582_v11, %s539_s20 }
  0x26   : > { %303 = vrot.lane.b32.xlu0 %v582_v11, %s540_s21  ;;  %305 = vrot.lane.b32.xlu1 %v580_v10, %s540_s21 }
  0x27   : > { %268 = vrot.lane.b32.xlu2 %v582_v11, %s541_s22 }
  0x2e   : > { %270 = vrot.lane.b32.xlu0 %v580_v10, %s541_s22  ;;  %257 = vrot.lane.b32.xlu1 %v582_v11, %s542_s23 }
  0x2f   : > { %259 = vrot.lane.b32.xlu2 %v580_v10, %s542_s23 }
  0x36   : > { %221 = vrot.lane.b32.xlu0 %v582_v11, %s543_s24  ;;  %223 = vrot.lane.b32.xlu1 %v580_v10, %s543_s24 }
  0x37   : > { %355 = vrot.lane.b32.xlu2 %v580_v10, %s544_s25 }
  0x3e   : > { %353 = vrot.lane.b32.xlu0 %v582_v11, %s544_s25  ;;  %370 = vperm.xlu1 %527, %v175_v62  }
  0x71   : > { %v330_v15 = vpop.permute.xlu2 %329 }
  0x79   : > { %v317_v19 = vpop.permute.xlu2 %316 }
  0x81   : > { %v600_v21 = vpop.permute.xlu2 %268 }
  0x82   : > { %v277_v5 = vsel %vm272_vm8, 0, %v600_v21 }
  0x83   : > { %v301_v9 = vsel %vm622_vm4, %v277_v5, 0 }
  0x88   : > { %v345_v30 = vpop.permute.xlu0 %344  ;;  %v343_v31 = vpop.permute.xlu1 %342 }
  0x89   : > { %v351_v35 = vsel %vm346_vm6, %v345_v30, 0  ;;  %v347_v36 = vsel %vm346_vm6, %v343_v31, %v345_v30  ;;  %v602_v37 = vpop.permute.xlu2 %259  ;;  %vm261_vm6 = vcmask 130048  }
  0x8a   : > { %408 = vmatpush.bf16.msra.mxu2 %v351_v35  ;;  %382 = vmatpush.bf16.msra.mxu0 %v347_v36  ;;  %vm502_vm9 = vmneg %vm261_vm6 }
  0x90   : > { %v332_v45 = vpop.permute.xlu0 %331  ;;  %v319_v46 = vpop.permute.xlu1 %318 }
  0x91   : > { %v334_v48 = vsel %vm333_vm12, %v330_v15, %v332_v45  ;;  %v338_v49 = vsel %vm333_vm12, %v332_v45, 0  ;;  %v356_v50 = vpop.permute.xlu2 %355  ;;  %v321_v54 = vsel %vm320_vm0, %v317_v19, %v319_v46  ;;  %v325_v56 = vsel %vm320_vm0, %v319_v46, 0 }
  0x92   : > { %v340_v51 = vsel %vm609_vm11, %v334_v48, 0  ;;  %v341_v52 = vsel %vm613_vm13, %v338_v49, 0  ;;  %v362_v57 = vsel %vm357_vm3, %v356_v50, 0  ;;  %v327_v60 = vsel %vm622_vm4, %v321_v54, 0 }
  0x93   : > { %383 = vmatpush.bf16.msra.mxu0 %v340_v51  ;;  %409 = vmatpush.bf16.msra.mxu2 %v341_v52  ;;  %v365_v58 = vsel %vm627_vm5, %v362_v57, 0  ;;  %v328_v61 = vsel %vm627_vm5, %v325_v56, 0  ;;  %v376_v19 = vpack.c.b16 %v374_v12, %v374_v12 }
  0x94   : > { %428 = vmatpush.bf16.msra.mxu3 %v365_v58 }
  0x97   : > { %384 = vmatpush.bf16.msra.mxu0 %v327_v60  ;;  %410 = vmatpush.bf16.msra.mxu2 %v328_v61 }
  0x98   : > { %v304_v63 = vpop.permute.xlu0 %303  ;;  %v306_v0 = vpop.permute.xlu1 %305  ;;  %505 = vmatmul.msk.bf16.vlgmr.msra.gmra.mxu3 %vm261_vm6, %v377_v59 }
  0x99   : > { %v312_v1 = vsel %vm307_vm7, 0, %v304_v63  ;;  %v308_v2 = vsel %vm307_vm7, %v304_v63, %v306_v0 }
  0x9a   : > { %v314_v3 = vsel %vm609_vm11, %v312_v1, 0  ;;  %v315_v4 = vsel %vm613_vm13, %v308_v2, 0 }
  0x9b   : > { %385 = vmatpush.bf16.msra.mxu0 %v582_v11  ;;  %411 = vmatpush.bf16.msra.mxu2 %v580_v10 }
  0x9f   : > { %386 = vmatpush.bf16.msra.mxu0 %v314_v3  ;;  %412 = vmatpush.bf16.msra.mxu2 %v315_v4 }
  0xa0   : > { %v271_v6 = vpop.permute.xlu0 %270  ;;  %v258_v7 = vpop.permute.xlu1 %257 }
  0xa1   : > { %v273_v8 = vsel %vm272_vm8, %v600_v21, %v271_v6  ;;  %v262_v11 = vsel %vm261_vm6, %v258_v7, %v602_v37 }
  0xa2   : > { %v302_v10 = vsel %vm627_vm5, %v273_v8, 0 }
  0xa3   : > { %387 = vmatpush.bf16.msra.mxu0 %v301_v9  ;;  %413 = vmatpush.bf16.msra.mxu2 %v302_v10 }
  0xa7   : > { %503 = vmatpush.bf16.msk.msra.mxu0 %vm502_vm9, %v258_v7  ;;  %414 = vmatpush.bf16.msra.mxu2 %v262_v11 }
  0xa8   : > { %v222_v13 = vpop.permute.xlu0 %221  ;;  %v224_v14 = vpop.permute.xlu1 %223 }
  0xa9   : > { %v231_v15 = vsel %vm225_vm10, 0, %v222_v13  ;;  %v226_v16 = vsel %vm225_vm10, %v222_v13, %v224_v14 }
  0xaa   : > { %v255_v17 = vsel %vm609_vm11, %v231_v15, 0  ;;  %v256_v18 = vsel %vm613_vm13, %v226_v16, 0 }
  0xab   : > { %389 = vmatpush.bf16.msra.mxu0 %v255_v17  ;;  %415 = vmatpush.bf16.msra.mxu2 %v256_v18 }
  0xae   : > { %390 = vmatmul.bf16.vlgmr.msra.gmra.mxu0 %v376_v19  ;;  %416 = vmatmul.bf16.vlgmr.msra.gmra.mxu2 %v376_v19 }
  0xb0   : > { %v354_v20 = vpop.permute.xlu0 %353  ;;  %v371_v26 = vpop.permute.xlu1 %370 }
  0xb1   : > { %v358_v21 = vsel %vm357_vm3, %v354_v20, %v356_v50 }
  0xb2   : > { %v364_v22 = vsel %vm622_vm4, %v358_v21, 0 }
  0xb3   : > { %402 = vmatpush.bf16.msra.mxu1 %v364_v22 }
  0xb6   : > { %504 = vmatmul.msk.bf16.vlgmr.msra.gmra.mxu1 %vm261_vm6, %v377_v59 }
 0x11b   : > { %v430_v23 = vpop.f32.mrf.mxu3 }
 0x123   : > { %v432_v24 = vpop.f32.mrf.mxu3 }
 0x12b   : > { %v391_v25 = vpop.f32.mrf.mxu0 }
 0x12c   : > { %v392_v27 = vadd.f32 %v391_v25, %v371_v26 }
 0x131   : > { %v417_v28 = vpop.f32.mrf.mxu2 }
 0x132   : > { %v418_v29 = vadd.f32 %v417_v28, %v371_v26 }
 0x133   : > { %v393_v30 = vpop.f32.mrf.mxu0  ;;  %v404_v31 = vpop.f32.mrf.mxu1 }
 0x134   : > { %v431_v32 = vadd.f32 %v430_v23, %v418_v29  ;;  %v405_v33 = vadd.f32 %v404_v31, %v392_v27 }
 0x136   : > { %v435_v34 = vmax.f32 %v431_v32, 0.0  ;;  %v434_v35 = vmax.f32 %v405_v33, 0.0 }
 0x138   : > { %436 = vst [vmem:[%s170_s6] sm:$0xff] %v434_v35 }
 0x139   : > { %437 = vst [vmem:[%s170_s6 + $0x8] sm:$0xff] %v435_v34  ;;  %v419_v36 = vpop.f32.mrf.mxu2 }
 0x13b   : > { %v406_v37 = vpop.f32.mrf.mxu1 }
 0x13c PF: > { %s13_s12 = sadd.s32 1, %s535_s12  }
 0x13d   : > { %p10_p4 = scmp.ge.s32.totalorder %s13_s12, 4  }
 0x13f   :  { %12 = sbr.rel (!%p10_p4) target bundleno = 1 (0x1), region = 62 }

// kernel: _lambda_.15
= control target key start
LH: loop header
LB: loop body
LE: loop exit
PB: predicated region body
PF: predicated region fallthrough
CT: control target
= control target key end

     0   :  { %s495_s18 = smov 0   ;;  %s529_s0 = inlined_call_operand.vmem [shape: f32[2,16,256], index: 0, kind: input, shape index: {}]   ;;  %s530_s1 = inlined_call_operand.vmem [shape: f32[2,8,256], index: 1, kind: input, shape index: {}]   ;;  %s531_s2 = inlined_call_operand.vmem [shape: f32[2,8,256], index: 2, kind: input, shape index: {}]   ;;  %s532_s3 = inlined_call_operand.vmem [shape: bf16[8,32], index: 3, kind: input, shape index: {}]   ;;  %s533_s4 = inlined_call_operand.vmem [shape: f32[8,1], index: 4, kind: input, shape index: {}]   ;;  %s534_s5 = inlined_call_operand.vmem [shape: f32[2,8,256], index: 5, kind: output, shape index: {}]  }
   0x1 LB: > { %s425_s19 = sadd.s32 4294967295, %s462_s18   ;;  %p429_p0 = scmp.ge.s32.totalorder %s462_s18, 1  ;;  %s462_s18 = sphi %s495_s18, %s15_s18  }
   0x2   : > { %p207_p1 = scmp.lt.s32.totalorder %s462_s18, 3 }
   0x4   : > { %p208_p2 = pnand %p429_p0, %p207_p1 }
   0x5   : > { %p245_p3 = scmp.lt.s32.totalorder (!%p208_p2), %s425_s19, 1 }
   0x6   : > { %211 = sbr.rel (%p208_p2) target bundleno = 164 (0xa4), region = 40 }
   0xb   : > { %v464_v0 = vmov 0   ;;  %v267_v1 = vld [vmem:[%s533_s4] sm:$0xff]  ;;  %s536_s19 = smov (!%p245_p3, %s425_s19), 1  ;;  %vm300_vm0 = vcmask 1043456   ;;  %vm314_vm1 = vcmask 261120  }
   0xc   : > { %455 = vset.pattern.permute.xlu0 %v464_v0  ;;  %s506_s22 = sshll.u32 %s536_s19, 4  ;;  %s442_s23 = sshll.u32 %s536_s19, 5  ;;  %v266_v30 = vld [vmem:[%s532_s3] sm:$0xf] }
   0xd   : > { %311 = vperm.xlu0 %455, %v267_v1   ;;  %s254_s26 = scalar_lea.vmem %s530_s1, %s506_s22  ;;  %s259_s29 = scalar_lea.vmem %s531_s2, %s506_s22 }
   0xe   : > { %v274_v2 = vld [vmem:[%s254_s26] sm:$0xff]  ;;  %v275_v3 = vld [vmem:[%s254_s26 + $0x8] sm:$0xff]  ;;  %s249_s7 = scalar_lea.vmem %s529_s0, %s442_s23  ;;  %s264_s12 = scalar_lea.vmem %s534_s5, %s506_s22 }
   0xf   : > { %v277_v4 = vld [vmem:[%s259_s29] sm:$0xff]  ;;  %v276_v5 = vpack.c.bf16 %v275_v3, %v274_v2  ;;  %v278_v6 = vld [vmem:[%s259_s29 + $0x8] sm:$0xff]  ;;  %v270_v10 = vld [vmem:[%s249_s7 + $0x10] sm:$0xff] }
  0x10   : > { %v268_v7 = vld [vmem:[%s249_s7] sm:$0xff]  ;;  %v269_v8 = vld [vmem:[%s249_s7 + $0x8] sm:$0xff]  ;;  %v279_v9 = vpack.c.bf16 %v278_v6, %v277_v4  ;;  %v271_v11 = vld [vmem:[%s249_s7 + $0x18] sm:$0xff] }
  0x11   : > { %v272_v12 = vpack.c.bf16 %v269_v8, %v268_v7  ;;  %v291_v13 = vunpack.c.l.b16 %v276_v5  ;;  %v292_v14 = vunpack.c.h.b16 %v276_v5  ;;  %v273_v15 = vpack.c.bf16 %v271_v11, %v270_v10 }
  0x12   : > { %v296_v16 = vunpack.c.l.b16 %v279_v9  ;;  %v297_v17 = vunpack.c.h.b16 %v279_v9 }
  0x13   : > { %v282_v18 = vunpack.c.l.b16 %v272_v12  ;;  %v283_v19 = vunpack.c.h.b16 %v272_v12  ;;  %v293_v20 = vpack.c.b16 %v291_v13, %v291_v13  ;;  %v294_v21 = vpack.c.b16 %v292_v14, %v292_v14 }
  0x14   : > { %v284_v22 = vunpack.c.l.b16 %v273_v15  ;;  %v285_v23 = vunpack.c.h.b16 %v273_v15  ;;  %v298_v24 = vpack.c.b16 %v296_v16, %v296_v16  ;;  %v299_v25 = vpack.c.b16 %v297_v17, %v297_v17 }
  0x16   : > { %v303_v26 = vsel %vm300_vm0, %v293_v20, %v298_v24  ;;  %v307_v27 = vsel %vm300_vm0, %v294_v21, %v299_v25  ;;  %v286_v28 = vpack.c.b16 %v284_v22, %v282_v18  ;;  %v287_v29 = vpack.c.b16 %v285_v23, %v283_v19 }
  0x17   : > { %324 = vmatpush.bf16.msra.mxu0 %v303_v26  ;;  %337 = vmatpush.bf16.msra.mxu1 %v307_v27 }
  0x1b   : > { %325 = vmatpush.bf16.msra.mxu0 %v286_v28  ;;  %338 = vmatpush.bf16.msra.mxu1 %v287_v29 }
  0x1e   : > { %438 = vmatmul.msk.bf16.vlgmr.msra.gmra.mxu0 %vm314_vm1, %v266_v30  ;;  %439 = vmatmul.msk.bf16.vlgmr.msra.gmra.mxu1 %vm314_vm1, %v266_v30 }
  0x7f   : > { %v312_v31 = vpop.permute.xlu0 %311 }
  0x9b   : > { %v327_v32 = vpop.f32.mrf.mxu0  ;;  %v340_v33 = vpop.f32.mrf.mxu1 }
  0x9c   : > { %v328_v34 = vadd.f32 %v327_v32, %v312_v31  ;;  %v341_v35 = vadd.f32 %v340_v33, %v312_v31 }
  0x9e   : > { %344 = vst [vmem:[%s264_s12] sm:$0xff] %v328_v34 }
  0x9f   : > { %345 = vst [vmem:[%s264_s12 + $0x8] sm:$0xff] %v341_v35 }
  0xa3   : > { %v329_v36 = vpop.f32.mrf.mxu0  ;;  %v342_v37 = vpop.f32.mrf.mxu1 }
  0xa4 PF: > { %s15_s18 = sadd.s32 1, %s462_s18  }
  0xa5   : > { %p12_p4 = scmp.ge.s32.totalorder %s15_s18, 4  }
  0xa7   :  { %14 = sbr.rel (!%p12_p4) target bundleno = 1 (0x1), region = 76 }

// kernel: _lambda_.16
= control target key start
LH: loop header
LB: loop body
LE: loop exit
PB: predicated region body
PF: predicated region fallthrough
CT: control target
= control target key end

     0   :  { %s574_s12 = smov 0   ;;  %s680_s0 = inlined_call_operand.vmem [shape: f32[2,8,256], index: 0, kind: input, shape index: {}]   ;;  %s681_s1 = inlined_call_operand.vmem [shape: bf16[8,72], index: 1, kind: input, shape index: {}]   ;;  %s682_s2 = inlined_call_operand.vmem [shape: f32[8,1], index: 2, kind: input, shape index: {}]   ;;  %s683_s3 = inlined_call_operand.vmem [shape: f32[2,8,256], index: 3, kind: output, shape index: {}]  }
   0x1 LB: > { %s503_s13 = sadd.s32 4294967295, %s543_s12   ;;  %p507_p0 = scmp.ge.s32.totalorder %s543_s12, 1  ;;  %s543_s12 = sphi %s574_s12, %s13_s12  }
   0x2   : > { %p137_p1 = scmp.lt.s32.totalorder %s543_s12, 3 }
   0x4   : > { %p138_p2 = pnand %p507_p0, %p137_p1 }
   0x5   : > { %p161_p3 = scmp.lt.s32.totalorder (!%p138_p2), %s503_s13, 1  ;;  %s545_s18 = smov (!%p138_p2), 112  }
   0x6   : > { %141 = sbr.rel (%p138_p2) target bundleno = 316 (0x13c), region = 32  ;;  %s546_s19 = smov (!%p138_p2), 111  }
   0x7   : > { %s547_s20 = smov (!%p138_p2), 113   ;;  %s548_s21 = smov (!%p138_p2), 127  }
   0x8   : > { %s549_s22 = smov (!%p138_p2), 1   ;;  %s550_s23 = smov (!%p138_p2), 15  }
   0x9   : > { %s551_s24 = smov (!%p138_p2), 16   ;;  %s552_s25 = smov (!%p138_p2), 17  }
   0xb   : > { %s693_s13 = smov (!%p161_p3, %s503_s13), 1  ;;  %v176_v7 = vlaneseq  ;;  %v553_v8 = vmov 0   ;;  %vm325_vm12 = vcmask 924672   ;;  %vm338_vm14 = vcmask 916480   ;;  %v175_v56 = vld [vmem:[%s682_s2] sm:$0xff] }
   0xc   : > { %s516_s14 = sshll.u32 %s693_s13, 4  ;;  %535 = vset.pattern.permute.xlu1 %v553_v8  ;;  %536 = vset.pattern.permute.xlu0 %v553_v8  ;;  %v237_v21 = vunpack.c.l.b16 %v553_v8  ;;  %v238_v22 = vunpack.c.h.b16 %v553_v8  ;;  %vm347_vm15 = vcmask 908288  }
   0xd   : > { %s165_s17 = scalar_lea.vmem %s680_s0, %s516_s14  ;;  %v177_v9 = vand.u32 127, %v176_v7  ;;  %s170_s5 = scalar_lea.vmem %s683_s3, %s516_s14 }
   0xe   : > { %v207_v0 = vld [vmem:[%s165_s17] sm:$0xff]  ;;  %v208_v1 = vld [vmem:[%s165_s17 + $0x8] sm:$0xff] }
   0xf   : > { %v209_v2 = vpack.c.bf16 %v208_v1, %v207_v0  ;;  %v178_v10 = vadd.s32 128, %v177_v9  ;;  %v183_v11 = vand.u32 15, %v177_v9 }
  0x11   : > { %v211_v3 = vunpack.c.l.b16 %v209_v2  ;;  %v212_v5 = vunpack.c.h.b16 %v209_v2  ;;  %v190_v12 = vand.u32 15, %v178_v10  ;;  %vm205_vm0 = vcmp.lt.s32.totalorder %v183_v11, 15 }
  0x12   : > { %vm203_vm3 = vcmp.ge.s32.totalorder %v183_v11, 1 }
  0x13   : > { %v590_v4 = vpack.c.b16 %v211_v3, %v211_v3  ;;  %v595_v6 = vpack.c.b16 %v212_v5, %v212_v5  ;;  %vm206_vm1 = vcmp.lt.s32.totalorder %v190_v12, 15  ;;  %vm204_vm4 = vcmp.ge.s32.totalorder %v190_v12, 1 }
  0x14   : > { %vm275_vm2 = vmpackc.low %vm206_vm1, %vm205_vm0 }
  0x15   : > { %334 = vrot.lane.b32.xlu1 %v590_v4, %s545_s18  ;;  %343 = vrot.lane.b32.xlu0 %v590_v4, %s546_s19  ;;  %v276_v14 = vsel %vm275_vm2, 65537, %v553_v8  ;;  %vm231_vm5 = vmpackc.low %vm204_vm4, %vm203_vm3  ;;  %vm370_vm4 = vcmask 1043456  }
  0x16   : > { %321 = vrot.lane.b32.xlu2 %v590_v4, %s547_s20  ;;  %v277_v15 = vperm.slane %v276_v14, 0  ;;  %v232_v16 = vsel %vm231_vm5, 65537, %v553_v8  ;;  %v278_v17 = vperm.slane %v276_v14, 4 }
  0x17   : > { %v234_v18 = vperm.slane %v232_v16, 4  ;;  %v233_v20 = vperm.slane %v232_v16, 0 }
  0x18   : > { %v279_v23 = vunpack.c.l.b16 %v277_v15  ;;  %v280_v24 = vunpack.c.h.b16 %v277_v15  ;;  %v286_v25 = vunpack.c.l.b16 %v278_v17  ;;  %v287_v26 = vunpack.c.h.b16 %v278_v17 }
  0x19   : > { %v242_v29 = vunpack.c.l.b16 %v234_v18  ;;  %v243_v30 = vunpack.c.h.b16 %v234_v18  ;;  %v235_v31 = vunpack.c.l.b16 %v233_v20  ;;  %v236_v32 = vunpack.c.h.b16 %v233_v20 }
  0x1a   : > { %vm283_vm6 = vcmp.ne.s32.totalorder %v279_v23, %v237_v21  ;;  %vm284_vm7 = vcmp.ne.s32.totalorder %v280_v24, %v238_v22  ;;  %vm290_vm8 = vcmp.ne.s32.totalorder %v286_v25, %v237_v21  ;;  %vm291_vm9 = vcmp.ne.s32.totalorder %v287_v26, %v238_v22  ;;  %v174_v26 = vld [vmem:[%s681_s1] sm:$0xf] }
  0x1b   : > { %vm246_vm10 = vcmp.ne.s32.totalorder %v242_v29, %v237_v21  ;;  %vm247_vm11 = vcmp.ne.s32.totalorder %v243_v30, %v238_v22  ;;  %vm610_vm13 = vmpackc.low %vm284_vm7, %vm283_vm6  ;;  %vm239_vm1 = vcmp.ne.s32.totalorder %v235_v31, %v237_v21  ;;  %vm240_vm2 = vcmp.ne.s32.totalorder %v236_v32, %v238_v22 }
  0x1c   : > { %vm614_vm0 = vmpackc.low %vm291_vm9, %vm290_vm8  ;;  %vm312_vm6 = vcmask 1039360   ;;  %vm299_vm7 = vcmask 7168   ;;  %vm264_vm8 = vcmask 121856   ;;  %vm219_vm9 = vcmask 138240  }
  0x1d   : > { %336 = vrot.lane.b32.xlu1 %v595_v6, %s545_s18  ;;  %345 = vrot.lane.b32.xlu0 %v595_v6, %s546_s19  ;;  %vm618_vm3 = vmpackc.low %vm247_vm11, %vm246_vm10  ;;  %vm255_vm10 = vcmask 130048   ;;  %vm408_vm11 = vcmask 588800  }
  0x1e   : > { %323 = vrot.lane.b32.xlu2 %v595_v6, %s547_s20  ;;  %vm622_vm5 = vmpackc.low %vm240_vm2, %vm239_vm1 }
  0x25   : > { %310 = vrot.lane.b32.xlu1 %v595_v6, %s548_s21  ;;  %308 = vrot.lane.b32.xlu0 %v590_v4, %s548_s21 }
  0x26   : > { %295 = vrot.lane.b32.xlu2 %v590_v4, %s549_s22 }
  0x2d   : > { %260 = vrot.lane.b32.xlu1 %v590_v4, %s550_s23  ;;  %297 = vrot.lane.b32.xlu0 %v595_v6, %s549_s22 }
  0x2e   : > { %262 = vrot.lane.b32.xlu2 %v595_v6, %s550_s23 }
  0x35   : > { %253 = vrot.lane.b32.xlu1 %v595_v6, %s551_s24  ;;  %251 = vrot.lane.b32.xlu0 %v590_v4, %s551_s24 }
  0x36   : > { %215 = vrot.lane.b32.xlu2 %v590_v4, %s552_s25 }
  0x3d   : > { %217 = vrot.lane.b32.xlu0 %v595_v6, %s552_s25  ;;  %405 = vperm.xlu1 %535, %v175_v56  }
  0x70   : > { %v322_v13 = vpop.permute.xlu2 %321 }
  0x78   : > { %v324_v19 = vpop.permute.xlu2 %323 }
  0x79   : > { %v330_v35 = vsel %vm325_vm12, %v324_v19, 0  ;;  %v326_v38 = vsel %vm325_vm12, %v322_v13, %v324_v19 }
  0x7a   : > { %v333_v49 = vsel %vm618_vm3, %v330_v35, 0  ;;  %v332_v53 = vsel %vm622_vm5, %v326_v38, 0 }
  0x80   : > { %v296_v36 = vpop.permute.xlu2 %295 }
  0x81   : > { %v304_v61 = vsel %vm299_vm7, 0, %v296_v36 }
  0x82   : > { %v306_v3 = vsel %vm622_vm5, %v304_v61, 0 }
  0x83   : > { %v361_v8 = vrot.slane %v306_v3, 4 }
  0x87   : > { %v335_v27 = vpop.permute.xlu1 %334  ;;  %v344_v28 = vpop.permute.xlu0 %343 }
  0x88   : > { %v263_v62 = vpop.permute.xlu2 %262 }
  0x8f   : > { %v337_v39 = vpop.permute.xlu1 %336  ;;  %v346_v40 = vpop.permute.xlu0 %345 }
  0x90   : > { %v339_v41 = vsel %vm338_vm14, %v335_v27, %v337_v39  ;;  %v342_v42 = vsel %vm338_vm14, %v337_v39, 0  ;;  %v348_v43 = vsel %vm347_vm15, %v344_v28, %v346_v40  ;;  %v352_v44 = vsel %vm347_vm15, %v346_v40, 0  ;;  %v216_v17 = vpop.permute.xlu2 %215 }
  0x91   : > { %v369_v46 = vrot.slane %v342_v42, 4  ;;  %v354_v47 = vsel %vm610_vm13, %v348_v43, 0  ;;  %v355_v48 = vsel %vm614_vm0, %v352_v44, 0  ;;  %v368_v50 = vrot.slane %v339_v41, 4 }
  0x92   : > { %v413_v51 = vsel %vm370_vm4, %v354_v47, 0  ;;  %v416_v52 = vsel %vm370_vm4, %v355_v48, 0  ;;  %v225_v19 = vsel %vm219_vm9, 0, %v216_v17 }
  0x93   : > { %421 = vmatpush.bf16.msra.mxu0 %v413_v51  ;;  %434 = vmatpush.bf16.msra.mxu1 %v416_v52  ;;  %v401_v54 = vsel %vm370_vm4, %v333_v49, %v369_v46  ;;  %v397_v55 = vsel %vm370_vm4, %v332_v53, %v368_v50  ;;  %v249_v22 = vsel %vm622_vm5, %v225_v19, 0 }
  0x97   : > { %v311_v57 = vpop.permute.xlu1 %310  ;;  %422 = vmatpush.bf16.msra.mxu0 %v397_v55  ;;  %v309_v58 = vpop.permute.xlu0 %308  ;;  %435 = vmatpush.bf16.msra.mxu1 %v401_v54 }
  0x98   : > { %v317_v59 = vsel %vm312_vm6, %v311_v57, 0  ;;  %v313_v60 = vsel %vm312_vm6, %v309_v58, %v311_v57 }
  0x99   : > { %v320_v63 = vsel %vm614_vm0, %v317_v59, 0  ;;  %v319_v0 = vsel %vm610_vm13, %v313_v60, 0 }
  0x9a   : > { %v366_v1 = vrot.slane %v320_v63, 4  ;;  %v365_v2 = vrot.slane %v319_v0, 4 }
  0x9c   : > { %v389_v5 = vsel %vm370_vm4, %v590_v4, %v365_v2  ;;  %v393_v7 = vsel %vm370_vm4, %v595_v6, %v366_v1 }
  0x9d   : > { %423 = vmatpush.bf16.msra.mxu0 %v389_v5  ;;  %436 = vmatpush.bf16.msra.mxu1 %v393_v7 }
  0x9f   : > { %v261_v9 = vpop.permute.xlu1 %260  ;;  %v298_v10 = vpop.permute.xlu0 %297 }
  0xa0   : > { %v269_v11 = vsel %vm264_vm8, 0, %v261_v9  ;;  %v300_v12 = vsel %vm299_vm7, %v296_v36, %v298_v10  ;;  %v265_v13 = vsel %vm264_vm8, %v261_v9, %v263_v62 }
  0xa1   : > { %v307_v14 = vsel %vm618_vm3, %v300_v12, 0  ;;  %v293_v15 = vsel %vm610_vm13, %v269_v11, 0  ;;  %v294_v4 = vsel %vm614_vm0, %v265_v13, 0 }
  0xa2   : > { %v362_v6 = vrot.slane %v307_v14, 4  ;;  %v381_v16 = vsel %vm370_vm4, %v293_v15, %v361_v8 }
  0xa3   : > { %424 = vmatpush.bf16.msra.mxu0 %v381_v16 }
  0xa4   : > { %v385_v18 = vsel %vm370_vm4, %v294_v4, %v362_v6 }
  0xa5   : > { %437 = vmatpush.bf16.msra.mxu1 %v385_v18 }
  0xa7   : > { %v252_v20 = vpop.permute.xlu0 %251  ;;  %v254_v24 = vpop.permute.xlu1 %253 }
  0xa8   : > { %v259_v21 = vsel %vm255_vm10, 0, %v252_v20  ;;  %v256_v27 = vsel %vm255_vm10, %v252_v20, %v254_v24 }
  0xa9   : > { %v357_v23 = vrot.slane %v259_v21, 4  ;;  %v358_v29 = vrot.slane %v256_v27, 4 }
  0xab   : > { %v373_v25 = vsel %vm370_vm4, %v249_v22, %v357_v23 }
  0xac   : > { %425 = vmatpush.bf16.msra.mxu0 %v373_v25 }
  0xaf   : > { %512 = vmatmul.msk.bf16.vlgmr.msra.gmra.mxu0 %vm408_vm11, %v174_v26  ;;  %v218_v28 = vpop.permute.xlu0 %217  ;;  %v406_v33 = vpop.permute.xlu1 %405 }
  0xb0   : > { %v220_v30 = vsel %vm219_vm9, %v216_v17, %v218_v28 }
  0xb1   : > { %v250_v31 = vsel %vm618_vm3, %v220_v30, 0 }
  0xb2   : > { %v377_v32 = vsel %vm370_vm4, %v250_v31, %v358_v29 }
  0xb3   : > { %438 = vmatpush.bf16.msra.mxu1 %v377_v32 }
  0xb6   : > { %513 = vmatmul.msk.bf16.vlgmr.msra.gmra.mxu1 %vm408_vm11, %v174_v26 }
 0x12c   : > { %v427_v34 = vpop.f32.mrf.mxu0 }
 0x12d   : > { %v428_v35 = vadd.f32 %v427_v34, %v406_v33 }
 0x12f   : > { %v444_v36 = vmax.f32 %v428_v35, 0.0 }
 0x131   : > { %446 = vst [vmem:[%s170_s5] sm:$0xff] %v444_v36 }
 0x133   : > { %v440_v38 = vpop.f32.mrf.mxu1 }
 0x134   : > { %v441_v39 = vadd.f32 %v440_v38, %v406_v33  ;;  %v429_v40 = vpop.f32.mrf.mxu0 }
 0x136   : > { %v445_v41 = vmax.f32 %v441_v39, 0.0 }
 0x138   : > { %447 = vst [vmem:[%s170_s5 + $0x8] sm:$0xff] %v445_v41 }
 0x13b   : > { %v442_v37 = vpop.f32.mrf.mxu1 }
 0x13c PF: > { %s13_s12 = sadd.s32 1, %s543_s12  }
 0x13d   : > { %p10_p4 = scmp.ge.s32.totalorder %s13_s12, 4  }
 0x13f   :  { %12 = sbr.rel (!%p10_p4) target bundleno = 1 (0x1), region = 62 }

// kernel: _lambda_.14
= control target key start
LH: loop header
LB: loop body
LE: loop exit
PB: predicated region body
PF: predicated region fallthrough
CT: control target
= control target key end

     0   :  { %s783_s15 = smov 0   ;;  %s985_s0 = inlined_call_operand.vmem [shape: f32[2,16,256], index: 0, kind: input, shape index: {}]   ;;  %s986_s1 = inlined_call_operand.vmem [shape: f32[2,8,256], index: 1, kind: input, shape index: {}]   ;;  %s987_s2 = inlined_call_operand.vmem [shape: bf16[8,216], index: 2, kind: input, shape index: {}]   ;;  %s988_s3 = inlined_call_operand.vmem [shape: f32[8,1], index: 3, kind: input, shape index: {}]   ;;  %s989_s4 = inlined_call_operand.vmem [shape: f32[2,8,256], index: 4, kind: output, shape index: {}]  }
   0x1 LB: > { %s702_s16 = sadd.s32 4294967295, %s747_s15   ;;  %p706_p0 = scmp.ge.s32.totalorder %s747_s15, 1  ;;  %s747_s15 = sphi %s783_s15, %s14_s15  }
   0x2   : > { %p172_p1 = scmp.lt.s32.totalorder %s747_s15, 3 }
   0x4   : > { %p173_p2 = pnand %p706_p0, %p172_p1 }
   0x5   : > { %p203_p3 = scmp.lt.s32.totalorder (!%p173_p2), %s702_s16, 1  ;;  %s749_s25 = smov (!%p173_p2), 113  }
   0x6   : > { %176 = sbr.rel (%p173_p2) target bundleno = 362 (0x16a), region = 36  ;;  %s750_s26 = smov (!%p173_p2), 112  }
   0x7   : > { %s751_s27 = smov (!%p173_p2), 111   ;;  %s752_s28 = smov (!%p173_p2), 127  }
   0x8   : > { %s753_s29 = smov (!%p173_p2), 1   ;;  %s754_s30 = smov (!%p173_p2), 15  }
   0x9   : > { %s755_s5 = smov (!%p173_p2), 16   ;;  %s756_s6 = smov (!%p173_p2), 17  }
   0xb   : > { %s999_s16 = smov (!%p203_p3, %s702_s16), 1  ;;  %v223_v19 = vlaneseq  ;;  %v757_v21 = vmov 0   ;;  %vm393_vm8 = vcmask 916480   ;;  %vm380_vm9 = vcmask 924672  }
   0xc   : > { %s719_s17 = sshll.u32 %s999_s16, 5  ;;  %s720_s18 = sshll.u32 %s999_s16, 4  ;;  %739 = vset.pattern.permute.xlu2 %v757_v21  ;;  %740 = vset.pattern.permute.xlu0 %v757_v21  ;;  %v290_v30 = vunpack.c.l.b16 %v757_v21  ;;  %v291_v31 = vunpack.c.h.b16 %v757_v21  ;;  %vm367_vm11 = vcmask 1039360   ;;  %vm404_vm15 = vcmask 908288  }
   0xd   : > { %s207_s21 = scalar_lea.vmem %s985_s0, %s719_s17  ;;  %s212_s24 = scalar_lea.vmem %s986_s1, %s720_s18  ;;  %v224_v20 = vand.u32 127, %v223_v19 }
   0xe   : > { %v254_v0 = vld [vmem:[%s207_s21] sm:$0xff]  ;;  %v255_v1 = vld [vmem:[%s207_s21 + $0x8] sm:$0xff]  ;;  %v256_v2 = vld [vmem:[%s207_s21 + $0x10] sm:$0xff]  ;;  %s217_s13 = scalar_lea.vmem %s989_s4, %s720_s18 }
   0xf   : > { %v257_v3 = vld [vmem:[%s207_s21 + $0x18] sm:$0xff]  ;;  %v258_v4 = vpack.c.bf16 %v255_v1, %v254_v0  ;;  %v413_v5 = vld [vmem:[%s212_s24] sm:$0xff]  ;;  %v414_v6 = vld [vmem:[%s212_s24 + $0x8] sm:$0xff]  ;;  %v225_v22 = vadd.s32 128, %v224_v20  ;;  %v230_v23 = vand.u32 15, %v224_v20 }
  0x10   : > { %v259_v7 = vpack.c.bf16 %v257_v3, %v256_v2  ;;  %v415_v11 = vpack.c.bf16 %v414_v6, %v413_v5 }
  0x11   : > { %v263_v8 = vunpack.c.h.b16 %v258_v4  ;;  %v262_v9 = vunpack.c.l.b16 %v258_v4  ;;  %v237_v24 = vand.u32 15, %v225_v22  ;;  %vm250_vm0 = vcmp.ge.s32.totalorder %v230_v23, 1 }
  0x12   : > { %v265_v10 = vunpack.c.h.b16 %v259_v7  ;;  %v264_v12 = vunpack.c.l.b16 %v259_v7  ;;  %v418_v15 = vunpack.c.h.b16 %v415_v11  ;;  %v417_v17 = vunpack.c.l.b16 %v415_v11 }
  0x13   : > { %vm251_vm1 = vcmp.ge.s32.totalorder %v237_v24, 1  ;;  %vm252_vm3 = vcmp.lt.s32.totalorder %v230_v23, 15  ;;  %vm253_vm4 = vcmp.lt.s32.totalorder %v237_v24, 15 }
  0x14   : > { %v803_v13 = vpack.c.b16 %v265_v10, %v263_v8  ;;  %v805_v14 = vpack.c.b16 %v264_v12, %v262_v9  ;;  %v810_v16 = vpack.c.b16 %v418_v15, %v418_v15  ;;  %v816_v18 = vpack.c.b16 %v417_v17, %v417_v17  ;;  %vm284_vm2 = vmpackc.low %vm251_vm1, %vm250_vm0 }
  0x15   : > { %v285_v27 = vsel %vm284_vm2, 65537, %v757_v21  ;;  %vm330_vm5 = vmpackc.low %vm253_vm4, %vm252_vm3  ;;  %vm514_vm0 = vcmask 1043456  }
  0x16   : > { %378 = vrot.lane.b32.xlu1 %v803_v13, %s749_s25  ;;  %391 = vrot.lane.b32.xlu0 %v803_v13, %s750_s26  ;;  %v287_v28 = vperm.slane %v285_v27, 4  ;;  %v331_v29 = vsel %vm330_vm5, 65537, %v757_v21  ;;  %v286_v46 = vperm.slane %v285_v27, 0 }
  0x17   : > { %389 = vrot.lane.b32.xlu2 %v805_v14, %s750_s26  ;;  %v333_v35 = vperm.slane %v331_v29, 4  ;;  %v332_v49 = vperm.slane %v331_v29, 0 }
  0x18   : > { %v295_v33 = vunpack.c.l.b16 %v287_v28  ;;  %v296_v34 = vunpack.c.h.b16 %v287_v28  ;;  %v288_v53 = vunpack.c.l.b16 %v286_v46  ;;  %v289_v54 = vunpack.c.h.b16 %v286_v46 }
  0x19   : > { %v341_v36 = vunpack.c.l.b16 %v333_v35  ;;  %v342_v37 = vunpack.c.h.b16 %v333_v35  ;;  %v334_v60 = vunpack.c.l.b16 %v332_v49  ;;  %v335_v61 = vunpack.c.h.b16 %v332_v49 }
  0x1a   : > { %vm299_vm6 = vcmp.ne.s32.totalorder %v295_v33, %v290_v30  ;;  %vm300_vm7 = vcmp.ne.s32.totalorder %v296_v34, %v291_v31  ;;  %vm292_vm1 = vcmp.ne.s32.totalorder %v288_v53, %v290_v30  ;;  %vm293_vm2 = vcmp.ne.s32.totalorder %v289_v54, %v291_v31 }
  0x1b   : > { %vm851_vm10 = vmpackc.low %vm300_vm7, %vm299_vm6  ;;  %vm345_vm12 = vcmp.ne.s32.totalorder %v341_v36, %v290_v30  ;;  %vm346_vm13 = vcmp.ne.s32.totalorder %v342_v37, %v291_v31  ;;  %vm338_vm3 = vcmp.ne.s32.totalorder %v334_v60, %v290_v30  ;;  %vm339_vm4 = vcmp.ne.s32.totalorder %v335_v61, %v291_v31 }
  0x1c   : > { %vm862_vm14 = vmpackc.low %vm346_vm13, %vm345_vm12  ;;  %vm354_vm7 = vcmask 7168   ;;  %vm308_vm12 = vcmask 130048  }
  0x1d   : > { %vm878_vm5 = vmpackc.low %vm293_vm2, %vm292_vm1 }
  0x1e   : > { %485 = vrot.lane.b32.xlu1 %v810_v16, %s750_s26  ;;  %492 = vrot.lane.b32.xlu0 %v810_v16, %s751_s27  ;;  %vm886_vm6 = vmpackc.low %vm339_vm4, %vm338_vm3 }
  0x1f   : > { %365 = vrot.lane.b32.xlu2 %v803_v13, %s752_s28  ;;  %vm713_vm13 = vmneg %vm308_vm12 }
  0x26   : > { %490 = vrot.lane.b32.xlu0 %v816_v18, %s751_s27  ;;  %376 = vrot.lane.b32.xlu1 %v805_v14, %s749_s25 }
  0x27   : > { %474 = vrot.lane.b32.xlu2 %v810_v16, %s749_s25 }
  0x2e   : > { %483 = vrot.lane.b32.xlu0 %v816_v18, %s750_s26  ;;  %463 = vrot.lane.b32.xlu1 %v810_v16, %s752_s28 }
  0x2f   : > { %363 = vrot.lane.b32.xlu2 %v805_v14, %s752_s28 }
  0x36   : > { %350 = vrot.lane.b32.xlu0 %v805_v14, %s753_s29  ;;  %352 = vrot.lane.b32.xlu1 %v803_v13, %s753_s29 }
  0x37   : > { %450 = vrot.lane.b32.xlu2 %v816_v18, %s753_s29 }
  0x3e   : > { %452 = vrot.lane.b32.xlu0 %v810_v16, %s753_s29  ;;  %472 = vrot.lane.b32.xlu1 %v816_v18, %s749_s25 }
  0x3f   : > { %439 = vrot.lane.b32.xlu2 %v816_v18, %s754_s30 }
  0x46   : > { %441 = vrot.lane.b32.xlu0 %v810_v16, %s754_s30  ;;  %461 = vrot.lane.b32.xlu1 %v816_v18, %s752_s28 }
  0x47   : > { %315 = vrot.lane.b32.xlu2 %v805_v14, %s754_s30 }
  0x4e   : > { %317 = vrot.lane.b32.xlu0 %v803_v13, %s754_s30  ;;  %432 = vrot.lane.b32.xlu1 %v816_v18, %s755_s5 }
  0x4f   : > { %434 = vrot.lane.b32.xlu2 %v810_v16, %s755_s5 }
  0x56   : > { %421 = vrot.lane.b32.xlu0 %v816_v18, %s756_s6  ;;  %423 = vrot.lane.b32.xlu1 %v810_v16, %s756_s6 }
  0x57   : > { %304 = vrot.lane.b32.xlu2 %v805_v14, %s755_s5 }
  0x5e   : > { %306 = vrot.lane.b32.xlu0 %v803_v13, %s755_s5  ;;  %268 = vrot.lane.b32.xlu1 %v805_v14, %s756_s6 }
  0x5f   : > { %270 = vrot.lane.b32.xlu2 %v803_v13, %s756_s6 }
  0x66   : > { %402 = vrot.lane.b32.xlu0 %v803_v13, %s751_s27  ;;  %400 = vrot.lane.b32.xlu1 %v805_v14, %s751_s27 }
  0x71   : > { %v390_v25 = vpop.permute.xlu2 %389 }
  0x79   : > { %v847_v26 = vpop.permute.xlu2 %365 }
  0x7a   : > { %v372_v47 = vsel %vm367_vm11, %v847_v26, 0 }
  0x7b   : > { %v375_v50 = vsel %vm862_vm14, %v372_v47, 0 }
  0x81   : > { %v849_v32 = vpop.permute.xlu2 %474 }
  0x82   : > { %v479_v63 = vsel %vm380_vm9, %v849_v32, 0 }
  0x83   : > { %v482_v6 = vsel %vm851_vm10, %v479_v63, 0 }
  0x88   : > { %v379_v38 = vpop.permute.xlu1 %378  ;;  %v392_v39 = vpop.permute.xlu0 %391 }
  0x89   : > { %v394_v41 = vsel %vm393_vm8, %v390_v25, %v392_v39  ;;  %v398_v42 = vsel %vm393_vm8, %v392_v39, 0  ;;  %v385_v43 = vsel %vm380_vm9, %v379_v38, 0  ;;  %v364_v44 = vpop.permute.xlu2 %363 }
  0x8a   : > { %579 = vmatpush.bf16.msra.mxu0 %v394_v41  ;;  %605 = vmatpush.bf16.msra.mxu2 %v398_v42  ;;  %v388_v45 = vsel %vm851_vm10, %v385_v43, 0  ;;  %v368_v11 = vsel %vm367_vm11, %v364_v44, %v847_v26 }
  0x8b   : > { %v374_v15 = vsel %vm886_vm6, %v368_v11, 0 }
  0x8e   : > { %606 = vmatpush.bf16.msra.mxu2 %v388_v45 }
  0x90   : > { %v486_v51 = vpop.permute.xlu1 %485  ;;  %v493_v52 = vpop.permute.xlu0 %492 }
  0x91   : > { %v497_v55 = vsel %vm404_vm15, %v493_v52, 0  ;;  %v869_v56 = vpop.permute.xlu2 %450  ;;  %v489_v57 = vsel %vm393_vm8, %v486_v51, 0 }
  0x92   : > { %v500_v58 = vsel %vm862_vm14, %v497_v55, 0  ;;  %607 = vmatpush.bf16.msra.mxu2 %v375_v50  ;;  %v457_v47 = vsel %vm354_vm7, 0, %v869_v56 }
  0x93   : > { %v542_v59 = vrot.slane %v500_v58, 4  ;;  %v459_v53 = vsel %vm878_vm5, %v457_v47, 0 }
  0x95   : > { %v547_v62 = vsel %vm514_vm0, %v489_v57, %v542_v59  ;;  %v508_v59 = vrot.slane %v459_v53, 4 }
  0x96   : > { %v551_v0 = vrot.slane %v547_v62, 4  ;;  %608 = vmatpush.bf16.msra.mxu2 %v803_v13  ;;  %v222_v62 = vld [vmem:[%s988_s3] sm:$0xff] }
  0x97   : > { %562 = vperm.xlu2 %739, %v222_v62  }
  0x98   : > { %v491_v2 = vpop.permute.xlu0 %490  ;;  %v377_v3 = vpop.permute.xlu1 %376  ;;  %v577_v4 = vsel %vm514_vm0, %v551_v0, 0  ;;  %v558_v12 = vsel %vm514_vm0, %v482_v6, %v551_v0 }
  0x99   : > { %620 = vmatpush.bf16.msra.mxu3 %v577_v4  ;;  %v381_v5 = vsel %vm380_vm9, %v377_v3, %v379_v38  ;;  %v440_v7 = vpop.permute.xlu2 %439  ;;  %v494_v9 = vsel %vm404_vm15, %v491_v2, %v493_v52 }
  0x9a   : > { %v387_v10 = vsel %vm878_vm5, %v381_v5, 0  ;;  %v499_v13 = vsel %vm886_vm6, %v494_v9, 0 }
  0x9b   : > { %580 = vmatpush.bf16.msra.mxu0 %v387_v10  ;;  %v541_v17 = vrot.slane %v499_v13, 4 }
  0x9d   : > { %621 = vmatpush.bf16.msra.mxu3 %v558_v12 }
  0x9f   : > { %581 = vmatpush.bf16.msra.mxu0 %v374_v15 }
  0xa0   : > { %v484_v19 = vpop.permute.xlu0 %483  ;;  %v464_v20 = vpop.permute.xlu1 %463 }
  0xa1   : > { %v487_v21 = vsel %vm393_vm8, %v484_v19, %v486_v51  ;;  %v468_v22 = vsel %vm367_vm11, %v464_v20, 0  ;;  %v316_v23 = vpop.permute.xlu2 %315  ;;  %vm319_vm8 = vcmask 121856  }
  0xa2   : > { %v471_v24 = vsel %vm862_vm14, %v468_v22, 0  ;;  %v545_v25 = vsel %vm514_vm0, %v487_v21, %v541_v17  ;;  %v324_v35 = vsel %vm319_vm8, 0, %v316_v23  ;;  %v446_v57 = vsel %vm319_vm8, 0, %v440_v7 }
  0xa3   : > { %v513_v26 = vrot.slane %v471_v24, 4  ;;  %v550_v27 = vrot.slane %v545_v25, 4  ;;  %582 = vmatpush.bf16.msra.mxu0 %v805_v14  ;;  %v448_v61 = vsel %vm886_vm6, %v446_v57, 0 }
  0xa4   : > { %v525_v2 = vsel %vm514_vm0, %v448_v61, %v508_v59 }
  0xa5   : > { %v575_v28 = vsel %vm514_vm0, %v550_v27, 0  ;;  %v537_v29 = vsel %vm514_vm0, %v810_v16, %v513_v26  ;;  %v348_v16 = vsel %vm886_vm6, %v324_v35, 0 }
  0xa6   : > { %594 = vmatpush.bf16.msra.mxu1 %v575_v28  ;;  %622 = vmatpush.bf16.msra.mxu3 %v537_v29 }
  0xa8   : > { %v351_v30 = vpop.permute.xlu0 %350  ;;  %v353_v31 = vpop.permute.xlu1 %352 }
  0xa9   : > { %v359_v33 = vsel %vm354_vm7, 0, %v351_v30  ;;  %v355_v34 = vsel %vm354_vm7, %v351_v30, %v353_v31  ;;  %v435_v36 = vpop.permute.xlu2 %434 }
  0xaa   : > { %v361_v14 = vsel %vm878_vm5, %v359_v33, 0  ;;  %v362_v37 = vsel %vm851_vm10, %v355_v34, 0 }
  0xab   : > { %583 = vmatpush.bf16.msra.mxu0 %v361_v14  ;;  %609 = vmatpush.bf16.msra.mxu2 %v362_v37 }
  0xaf   : > { %584 = vmatpush.bf16.msra.mxu0 %v348_v16 }
  0xb0   : > { %v453_v38 = vpop.permute.xlu0 %452  ;;  %v473_v39 = vpop.permute.xlu1 %472 }
  0xb1   : > { %v476_v41 = vsel %vm380_vm9, %v473_v39, %v849_v32  ;;  %v305_v43 = vpop.permute.xlu2 %304  ;;  %v454_v44 = vsel %vm354_vm7, %v869_v56, %v453_v38  ;;  %vm272_vm9 = vcmask 138240  }
  0xb2   : > { %v481_v42 = vsel %vm878_vm5, %v476_v41, 0  ;;  %v460_v46 = vsel %vm851_vm10, %v454_v44, 0 }
  0xb3   : > { %v554_v45 = vsel %vm514_vm0, %v481_v42, %v550_v27  ;;  %714 = vmatpush.bf16.msk.msra.mxu0 %vm713_vm13, %v305_v43  ;;  %v509_v32 = vrot.slane %v460_v46, 4 }
  0xb4   : > { %595 = vmatpush.bf16.msra.mxu1 %v554_v45 }
  0xb8   : > { %v442_v49 = vpop.permute.xlu0 %441  ;;  %v462_v50 = vpop.permute.xlu1 %461 }
  0xb9   : > { %v443_v51 = vsel %vm319_vm8, %v440_v7, %v442_v49  ;;  %v465_v52 = vsel %vm367_vm11, %v462_v50, %v464_v20  ;;  %v221_v20 = vld [vmem:[%s987_s2] sm:$0xff]  ;;  %v271_v21 = vpop.permute.xlu2 %270 }
  0xba   : > { %v470_v54 = vsel %vm886_vm6, %v465_v52, 0  ;;  %v449_v55 = vsel %vm862_vm14, %v443_v51, 0  ;;  %v566_v24 = vunpack.c.l.b16 %v221_v20  ;;  %v567_v31 = vunpack.c.h.b16 %v221_v20 }
  0xbb   : > { %v512_v58 = vrot.slane %v470_v54, 4  ;;  %v529_v56 = vsel %vm514_vm0, %v449_v55, %v509_v32 }
  0xbc   : > { %623 = vmatpush.bf16.msra.mxu3 %v529_v56  ;;  %v568_v30 = vpack.c.b16 %v566_v24, %v566_v24  ;;  %v569_v14 = vpack.c.b16 %v567_v31, %v567_v31 }
  0xbd   : > { %v533_v60 = vsel %vm514_vm0, %v816_v18, %v512_v58 }
  0xbe   : > { %596 = vmatpush.bf16.msra.mxu1 %v533_v60 }
  0xc0   : > { %v318_v63 = vpop.permute.xlu0 %317  ;;  %v433_v0 = vpop.permute.xlu1 %432 }
  0xc1   : > { %v320_v3 = vsel %vm319_vm8, %v316_v23, %v318_v63  ;;  %v438_v18 = vsel %vm308_vm12, 0, %v433_v0  ;;  %v436_v5 = vsel %vm308_vm12, %v433_v0, %v435_v36 }
  0xc2   : > { %597 = vmatpush.bf16.msra.mxu1 %v525_v2  ;;  %v349_v4 = vsel %vm862_vm14, %v320_v3, 0  ;;  %v504_v6 = vrot.slane %v438_v18, 4  ;;  %v505_v7 = vrot.slane %v436_v5, 4 }
  0xc3   : > { %610 = vmatpush.bf16.msra.mxu2 %v349_v4 }
  0xc8   : > { %v422_v9 = vpop.permute.xlu0 %421  ;;  %v424_v10 = vpop.permute.xlu1 %423 }
  0xc9   : > { %v428_v11 = vsel %vm272_vm9, 0, %v422_v9  ;;  %v425_v12 = vsel %vm272_vm9, %v422_v9, %v424_v10 }
  0xca   : > { %v430_v13 = vsel %vm878_vm5, %v428_v11, 0  ;;  %v431_v15 = vsel %vm851_vm10, %v425_v12, 0 }
  0xcb   : > { %v517_v17 = vsel %vm514_vm0, %v430_v13, %v504_v6  ;;  %v521_v19 = vsel %vm514_vm0, %v431_v15, %v505_v7 }
  0xcc   : > { %598 = vmatpush.bf16.msra.mxu1 %v517_v17  ;;  %624 = vmatpush.bf16.msra.mxu3 %v521_v19 }
  0xd0   : > { %v307_v22 = vpop.permute.xlu0 %306  ;;  %v269_v23 = vpop.permute.xlu1 %268 }
  0xd1   : > { %v309_v25 = vsel %vm308_vm12, %v305_v43, %v307_v22  ;;  %v273_v26 = vsel %vm272_vm9, %v269_v23, %v271_v21  ;;  %v278_v27 = vsel %vm272_vm9, 0, %v269_v23 }
  0xd2   : > { %611 = vmatpush.bf16.msra.mxu2 %v309_v25  ;;  %v302_v28 = vsel %vm878_vm5, %v278_v27, 0  ;;  %v303_v29 = vsel %vm851_vm10, %v273_v26, 0  ;;  %vm571_vm10 = vcmask 719872  }
  0xd3   : > { %586 = vmatpush.bf16.msra.mxu0 %v302_v28 }
  0xd6   : > { %612 = vmatpush.bf16.msra.mxu2 %v303_v29  ;;  %587 = vmatmul.bf16.vlgmr.msra.gmra.mxu0 %v568_v30 }
  0xd8   : > { %v403_v33 = vpop.permute.xlu0 %402  ;;  %v401_v34 = vpop.permute.xlu1 %400 }
  0xd9   : > { %v409_v35 = vsel %vm404_vm15, %v403_v33, 0  ;;  %613 = vmatmul.bf16.vlgmr.msra.gmra.mxu2 %v568_v30  ;;  %v405_v36 = vsel %vm404_vm15, %v401_v34, %v403_v33 }
  0xda   : > { %v411_v1 = vsel %vm886_vm6, %v405_v36, 0  ;;  %v412_v40 = vsel %vm862_vm14, %v409_v35, 0 }
  0xdb   : > { %599 = vmatpush.bf16.msra.mxu1 %v411_v1  ;;  %625 = vmatpush.bf16.msra.mxu3 %v412_v40 }
  0xde   : > { %715 = vmatmul.msk.bf16.vlgmr.msra.gmra.mxu1 %vm571_vm10, %v569_v14  ;;  %716 = vmatmul.msk.bf16.vlgmr.msra.gmra.mxu3 %vm571_vm10, %v569_v14 }
  0xf1   : > { %v563_v16 = vpop.permute.xlu2 %562 }
 0x153   : > { %v588_v37 = vpop.f32.mrf.mxu0 }
 0x154   : > { %v589_v38 = vadd.f32 %v588_v37, %v563_v16 }
 0x15b   : > { %v601_v39 = vpop.f32.mrf.mxu1  ;;  %v590_v41 = vpop.f32.mrf.mxu0 }
 0x15c   : > { %v614_v42 = vpop.f32.mrf.mxu2  ;;  %v602_v43 = vadd.f32 %v601_v39, %v589_v38 }
 0x15d   : > { %v615_v48 = vadd.f32 %v614_v42, %v563_v16 }
 0x15e   : > { %v631_v8 = vmax.f32 %v602_v43, 0.0 }
 0x160   : > { %633 = vst [vmem:[%s217_s13] sm:$0xff] %v631_v8 }
 0x161   : > { %v627_v44 = vpop.f32.mrf.mxu3 }
 0x162   : > { %v628_v45 = vadd.f32 %v627_v44, %v615_v48 }
 0x163   : > { %v603_v46 = vpop.f32.mrf.mxu1 }
 0x164   : > { %v632_v47 = vmax.f32 %v628_v45, 0.0  ;;  %v616_v49 = vpop.f32.mrf.mxu2 }
 0x166   : > { %634 = vst [vmem:[%s217_s13 + $0x8] sm:$0xff] %v632_v47 }
 0x169   : > { %v629_v50 = vpop.f32.mrf.mxu3 }
 0x16a PF: > { %s14_s15 = sadd.s32 1, %s747_s15  }
 0x16b   : > { %p11_p4 = scmp.ge.s32.totalorder %s14_s15, 4  }
 0x16d   :  { %13 = sbr.rel (!%p11_p4) target bundleno = 1 (0x1), region = 69 }

// kernel: _lambda_.17
= control target key start
LH: loop header
LB: loop body
LE: loop exit
PB: predicated region body
PF: predicated region fallthrough
CT: control target
= control target key end

     0   :  { %s808_s15 = smov 0   ;;  %s1027_s0 = inlined_call_operand.vmem [shape: f32[2,8,256], index: 0, kind: input, shape index: {}]   ;;  %s1028_s1 = inlined_call_operand.vmem [shape: f32[2,8,256], index: 1, kind: input, shape index: {}]   ;;  %s1029_s2 = inlined_call_operand.vmem [shape: bf16[8,144], index: 2, kind: input, shape index: {}]   ;;  %s1030_s3 = inlined_call_operand.vmem [shape: f32[8,1], index: 3, kind: input, shape index: {}]   ;;  %s1031_s4 = inlined_call_operand.vmem [shape: f32[2,8,256], index: 4, kind: output, shape index: {}]  }
   0x1 LB: > { %s729_s16 = sadd.s32 4294967295, %s772_s15   ;;  %p733_p0 = scmp.ge.s32.totalorder %s772_s15, 1  ;;  %s772_s15 = sphi %s808_s15, %s14_s15  }
   0x2   : > { %p172_p1 = scmp.lt.s32.totalorder %s772_s15, 3 }
   0x4   : > { %p173_p2 = pnand %p733_p0, %p172_p1 }
   0x5   : > { %p203_p3 = scmp.lt.s32.totalorder (!%p173_p2), %s729_s16, 1  ;;  %s774_s21 = smov (!%p173_p2), 113  }
   0x6   : > { %176 = sbr.rel (%p173_p2) target bundleno = 358 (0x166), region = 36  ;;  %s775_s22 = smov (!%p173_p2), 1  }
   0x7   : > { %s776_s23 = smov (!%p173_p2), 127   ;;  %s777_s24 = smov (!%p173_p2), 15  }
   0x8   : > { %s778_s28 = smov (!%p173_p2), 16   ;;  %s779_s29 = smov (!%p173_p2), 17  }
   0x9   : > { %s780_s30 = smov (!%p173_p2), 112   ;;  %s781_s5 = smov (!%p173_p2), 111  }
   0xb   : > { %s1041_s16 = smov (!%p203_p3, %s729_s16), 1  ;;  %v782_v14 = vmov 0   ;;  %v223_v15 = vlaneseq  ;;  %vm372_vm6 = vcmask 924672   ;;  %vm359_vm12 = vcmask 1039360  }
   0xc   : > { %s816_s17 = sshll.u32 %s1041_s16, 4  ;;  %764 = vset.pattern.permute.xlu2 %v782_v14  ;;  %765 = vset.pattern.permute.xlu0 %v782_v14  ;;  %v284_v26 = vunpack.c.l.b16 %v782_v14  ;;  %v285_v27 = vunpack.c.h.b16 %v782_v14 }
   0xd   : > { %s212_s20 = scalar_lea.vmem %s1028_s1, %s816_s17  ;;  %s207_s27 = scalar_lea.vmem %s1027_s0, %s816_s17  ;;  %v224_v16 = vand.u32 127, %v223_v15 }
   0xe   : > { %v403_v0 = vld [vmem:[%s212_s20] sm:$0xff]  ;;  %v404_v1 = vld [vmem:[%s212_s20 + $0x8] sm:$0xff]  ;;  %s217_s12 = scalar_lea.vmem %s1031_s4, %s816_s17 }
   0xf   : > { %v405_v2 = vpack.c.bf16 %v404_v1, %v403_v0  ;;  %v254_v7 = vld [vmem:[%s207_s27] sm:$0xff]  ;;  %v255_v8 = vld [vmem:[%s207_s27 + $0x8] sm:$0xff]  ;;  %v225_v17 = vadd.s32 128, %v224_v16  ;;  %v230_v19 = vand.u32 15, %v224_v16 }
  0x10   : > { %v256_v9 = vpack.c.bf16 %v255_v8, %v254_v7 }
  0x11   : > { %v408_v3 = vunpack.c.h.b16 %v405_v2  ;;  %v407_v4 = vunpack.c.l.b16 %v405_v2  ;;  %v237_v20 = vand.u32 15, %v225_v17  ;;  %vm250_vm0 = vcmp.ge.s32.totalorder %v230_v19, 1 }
  0x12   : > { %v259_v10 = vunpack.c.h.b16 %v256_v9  ;;  %v258_v12 = vunpack.c.l.b16 %v256_v9  ;;  %vm252_vm3 = vcmp.lt.s32.totalorder %v230_v19, 15 }
  0x13   : > { %v822_v5 = vpack.c.b16 %v408_v3, %v408_v3  ;;  %v824_v6 = vpack.c.b16 %v407_v4, %v407_v4  ;;  %vm251_vm1 = vcmp.ge.s32.totalorder %v237_v20, 1  ;;  %vm253_vm4 = vcmp.lt.s32.totalorder %v237_v20, 15 }
  0x14   : > { %v850_v11 = vpack.c.b16 %v259_v10, %v259_v10  ;;  %v856_v13 = vpack.c.b16 %v258_v12, %v258_v12  ;;  %vm278_vm2 = vmpackc.low %vm251_vm1, %vm250_vm0  ;;  %vm346_vm0 = vcmask 7168   ;;  %vm517_vm1 = vcmask 1043456  }
  0x15   : > { %464 = vrot.lane.b32.xlu0 %v822_v5, %s774_s21  ;;  %440 = vrot.lane.b32.xlu1 %v824_v6, %s775_s22  ;;  %v279_v22 = vsel %vm278_vm2, 65537, %v782_v14  ;;  %vm322_vm5 = vmpackc.low %vm253_vm4, %vm252_vm3  ;;  %vm311_vm3 = vcmask 121856  }
  0x16   : > { %462 = vrot.lane.b32.xlu2 %v824_v6, %s774_s21  ;;  %v281_v23 = vperm.slane %v279_v22, 4  ;;  %v323_v24 = vsel %vm322_vm5, 65537, %v782_v14  ;;  %v280_v31 = vperm.slane %v279_v22, 0 }
  0x17   : > { %v325_v30 = vperm.slane %v323_v24, 4  ;;  %v324_v41 = vperm.slane %v323_v24, 0 }
  0x18   : > { %v289_v28 = vunpack.c.l.b16 %v281_v23  ;;  %v290_v29 = vunpack.c.h.b16 %v281_v23  ;;  %v282_v39 = vunpack.c.l.b16 %v280_v31  ;;  %v283_v40 = vunpack.c.h.b16 %v280_v31 }
  0x19   : > { %v333_v34 = vunpack.c.l.b16 %v325_v30  ;;  %v334_v35 = vunpack.c.h.b16 %v325_v30  ;;  %v326_v50 = vunpack.c.l.b16 %v324_v41  ;;  %v327_v51 = vunpack.c.h.b16 %v324_v41 }
  0x1a   : > { %vm293_vm7 = vcmp.ne.s32.totalorder %v289_v28, %v284_v26  ;;  %vm294_vm8 = vcmp.ne.s32.totalorder %v290_v29, %v285_v27  ;;  %vm286_vm14 = vcmp.ne.s32.totalorder %v282_v39, %v284_v26  ;;  %vm287_vm15 = vcmp.ne.s32.totalorder %v283_v40, %v285_v27 }
  0x1b   : > { %vm886_vm9 = vmpackc.low %vm294_vm8, %vm293_vm7  ;;  %vm337_vm10 = vcmp.ne.s32.totalorder %v333_v34, %v284_v26  ;;  %vm338_vm11 = vcmp.ne.s32.totalorder %v334_v35, %v285_v27  ;;  %vm330_vm4 = vcmp.ne.s32.totalorder %v326_v50, %v284_v26  ;;  %vm331_vm5 = vcmp.ne.s32.totalorder %v327_v51, %v285_v27 }
  0x1c   : > { %vm893_vm13 = vmpackc.low %vm338_vm11, %vm337_vm10  ;;  %vm302_vm8 = vcmask 130048   ;;  %vm266_vm10 = vcmask 138240   ;;  %vm385_vm11 = vcmask 916480  }
  0x1d   : > { %453 = vrot.lane.b32.xlu0 %v822_v5, %s776_s23  ;;  %442 = vrot.lane.b32.xlu1 %v822_v5, %s775_s22  ;;  %vm903_vm2 = vmpackc.low %vm287_vm15, %vm286_vm14  ;;  %vm394_vm14 = vcmask 908288  }
  0x1e   : > { %429 = vrot.lane.b32.xlu2 %v824_v6, %s777_s24  ;;  %vm915_vm7 = vmpackc.low %vm331_vm5, %vm330_vm4 }
  0x25   : > { %431 = vrot.lane.b32.xlu0 %v822_v5, %s777_s24  ;;  %451 = vrot.lane.b32.xlu1 %v824_v6, %s776_s23 }
  0x26   : > { %422 = vrot.lane.b32.xlu2 %v824_v6, %s778_s28 }
  0x2d   : > { %424 = vrot.lane.b32.xlu0 %v822_v5, %s778_s28  ;;  %411 = vrot.lane.b32.xlu1 %v824_v6, %s779_s29 }
  0x2e   : > { %413 = vrot.lane.b32.xlu2 %v822_v5, %s779_s29 }
  0x35   : > { %383 = vrot.lane.b32.xlu1 %v850_v11, %s780_s30  ;;  %392 = vrot.lane.b32.xlu0 %v850_v11, %s781_s5 }
  0x36   : > { %370 = vrot.lane.b32.xlu2 %v850_v11, %s774_s21 }
  0x3d   : > { %357 = vrot.lane.b32.xlu0 %v850_v11, %s776_s23  ;;  %390 = vrot.lane.b32.xlu1 %v856_v13, %s781_s5 }
  0x3e   : > { %381 = vrot.lane.b32.xlu2 %v856_v13, %s780_s30 }
  0x45   : > { %342 = vrot.lane.b32.xlu0 %v856_v13, %s775_s22  ;;  %344 = vrot.lane.b32.xlu1 %v850_v11, %s775_s22 }
  0x46   : > { %368 = vrot.lane.b32.xlu2 %v856_v13, %s774_s21 }
  0x4d   : > { %307 = vrot.lane.b32.xlu0 %v856_v13, %s777_s24  ;;  %309 = vrot.lane.b32.xlu1 %v850_v11, %s777_s24 }
  0x4e   : > { %355 = vrot.lane.b32.xlu2 %v856_v13, %s776_s23 }
  0x55   : > { %482 = vrot.lane.b32.xlu0 %v822_v5, %s781_s5  ;;  %298 = vrot.lane.b32.xlu1 %v856_v13, %s778_s28 }
  0x56   : > { %300 = vrot.lane.b32.xlu2 %v850_v11, %s778_s28 }
  0x5d   : > { %262 = vrot.lane.b32.xlu0 %v856_v13, %s779_s29  ;;  %264 = vrot.lane.b32.xlu1 %v850_v11, %s779_s29 }
  0x5e   : > { %475 = vrot.lane.b32.xlu2 %v822_v5, %s780_s30 }
  0x65   : > { %480 = vrot.lane.b32.xlu0 %v824_v6, %s781_s5  ;;  %473 = vrot.lane.b32.xlu1 %v824_v6, %s780_s30 }
  0x70   : > { %v463_v18 = vpop.permute.xlu2 %462 }
  0x78   : > { %v882_v21 = vpop.permute.xlu2 %429 }
  0x79   : > { %v436_v62 = vsel %vm311_vm3, 0, %v882_v21 }
  0x7a   : > { %v438_v7 = vsel %vm915_vm7, %v436_v62, 0 }
  0x7b   : > { %v511_v10 = vrot.slane %v438_v7, 4 }
  0x80   : > { %v884_v25 = vpop.permute.xlu2 %422 }
  0x81   : > { %v428_v14 = vsel %vm302_vm8, 0, %v884_v25 }
  0x87   : > { %v465_v32 = vpop.permute.xlu0 %464  ;;  %v441_v33 = vpop.permute.xlu1 %440 }
  0x88   : > { %v414_v36 = vpop.permute.xlu2 %413  ;;  %v469_v38 = vsel %vm372_vm6, %v465_v32, 0  ;;  %v466_v54 = vsel %vm372_vm6, %v463_v18, %v465_v32  ;;  %v447_v0 = vsel %vm346_vm0, 0, %v441_v33 }
  0x89   : > { %v472_v42 = vsel %vm886_vm9, %v469_v38, 0  ;;  %v471_v57 = vsel %vm903_vm2, %v466_v54, 0  ;;  %v449_v8 = vsel %vm903_vm2, %v447_v0, 0 }
  0x8a   : > { %v516_v46 = vrot.slane %v472_v42, 4  ;;  %v515_v63 = vrot.slane %v471_v57, 4  ;;  %v567_v12 = vsel %vm517_vm1, %v449_v8, %v824_v6 }
  0x8f   : > { %v454_v44 = vpop.permute.xlu0 %453  ;;  %v443_v45 = vpop.permute.xlu1 %442 }
  0x90   : > { %v458_v47 = vsel %vm359_vm12, %v454_v44, 0  ;;  %v444_v48 = vsel %vm346_vm0, %v441_v33, %v443_v45  ;;  %v899_v49 = vpop.permute.xlu2 %370 }
  0x91   : > { %v461_v52 = vsel %vm893_vm13, %v458_v47, 0  ;;  %v450_v56 = vsel %vm886_vm9, %v444_v48, 0  ;;  %v377_v23 = vsel %vm372_vm6, %v899_v49, 0 }
  0x92   : > { %v579_v55 = vsel %vm517_vm1, %v461_v52, %v516_v46  ;;  %v571_v58 = vsel %vm517_vm1, %v450_v56, %v822_v5  ;;  %v380_v31 = vsel %vm886_vm9, %v377_v23, 0 }
  0x93   : > { %632 = vmatpush.bf16.msra.mxu2 %v579_v55 }
  0x97   : > { %v432_v59 = vpop.permute.xlu0 %431  ;;  %633 = vmatpush.bf16.msra.mxu2 %v571_v58  ;;  %v452_v60 = vpop.permute.xlu1 %451 }
  0x98   : > { %v455_v1 = vsel %vm359_vm12, %v452_v60, %v454_v44  ;;  %v433_v2 = vsel %vm311_vm3, %v882_v21, %v432_v59  ;;  %v382_v4 = vpop.permute.xlu2 %381  ;;  %v559_v21 = vsel %vm517_vm1, %v428_v14, %v511_v10 }
  0x99   : > { %v460_v3 = vsel %vm915_vm7, %v455_v1, 0  ;;  %v439_v9 = vsel %vm893_vm13, %v433_v2, 0 }
  0x9a   : > { %v575_v5 = vsel %vm517_vm1, %v460_v3, %v515_v63  ;;  %v512_v15 = vrot.slane %v439_v9, 4 }
  0x9b   : > { %606 = vmatpush.bf16.msra.mxu0 %v575_v5 }
  0x9f   : > { %v425_v16 = vpop.permute.xlu0 %424  ;;  %607 = vmatpush.bf16.msra.mxu0 %v567_v12  ;;  %v412_v17 = vpop.permute.xlu1 %411 }
  0xa0   : > { %v426_v18 = vsel %vm302_vm8, %v884_v25, %v425_v16  ;;  %v415_v20 = vsel %vm266_vm10, %v412_v17, %v414_v36  ;;  %v369_v6 = vpop.permute.xlu2 %368  ;;  %v418_v32 = vsel %vm266_vm10, 0, %v412_v17 }
  0xa1   : > { %v563_v19 = vsel %vm517_vm1, %v426_v18, %v512_v15  ;;  %v421_v22 = vsel %vm886_vm9, %v415_v20, 0  ;;  %v420_v35 = vsel %vm903_vm2, %v418_v32, 0  ;;  %v373_v39 = vsel %vm372_vm6, %v369_v6, %v899_v49  ;;  %v221_v15 = vld [vmem:[%s1029_s2] sm:$0xff] }
  0xa2   : > { %634 = vmatpush.bf16.msra.mxu2 %v563_v19  ;;  %v508_v25 = vrot.slane %v421_v22, 4  ;;  %v507_v42 = vrot.slane %v420_v35, 4  ;;  %v379_v54 = vsel %vm903_vm2, %v373_v39, 0  ;;  %v599_v20 = vunpack.c.h.b16 %v221_v15 }
  0xa3   : > { %608 = vmatpush.bf16.msra.mxu0 %v559_v21 }
  0xa7   : > { %v384_v24 = vpop.permute.xlu1 %383  ;;  %v393_v26 = vpop.permute.xlu0 %392 }
  0xa8   : > { %v389_v27 = vsel %vm385_vm11, %v384_v24, 0  ;;  %v399_v28 = vsel %vm394_vm14, %v393_v26, 0  ;;  %v356_v36 = vpop.permute.xlu2 %355  ;;  %v386_v38 = vsel %vm385_vm11, %v382_v4, %v384_v24  ;;  %v601_v24 = vpack.c.b16 %v599_v20, %v599_v20 }
  0xa9   : > { %v504_v29 = vrot.slane %v389_v27, 4  ;;  %v402_v30 = vsel %vm893_vm13, %v399_v28, 0  ;;  %v503_v50 = vrot.slane %v386_v38, 4  ;;  %v598_v27 = vunpack.c.l.b16 %v221_v15 }
  0xaa   : > { %v556_v33 = vsel %vm517_vm1, %v402_v30, %v508_v25 }
  0xab   : > { %635 = vmatpush.bf16.msra.mxu2 %v556_v33  ;;  %v548_v34 = vsel %vm517_vm1, %v380_v31, %v504_v29  ;;  %v544_v57 = vsel %vm517_vm1, %v379_v54, %v503_v50  ;;  %v600_v38 = vpack.c.b16 %v598_v27, %v598_v27 }
  0xaf   : > { %636 = vmatpush.bf16.msra.mxu2 %v548_v34  ;;  %v358_v40 = vpop.permute.xlu0 %357  ;;  %v391_v41 = vpop.permute.xlu1 %390 }
  0xb0   : > { %v364_v44 = vsel %vm359_vm12, %v358_v40, 0  ;;  %v360_v45 = vsel %vm359_vm12, %v356_v36, %v358_v40  ;;  %v395_v46 = vsel %vm394_vm14, %v391_v41, %v393_v26  ;;  %v301_v0 = vpop.permute.xlu2 %300 }
  0xb1   : > { %v367_v47 = vsel %vm893_vm13, %v364_v44, 0  ;;  %v401_v48 = vsel %vm915_vm7, %v395_v46, 0  ;;  %v366_v52 = vsel %vm915_vm7, %v360_v45, 0 }
  0xb2   : > { %v501_v51 = vrot.slane %v367_v47, 4  ;;  %v552_v49 = vsel %vm517_vm1, %v401_v48, %v507_v42  ;;  %v500_v56 = vrot.slane %v366_v52, 4 }
  0xb3   : > { %609 = vmatpush.bf16.msra.mxu0 %v552_v49 }
  0xb4   : > { %v540_v55 = vsel %vm517_vm1, %v850_v11, %v501_v51  ;;  %v536_v63 = vsel %vm517_vm1, %v856_v13, %v500_v56  ;;  %v222_v13 = vld [vmem:[%s1030_s3] sm:$0xff] }
  0xb5   : > { %637 = vmatpush.bf16.msra.mxu2 %v540_v55  ;;  %594 = vperm.xlu2 %764, %v222_v13  }
  0xb7   : > { %v343_v58 = vpop.permute.xlu0 %342  ;;  %610 = vmatpush.bf16.msra.mxu0 %v544_v57  ;;  %v345_v59 = vpop.permute.xlu1 %344 }
  0xb8   : > { %v351_v60 = vsel %vm346_vm0, 0, %v343_v58  ;;  %v347_v62 = vsel %vm346_vm0, %v343_v58, %v345_v59  ;;  %v476_v16 = vpop.permute.xlu2 %475 }
  0xb9   : > { %v353_v1 = vsel %vm903_vm2, %v351_v60, 0  ;;  %v354_v11 = vsel %vm886_vm9, %v347_v62, 0  ;;  %v479_v6 = vsel %vm385_vm11, %v476_v16, 0 }
  0xba   : > { %v496_v4 = vrot.slane %v353_v1, 4  ;;  %v497_v5 = vrot.slane %v354_v11, 4 }
  0xbb   : > { %611 = vmatpush.bf16.msra.mxu0 %v536_v63 }
  0xbf   : > { %v308_v2 = vpop.permute.xlu0 %307  ;;  %v310_v3 = vpop.permute.xlu1 %309 }
  0xc0   : > { %v316_v7 = vsel %vm311_vm3, 0, %v308_v2  ;;  %v312_v8 = vsel %vm311_vm3, %v308_v2, %v310_v3 }
  0xc1   : > { %v340_v9 = vsel %vm915_vm7, %v316_v7, 0  ;;  %v341_v10 = vsel %vm893_vm13, %v312_v8, 0 }
  0xc2   : > { %v528_v12 = vsel %vm517_vm1, %v340_v9, %v496_v4  ;;  %v532_v14 = vsel %vm517_vm1, %v341_v10, %v497_v5 }
  0xc3   : > { %612 = vmatpush.bf16.msra.mxu0 %v528_v12  ;;  %638 = vmatpush.bf16.msra.mxu2 %v532_v14 }
  0xc7   : > { %v483_v17 = vpop.permute.xlu0 %482  ;;  %v299_v18 = vpop.permute.xlu1 %298 }
  0xc8   : > { %v487_v19 = vsel %vm394_vm14, %v483_v17, 0  ;;  %v303_v26 = vsel %vm302_vm8, %v299_v18, %v301_v0  ;;  %v306_v25 = vsel %vm302_vm8, 0, %v299_v18 }
  0xc9   : > { %v490_v21 = vsel %vm893_vm13, %v487_v19, 0  ;;  %v492_v30 = vrot.slane %v306_v25, 4  ;;  %v493_v31 = vrot.slane %v303_v26, 4 }
  0xca   : > { %v584_v22 = vrot.slane %v490_v21, 4 }
  0xcc   : > { %v590_v23 = vsel %vm517_vm1, %v479_v6, %v584_v22 }
  0xcd   : > { %652 = vmatpush.bf16.msra.mxu3 %v590_v23 }
  0xcf   : > { %v263_v28 = vpop.permute.xlu0 %262  ;;  %v265_v29 = vpop.permute.xlu1 %264 }
  0xd0   : > { %v272_v32 = vsel %vm266_vm10, 0, %v263_v28  ;;  %v267_v43 = vsel %vm266_vm10, %v263_v28, %v265_v29  ;;  %741 = vmatmul.msk.bf16.vlgmr.msra.gmra.mxu3 %vm302_vm8, %v601_v24 }
  0xd1   : > { %v296_v33 = vsel %vm903_vm2, %v272_v32, 0  ;;  %v297_v34 = vsel %vm886_vm9, %v267_v43, 0 }
  0xd2   : > { %v520_v35 = vsel %vm517_vm1, %v296_v33, %v492_v30  ;;  %v524_v36 = vsel %vm517_vm1, %v297_v34, %v493_v31 }
  0xd3   : > { %613 = vmatpush.bf16.msra.mxu0 %v520_v35  ;;  %639 = vmatpush.bf16.msra.mxu2 %v524_v36 }
  0xd6   : > { %640 = vmatmul.bf16.vlgmr.msra.gmra.mxu2 %v600_v38  ;;  %614 = vmatmul.bf16.vlgmr.msra.gmra.mxu0 %v600_v38 }
  0xd7   : > { %v481_v39 = vpop.permute.xlu0 %480  ;;  %v474_v41 = vpop.permute.xlu1 %473 }
  0xd8   : > { %v484_v40 = vsel %vm394_vm14, %v481_v39, %v483_v17  ;;  %v477_v37 = vsel %vm385_vm11, %v474_v41, %v476_v16 }
  0xd9   : > { %v489_v53 = vsel %vm915_vm7, %v484_v40, 0 }
  0xda   : > { %v583_v42 = vrot.slane %v489_v53, 4 }
  0xdc   : > { %v587_v44 = vsel %vm517_vm1, %v477_v37, %v583_v42 }
  0xdd   : > { %626 = vmatpush.bf16.msra.mxu1 %v587_v44 }
  0xe0   : > { %740 = vmatmul.msk.bf16.vlgmr.msra.gmra.mxu1 %vm302_vm8, %v601_v24 }
 0x10f   : > { %v595_v47 = vpop.permute.xlu2 %594 }
 0x153   : > { %v615_v45 = vpop.f32.mrf.mxu0  ;;  %v654_v46 = vpop.f32.mrf.mxu3 }
 0x154   : > { %v616_v50 = vadd.f32 %v615_v45, %v595_v47 }
 0x159   : > { %v641_v48 = vpop.f32.mrf.mxu2 }
 0x15a   : > { %v642_v51 = vadd.f32 %v641_v48, %v595_v47 }
 0x15b   : > { %v617_v49 = vpop.f32.mrf.mxu0  ;;  %v656_v52 = vpop.f32.mrf.mxu3 }
 0x15c   : > { %v655_v54 = vadd.f32 %v654_v46, %v642_v51 }
 0x15d   : > { %v628_v61 = vpop.f32.mrf.mxu1 }
 0x15e   : > { %v659_v55 = vmax.f32 %v655_v54, 0.0  ;;  %v629_v56 = vadd.f32 %v628_v61, %v616_v50 }
 0x160   : > { %v658_v57 = vmax.f32 %v629_v56, 0.0  ;;  %661 = vst [vmem:[%s217_s12 + $0x8] sm:$0xff] %v659_v55 }
 0x161   : > { %v643_v58 = vpop.f32.mrf.mxu2 }
 0x162   : > { %660 = vst [vmem:[%s217_s12] sm:$0xff] %v658_v57 }
 0x165   : > { %v630_v59 = vpop.f32.mrf.mxu1 }
 0x166 PF: > { %s14_s15 = sadd.s32 1, %s772_s15  }
 0x167   : > { %p11_p4 = scmp.ge.s32.totalorder %s14_s15, 4  }
 0x169   :  { %13 = sbr.rel (!%p11_p4) target bundleno = 1 (0x1), region = 69 }

// kernel: _lambda_.18
= control target key start
LH: loop header
LB: loop body
LE: loop exit
PB: predicated region body
PF: predicated region fallthrough
CT: control target
= control target key end

     0   :  { %s493_s18 = smov 0   ;;  %s532_s0 = inlined_call_operand.vmem [shape: f32[2,8,256], index: 0, kind: input, shape index: {}]   ;;  %s533_s1 = inlined_call_operand.vmem [shape: f32[2,8,256], index: 1, kind: input, shape index: {}]   ;;  %s534_s2 = inlined_call_operand.vmem [shape: f32[2,8,256], index: 2, kind: input, shape index: {}]   ;;  %s535_s3 = inlined_call_operand.vmem [shape: bf16[8,24], index: 3, kind: input, shape index: {}]   ;;  %s536_s4 = inlined_call_operand.vmem [shape: f32[8,1], index: 4, kind: input, shape index: {}]   ;;  %s537_s5 = inlined_call_operand.vmem [shape: f32[2,8,256], index: 5, kind: output, shape index: {}]  }
   0x1 LB: > { %s423_s19 = sadd.s32 4294967295, %s460_s18   ;;  %p427_p0 = scmp.ge.s32.totalorder %s460_s18, 1  ;;  %s460_s18 = sphi %s493_s18, %s15_s18  }
   0x2   : > { %p207_p1 = scmp.lt.s32.totalorder %s460_s18, 3 }
   0x4   : > { %p208_p2 = pnand %p427_p0, %p207_p1 }
   0x5   : > { %p245_p3 = scmp.lt.s32.totalorder (!%p208_p2), %s423_s19, 1 }
   0x6   : > { %211 = sbr.rel (%p208_p2) target bundleno = 163 (0xa3), region = 40 }
   0xb   : > { %v462_v0 = vmov 0   ;;  %v267_v1 = vld [vmem:[%s536_s4] sm:$0xff]  ;;  %s539_s19 = smov (!%p245_p3, %s423_s19), 1  ;;  %vm292_vm0 = vcmask 1043456   ;;  %vm306_vm1 = vcmask 195584  }
   0xc   : > { %453 = vset.pattern.permute.xlu0 %v462_v0  ;;  %s504_s22 = sshll.u32 %s539_s19, 4  ;;  %v266_v27 = vld [vmem:[%s535_s3] sm:$0xf] }
   0xd   : > { %303 = vperm.xlu0 %453, %v267_v1   ;;  %s259_s25 = scalar_lea.vmem %s534_s2, %s504_s22  ;;  %s249_s28 = scalar_lea.vmem %s532_s0, %s504_s22 }
   0xe   : > { %v274_v2 = vld [vmem:[%s259_s25] sm:$0xff]  ;;  %v275_v3 = vld [vmem:[%s259_s25 + $0x8] sm:$0xff]  ;;  %s254_s6 = scalar_lea.vmem %s533_s1, %s504_s22  ;;  %s264_s11 = scalar_lea.vmem %s537_s5, %s504_s22 }
   0xf   : > { %v268_v4 = vld [vmem:[%s249_s28] sm:$0xff]  ;;  %v276_v5 = vpack.c.bf16 %v275_v3, %v274_v2  ;;  %v269_v6 = vld [vmem:[%s249_s28 + $0x8] sm:$0xff] }
  0x10   : > { %v271_v7 = vld [vmem:[%s254_s6] sm:$0xff]  ;;  %v272_v8 = vld [vmem:[%s254_s6 + $0x8] sm:$0xff]  ;;  %v270_v9 = vpack.c.bf16 %v269_v6, %v268_v4 }
  0x11   : > { %v273_v10 = vpack.c.bf16 %v272_v8, %v271_v7  ;;  %v288_v11 = vunpack.c.l.b16 %v276_v5  ;;  %v289_v12 = vunpack.c.h.b16 %v276_v5 }
  0x12   : > { %v278_v13 = vunpack.c.l.b16 %v270_v9  ;;  %v279_v15 = vunpack.c.h.b16 %v270_v9 }
  0x13   : > { %v283_v14 = vunpack.c.l.b16 %v273_v10  ;;  %v284_v16 = vunpack.c.h.b16 %v273_v10  ;;  %v290_v17 = vpack.c.b16 %v288_v11, %v288_v11  ;;  %v291_v18 = vpack.c.b16 %v289_v12, %v289_v12 }
  0x14   : > { %v280_v19 = vpack.c.b16 %v278_v13, %v278_v13  ;;  %v281_v21 = vpack.c.b16 %v279_v15, %v279_v15 }
  0x15   : > { %v285_v20 = vpack.c.b16 %v283_v14, %v283_v14  ;;  %v286_v22 = vpack.c.b16 %v284_v16, %v284_v16  ;;  %v311_v23 = vsel %vm292_vm0, %v290_v17, 0  ;;  %v314_v24 = vsel %vm292_vm0, %v291_v18, 0 }
  0x16   : > { %322 = vmatpush.bf16.msra.mxu0 %v311_v23  ;;  %335 = vmatpush.bf16.msra.mxu1 %v314_v24 }
  0x17   : > { %v295_v25 = vsel %vm292_vm0, %v280_v19, %v285_v20  ;;  %v299_v26 = vsel %vm292_vm0, %v281_v21, %v286_v22 }
  0x1a   : > { %323 = vmatpush.bf16.msra.mxu0 %v295_v25  ;;  %336 = vmatpush.bf16.msra.mxu1 %v299_v26 }
  0x1d   : > { %436 = vmatmul.msk.bf16.vlgmr.msra.gmra.mxu0 %vm306_vm1, %v266_v27  ;;  %437 = vmatmul.msk.bf16.vlgmr.msra.gmra.mxu1 %vm306_vm1, %v266_v27 }
  0x7f   : > { %v304_v28 = vpop.permute.xlu0 %303 }
  0x9a   : > { %v325_v29 = vpop.f32.mrf.mxu0  ;;  %v338_v30 = vpop.f32.mrf.mxu1 }
  0x9b   : > { %v326_v31 = vadd.f32 %v325_v29, %v304_v28  ;;  %v339_v32 = vadd.f32 %v338_v30, %v304_v28 }
  0x9d   : > { %342 = vst [vmem:[%s264_s11] sm:$0xff] %v326_v31 }
  0x9e   : > { %343 = vst [vmem:[%s264_s11 + $0x8] sm:$0xff] %v339_v32 }
  0xa2   : > { %v327_v33 = vpop.f32.mrf.mxu0  ;;  %v340_v34 = vpop.f32.mrf.mxu1 }
  0xa3 PF: > { %s15_s18 = sadd.s32 1, %s460_s18  }
  0xa4   : > { %p12_p4 = scmp.ge.s32.totalorder %s15_s18, 4  }
  0xa6   :  { %14 = sbr.rel (!%p12_p4) target bundleno = 1 (0x1), region = 76 }

// kernel: _lambda_.19
= control target key start
LH: loop header
LB: loop body
LE: loop exit
PB: predicated region body
PF: predicated region fallthrough
CT: control target
= control target key end

     0   :  { %s433_s15 = smov 0   ;;  %s466_s0 = inlined_call_operand.vmem [shape: f32[2,8,256], index: 0, kind: input, shape index: {}]   ;;  %s467_s1 = inlined_call_operand.vmem [shape: f32[2,8,256], index: 1, kind: input, shape index: {}]   ;;  %s468_s2 = inlined_call_operand.vmem [shape: bf16[16,16], index: 2, kind: input, shape index: {}]   ;;  %s469_s3 = inlined_call_operand.vmem [shape: f32[16,1], index: 3, kind: input, shape index: {}]   ;;  %s470_s4 = inlined_call_operand.vmem [shape: f32[2,16,256], index: 4, kind: output, shape index: {}]  }
   0x1 LB: > { %s366_s16 = sadd.s32 4294967295, %s405_s15   ;;  %p370_p0 = scmp.ge.s32.totalorder %s405_s15, 1  ;;  %s405_s15 = sphi %s433_s15, %s14_s15  }
   0x2   : > { %p172_p1 = scmp.lt.s32.totalorder %s405_s15, 3 }
   0x4   : > { %p173_p2 = pnand %p370_p0, %p172_p1 }
   0x5   : > { %p203_p3 = scmp.lt.s32.totalorder (!%p173_p2), %s366_s16, 1 }
   0x6   : > { %176 = sbr.rel (%p173_p2) target bundleno = 164 (0xa4), region = 36 }
   0xb   : > { %v221_v0 = vld [vmem:[%s469_s3] sm:$0xff]  ;;  %v407_v1 = vmov 0   ;;  %s472_s16 = smov (!%p203_p3, %s366_s16), 1  ;;  %v222_v7 = vld [vmem:[%s469_s3 + $0x8] sm:$0xff]  ;;  %vm239_vm0 = vcmask 1043456   ;;  %vm263_vm1 = vcmask 130048  }
   0xc   : > { %398 = vset.pattern.permute.xlu0 %v407_v1  ;;  %s385_s19 = sshll.u32 %s472_s16, 4  ;;  %v388_v19 = vld [vmem:[%s468_s2] sm:$0xff]  ;;  %s387_s30 = sshll.u32 %s472_s16, 5 }
   0xd   : > { %250 = vperm.xlu0 %398, %v221_v0   ;;  %s207_s22 = scalar_lea.vmem %s466_s0, %s385_s19  ;;  %s212_s25 = scalar_lea.vmem %s467_s1, %s385_s19 }
   0xe   : > { %v223_v2 = vld [vmem:[%s207_s22] sm:$0xff]  ;;  %v224_v3 = vld [vmem:[%s207_s22 + $0x8] sm:$0xff]  ;;  %s217_s7 = scalar_lea.vmem %s470_s4, %s387_s30 }
   0xf   : > { %v226_v4 = vld [vmem:[%s212_s25] sm:$0xff]  ;;  %v225_v5 = vpack.c.bf16 %v224_v3, %v223_v2  ;;  %v227_v6 = vld [vmem:[%s212_s25 + $0x8] sm:$0xff] }
  0x10   : > { %v228_v8 = vpack.c.bf16 %v227_v6, %v226_v4 }
  0x11   : > { %v230_v9 = vunpack.c.l.b16 %v225_v5  ;;  %v231_v10 = vunpack.c.h.b16 %v225_v5 }
  0x12   : > { %v235_v11 = vunpack.c.l.b16 %v228_v8  ;;  %v236_v12 = vunpack.c.h.b16 %v228_v8 }
  0x13   : > { %v232_v13 = vpack.c.b16 %v230_v9, %v230_v9  ;;  %v233_v14 = vpack.c.b16 %v231_v10, %v231_v10 }
  0x14   : > { %v237_v15 = vpack.c.b16 %v235_v11, %v235_v11  ;;  %v238_v16 = vpack.c.b16 %v236_v12, %v236_v12 }
  0x15   : > { %255 = vperm.xlu0 %398, %v222_v7  }
  0x16   : > { %v242_v17 = vsel %vm239_vm0, %v232_v13, %v237_v15  ;;  %v246_v18 = vsel %vm239_vm0, %v233_v14, %v238_v16 }
  0x17   : > { %274 = vmatpush.bf16.msra.mxu0 %v242_v17  ;;  %288 = vmatpush.bf16.msra.mxu1 %v246_v18 }
  0x1a   : > { %381 = vmatmul.msk.bf16.vlgmr.msra.gmra.mxu0 %vm263_vm1, %v388_v19  ;;  %382 = vmatmul.msk.bf16.vlgmr.msra.gmra.mxu1 %vm263_vm1, %v388_v19 }
  0x7f   : > { %v251_v20 = vpop.permute.xlu0 %250 }
  0x87   : > { %v256_v25 = vpop.permute.xlu0 %255 }
  0x97   : > { %v276_v21 = vpop.f32.mrf.mxu0  ;;  %v290_v22 = vpop.f32.mrf.mxu1 }
  0x98   : > { %v277_v23 = vadd.f32 %v276_v21, %v251_v20  ;;  %v291_v24 = vadd.f32 %v290_v22, %v251_v20 }
  0x9a   : > { %295 = vst [vmem:[%s217_s7] sm:$0xff] %v277_v23 }
  0x9b   : > { %296 = vst [vmem:[%s217_s7 + $0x8] sm:$0xff] %v291_v24 }
  0x9f   : > { %v278_v26 = vpop.f32.mrf.mxu0  ;;  %v292_v27 = vpop.f32.mrf.mxu1 }
  0xa0   : > { %v279_v28 = vadd.f32 %v278_v26, %v256_v25  ;;  %v293_v29 = vadd.f32 %v292_v27, %v256_v25 }
  0xa2   : > { %297 = vst [vmem:[%s217_s7 + $0x10] sm:$0xff] %v279_v28 }
  0xa3   : > { %298 = vst [vmem:[%s217_s7 + $0x18] sm:$0xff] %v293_v29 }
  0xa4 PF: > { %s14_s15 = sadd.s32 1, %s405_s15  }
  0xa5   : > { %p11_p4 = scmp.ge.s32.totalorder %s14_s15, 4  }
  0xa7   :  { %13 = sbr.rel (!%p11_p4) target bundleno = 1 (0x1), region = 69 }

// kernel: _lambda_.20
= control target key start
LH: loop header
LB: loop body
LE: loop exit
PB: predicated region body
PF: predicated region fallthrough
CT: control target
= control target key end

     0   :  { %s666_s15 = smov 0   ;;  %s791_s0 = inlined_call_operand.vmem [shape: f32[2,16,256], index: 0, kind: input, shape index: {}]   ;;  %s792_s1 = inlined_call_operand.vmem [shape: bf16[16,144], index: 1, kind: input, shape index: {}]   ;;  %s793_s2 = inlined_call_operand.vmem [shape: f32[16,1], index: 2, kind: input, shape index: {}]   ;;  %s794_s3 = inlined_call_operand.vmem [shape: f32[2,16,256], index: 3, kind: input, shape index: {}]   ;;  %s795_s4 = inlined_call_operand.vmem [shape: f32[2,16,256], index: 4, kind: output, shape index: {}]  }
   0x1 LB: > { %s574_s16 = sadd.s32 4294967295, %s630_s15   ;;  %p578_p0 = scmp.ge.s32.totalorder %s630_s15, 1  ;;  %s630_s15 = sphi %s666_s15, %s14_s15  }
   0x2   : > { %p172_p1 = scmp.lt.s32.totalorder %s630_s15, 3 }
   0x4   : > { %p173_p2 = pnand %p578_p0, %p172_p1 }
   0x5   : > { %p203_p3 = scmp.lt.s32.totalorder (!%p173_p2), %s574_s16, 1  ;;  %s632_s21 = smov (!%p173_p2), 112  }
   0x6   : > { %176 = sbr.rel (%p173_p2) target bundleno = 322 (0x142), region = 36  ;;  %s633_s22 = smov (!%p173_p2), 113  }
   0x7   : > { %s634_s23 = smov (!%p173_p2), 127   ;;  %s635_s24 = smov (!%p173_p2), 1  }
   0x8   : > { %s636_s25 = smov (!%p173_p2), 15   ;;  %s637_s26 = smov (!%p173_p2), 16  }
   0x9   : > { %s638_s27 = smov (!%p173_p2), 17   ;;  %s639_s28 = smov (!%p173_p2), 111  }
   0xb   : > { %s805_s16 = smov (!%p203_p3, %s574_s16), 1  ;;  %v225_v12 = vlaneseq  ;;  %v640_v13 = vmov 0   ;;  %vm395_vm6 = vcmask 916480   ;;  %vm382_vm12 = vcmask 924672   ;;  %v602_v49 = vld [vmem:[%s792_s1 + $0x4] sm:$0xf] }
   0xc   : > { %s674_s17 = sshll.u32 %s805_s16, 5  ;;  %621 = vset.pattern.permute.xlu1 %v640_v13  ;;  %622 = vset.pattern.permute.xlu2 %v640_v13  ;;  %v292_v28 = vunpack.c.l.b16 %v640_v13  ;;  %v293_v29 = vunpack.c.h.b16 %v640_v13  ;;  %v589_v50 = vld [vmem:[%s792_s1 + $0x8] sm:$0xf0]  ;;  %v223_v62 = vld [vmem:[%s793_s2] sm:$0xff] }
   0xd   : > { %s207_s20 = scalar_lea.vmem %s791_s0, %s674_s17  ;;  %623 = vset.pattern.permute.xlu0 %v640_v13  ;;  %v226_v14 = vand.u32 127, %v225_v12  ;;  %v592_v59 = vor.u32 %v602_v49, %v589_v50  ;;  %v224_v63 = vld [vmem:[%s793_s2 + $0x8] sm:$0xff]  ;;  %s212_s19 = scalar_lea.vmem %s794_s3, %s674_s17 }
   0xe   : > { %v256_v0 = vld [vmem:[%s207_s20] sm:$0xff]  ;;  %v257_v1 = vld [vmem:[%s207_s20 + $0x8] sm:$0xff]  ;;  %v258_v2 = vld [vmem:[%s207_s20 + $0x10] sm:$0xff] }
   0xf   : > { %v259_v3 = vld [vmem:[%s207_s20 + $0x18] sm:$0xff]  ;;  %v260_v4 = vpack.c.bf16 %v257_v1, %v256_v0  ;;  %v227_v16 = vadd.s32 128, %v226_v14  ;;  %v232_v17 = vand.u32 15, %v226_v14  ;;  %v603_v14 = vld [vmem:[%s792_s1 + $0x4] sm:$0xf0] }
  0x10   : > { %v261_v5 = vpack.c.bf16 %v259_v3, %v258_v2 }
  0x11   : > { %v265_v6 = vunpack.c.h.b16 %v260_v4  ;;  %v264_v7 = vunpack.c.l.b16 %v260_v4  ;;  %v239_v18 = vand.u32 15, %v227_v16  ;;  %vm252_vm0 = vcmp.ge.s32.totalorder %v232_v17, 1 }
  0x12   : > { %v267_v8 = vunpack.c.h.b16 %v261_v5  ;;  %v266_v9 = vunpack.c.l.b16 %v261_v5  ;;  %vm254_vm3 = vcmp.lt.s32.totalorder %v232_v17, 15 }
  0x13   : > { %vm253_vm1 = vcmp.ge.s32.totalorder %v239_v18, 1  ;;  %vm255_vm4 = vcmp.lt.s32.totalorder %v239_v18, 15 }
  0x14   : > { %v680_v10 = vpack.c.b16 %v267_v8, %v265_v6  ;;  %v682_v11 = vpack.c.b16 %v266_v9, %v264_v7  ;;  %vm286_vm2 = vmpackc.low %vm253_vm1, %vm252_vm0  ;;  %vm369_vm0 = vcmask 1039360  }
  0x15   : > { %v287_v20 = vsel %vm286_vm2, 65537, %v640_v13  ;;  %vm332_vm5 = vmpackc.low %vm255_vm4, %vm254_vm3  ;;  %vm406_vm3 = vcmask 908288  }
  0x16   : > { %393 = vrot.lane.b32.xlu0 %v680_v10, %s632_s21  ;;  %391 = vrot.lane.b32.xlu1 %v682_v11, %s632_s21  ;;  %v288_v22 = vperm.slane %v287_v20, 0  ;;  %v333_v23 = vsel %vm332_vm5, 65537, %v640_v13  ;;  %v289_v24 = vperm.slane %v287_v20, 4  ;;  %v587_v13 = vld [vmem:[%s792_s1] sm:$0xf] }
  0x17   : > { %378 = vrot.lane.b32.xlu2 %v682_v11, %s633_s22  ;;  %v334_v25 = vperm.slane %v333_v23, 0  ;;  %v335_v34 = vperm.slane %v333_v23, 4 }
  0x18   : > { %v290_v26 = vunpack.c.l.b16 %v288_v22  ;;  %v291_v27 = vunpack.c.h.b16 %v288_v22  ;;  %v297_v32 = vunpack.c.l.b16 %v289_v24  ;;  %v298_v33 = vunpack.c.h.b16 %v289_v24 }
  0x19   : > { %v336_v38 = vunpack.c.l.b16 %v334_v25  ;;  %v337_v39 = vunpack.c.h.b16 %v334_v25  ;;  %v343_v40 = vunpack.c.l.b16 %v335_v34  ;;  %v344_v41 = vunpack.c.h.b16 %v335_v34 }
  0x1a   : > { %vm294_vm7 = vcmp.ne.s32.totalorder %v290_v26, %v292_v28  ;;  %vm295_vm8 = vcmp.ne.s32.totalorder %v291_v27, %v293_v29  ;;  %vm301_vm9 = vcmp.ne.s32.totalorder %v297_v32, %v292_v28  ;;  %vm302_vm10 = vcmp.ne.s32.totalorder %v298_v33, %v293_v29  ;;  %v495_v33 = vld [vmem:[%s212_s19] sm:$0xff] }
  0x1b   : > { %vm704_vm11 = vmpackc.low %vm295_vm8, %vm294_vm7  ;;  %vm340_vm14 = vcmp.ne.s32.totalorder %v336_v38, %v292_v28  ;;  %vm341_vm15 = vcmp.ne.s32.totalorder %v337_v39, %v293_v29  ;;  %vm347_vm1 = vcmp.ne.s32.totalorder %v343_v40, %v292_v28  ;;  %vm348_vm2 = vcmp.ne.s32.totalorder %v344_v41, %v293_v29 }
  0x1c   : > { %vm708_vm13 = vmpackc.low %vm302_vm10, %vm301_vm9  ;;  %vm356_vm7 = vcmask 7168   ;;  %vm321_vm8 = vcmask 121856   ;;  %vm274_vm10 = vcmask 138240  }
  0x1d   : > { %vm725_vm4 = vmpackc.low %vm341_vm15, %vm340_vm14 }
  0x1e   : > { %380 = vrot.lane.b32.xlu0 %v680_v10, %s633_s22  ;;  %367 = vrot.lane.b32.xlu1 %v680_v10, %s634_s23  ;;  %vm730_vm5 = vmpackc.low %vm348_vm2, %vm347_vm1  ;;  %s217_s22 = scalar_lea.vmem %s795_s4, %s674_s17 }
  0x1f   : > { %365 = vrot.lane.b32.xlu2 %v682_v11, %s634_s23 }
  0x26   : > { %352 = vrot.lane.b32.xlu0 %v682_v11, %s635_s24  ;;  %354 = vrot.lane.b32.xlu1 %v680_v10, %s635_s24 }
  0x27   : > { %317 = vrot.lane.b32.xlu2 %v682_v11, %s636_s25 }
  0x2e   : > { %319 = vrot.lane.b32.xlu0 %v680_v10, %s636_s25  ;;  %306 = vrot.lane.b32.xlu1 %v682_v11, %s637_s26 }
  0x2f   : > { %308 = vrot.lane.b32.xlu2 %v680_v10, %s637_s26 }
  0x36   : > { %270 = vrot.lane.b32.xlu0 %v682_v11, %s638_s27  ;;  %272 = vrot.lane.b32.xlu1 %v680_v10, %s638_s27 }
  0x37   : > { %404 = vrot.lane.b32.xlu2 %v680_v10, %s639_s28 }
  0x3e   : > { %402 = vrot.lane.b32.xlu0 %v682_v11, %s639_s28  ;;  %419 = vperm.xlu1 %621, %v223_v62  }
  0x3f   : > { %424 = vperm.xlu2 %622, %v224_v63  }
  0x71   : > { %v379_v15 = vpop.permute.xlu2 %378 }
  0x79   : > { %v366_v19 = vpop.permute.xlu2 %365 }
  0x81   : > { %v700_v21 = vpop.permute.xlu2 %317 }
  0x82   : > { %v326_v6 = vsel %vm321_vm8, 0, %v700_v21 }
  0x88   : > { %v394_v30 = vpop.permute.xlu0 %393  ;;  %v392_v31 = vpop.permute.xlu1 %391 }
  0x89   : > { %v400_v35 = vsel %vm395_vm6, %v394_v30, 0  ;;  %v396_v36 = vsel %vm395_vm6, %v392_v31, %v394_v30  ;;  %v702_v37 = vpop.permute.xlu2 %308  ;;  %vm310_vm6 = vcmask 130048   ;;  %v496_v31 = vld [vmem:[%s212_s19 + $0x8] sm:$0xff] }
  0x8a   : > { %467 = vmatpush.bf16.msra.mxu2 %v400_v35  ;;  %439 = vmatpush.bf16.msra.mxu0 %v396_v36  ;;  %vm593_vm9 = vmneg %vm310_vm6 }
  0x90   : > { %v381_v44 = vpop.permute.xlu0 %380  ;;  %v368_v45 = vpop.permute.xlu1 %367 }
  0x91   : > { %v383_v46 = vsel %vm382_vm12, %v379_v15, %v381_v44  ;;  %v387_v47 = vsel %vm382_vm12, %v381_v44, 0  ;;  %v712_v48 = vpop.permute.xlu2 %404  ;;  %v370_v54 = vsel %vm369_vm0, %v366_v19, %v368_v45  ;;  %v374_v56 = vsel %vm369_vm0, %v368_v45, 0  ;;  %v498_v44 = vld [vmem:[%s212_s19 + $0x18] sm:$0xff] }
  0x92   : > { %v389_v51 = vsel %vm704_vm11, %v383_v46, 0  ;;  %v390_v52 = vsel %vm708_vm13, %v387_v47, 0  ;;  %v411_v57 = vsel %vm406_vm3, %v712_v48, 0  ;;  %v376_v60 = vsel %vm725_vm4, %v370_v54, 0  ;;  %v497_v46 = vld [vmem:[%s212_s19 + $0x10] sm:$0xff] }
  0x93   : > { %440 = vmatpush.bf16.msra.mxu0 %v389_v51  ;;  %468 = vmatpush.bf16.msra.mxu2 %v390_v52  ;;  %v414_v58 = vsel %vm730_vm5, %v411_v57, 0  ;;  %v377_v61 = vsel %vm730_vm5, %v374_v56, 0 }
  0x94   : > { %488 = vmatpush.bf16.msra.mxu3 %v414_v58 }
  0x97   : > { %441 = vmatpush.bf16.msra.mxu0 %v376_v60  ;;  %469 = vmatpush.bf16.msra.mxu2 %v377_v61 }
  0x98   : > { %v353_v0 = vpop.permute.xlu0 %352  ;;  %v355_v1 = vpop.permute.xlu1 %354  ;;  %596 = vmatmul.msk.bf16.vlgmr.msra.gmra.mxu3 %vm310_vm6, %v592_v59 }
  0x99   : > { %v361_v2 = vsel %vm356_vm7, 0, %v353_v0  ;;  %v357_v3 = vsel %vm356_vm7, %v353_v0, %v355_v1  ;;  %v425_v38 = vpop.permute.xlu2 %424 }
  0x9a   : > { %v363_v4 = vsel %vm704_vm11, %v361_v2, 0  ;;  %v364_v5 = vsel %vm708_vm13, %v357_v3, 0 }
  0x9b   : > { %442 = vmatpush.bf16.msra.mxu0 %v682_v11  ;;  %470 = vmatpush.bf16.msra.mxu2 %v680_v10  ;;  %v350_v10 = vsel %vm725_vm4, %v326_v6, 0 }
  0x9f   : > { %443 = vmatpush.bf16.msra.mxu0 %v363_v4  ;;  %471 = vmatpush.bf16.msra.mxu2 %v364_v5 }
  0xa0   : > { %v320_v7 = vpop.permute.xlu0 %319  ;;  %v307_v8 = vpop.permute.xlu1 %306 }
  0xa1   : > { %v322_v9 = vsel %vm321_vm8, %v700_v21, %v320_v7  ;;  %v311_v12 = vsel %vm310_vm6, %v307_v8, %v702_v37  ;;  %v588_v21 = vor.u32 %v603_v14, %v587_v13 }
  0xa2   : > { %v351_v11 = vsel %vm730_vm5, %v322_v9, 0 }
  0xa3   : > { %444 = vmatpush.bf16.msra.mxu0 %v350_v10  ;;  %472 = vmatpush.bf16.msra.mxu2 %v351_v11 }
  0xa7   : > { %594 = vmatpush.bf16.msk.msra.mxu0 %vm593_vm9, %v307_v8  ;;  %473 = vmatpush.bf16.msra.mxu2 %v311_v12 }
  0xa8   : > { %v271_v15 = vpop.permute.xlu0 %270  ;;  %v273_v16 = vpop.permute.xlu1 %272 }
  0xa9   : > { %v280_v17 = vsel %vm274_vm10, 0, %v271_v15  ;;  %v275_v18 = vsel %vm274_vm10, %v271_v15, %v273_v16 }
  0xaa   : > { %v304_v19 = vsel %vm704_vm11, %v280_v17, 0  ;;  %v305_v20 = vsel %vm708_vm13, %v275_v18, 0 }
  0xab   : > { %446 = vmatpush.bf16.msra.mxu0 %v304_v19  ;;  %474 = vmatpush.bf16.msra.mxu2 %v305_v20 }
  0xae   : > { %447 = vmatmul.bf16.vlgmr.msra.gmra.mxu0 %v588_v21  ;;  %475 = vmatmul.bf16.vlgmr.msra.gmra.mxu2 %v588_v21 }
  0xb0   : > { %v403_v22 = vpop.permute.xlu0 %402  ;;  %v420_v26 = vpop.permute.xlu1 %419 }
  0xb1   : > { %v407_v23 = vsel %vm406_vm3, %v403_v22, %v712_v48 }
  0xb2   : > { %v413_v24 = vsel %vm725_vm4, %v407_v23, 0 }
  0xb3   : > { %460 = vmatpush.bf16.msra.mxu1 %v413_v24 }
  0xb6   : > { %595 = vmatmul.msk.bf16.vlgmr.msra.gmra.mxu1 %vm310_vm6, %v592_v59 }
 0x11b   : > { %v490_v28 = vpop.f32.mrf.mxu3 }
 0x123   : > { %v492_v43 = vpop.f32.mrf.mxu3 }
 0x12b   : > { %v448_v25 = vpop.f32.mrf.mxu0 }
 0x12c   : > { %v449_v27 = vadd.f32 %v448_v25, %v420_v26 }
 0x131   : > { %v476_v29 = vpop.f32.mrf.mxu2 }
 0x132   : > { %v477_v30 = vadd.f32 %v476_v29, %v420_v26 }
 0x133   : > { %v462_v32 = vpop.f32.mrf.mxu1  ;;  %v450_v39 = vpop.f32.mrf.mxu0 }
 0x134   : > { %v491_v34 = vadd.f32 %v490_v28, %v477_v30  ;;  %v463_v35 = vadd.f32 %v462_v32, %v449_v27  ;;  %v451_v41 = vadd.f32 %v450_v39, %v425_v38 }
 0x136   : > { %v500_v36 = vadd.f32 %v496_v31, %v491_v34  ;;  %v499_v37 = vadd.f32 %v495_v33, %v463_v35 }
 0x138   : > { %504 = vst [vmem:[%s217_s22 + $0x8] sm:$0xff] %v500_v36 }
 0x139   : > { %503 = vst [vmem:[%s217_s22] sm:$0xff] %v499_v37  ;;  %v478_v40 = vpop.f32.mrf.mxu2 }
 0x13a   : > { %v479_v42 = vadd.f32 %v478_v40, %v425_v38 }
 0x13b   : > { %v464_v45 = vpop.f32.mrf.mxu1 }
 0x13c   : > { %v493_v47 = vadd.f32 %v492_v43, %v479_v42  ;;  %v465_v48 = vadd.f32 %v464_v45, %v451_v41 }
 0x13e   : > { %v502_v49 = vadd.f32 %v498_v44, %v493_v47  ;;  %v501_v50 = vadd.f32 %v497_v46, %v465_v48 }
 0x140   : > { %506 = vst [vmem:[%s217_s22 + $0x18] sm:$0xff] %v502_v49 }
 0x141   : > { %505 = vst [vmem:[%s217_s22 + $0x10] sm:$0xff] %v501_v50 }
 0x142 PF: > { %s14_s15 = sadd.s32 1, %s630_s15  }
 0x143   : > { %p11_p4 = scmp.ge.s32.totalorder %s14_s15, 4  }
 0x145   :  { %13 = sbr.rel (!%p11_p4) target bundleno = 1 (0x1), region = 69 }

// kernel: _lambda_.21
= control target key start
LH: loop header
LB: loop body
LE: loop exit
PB: predicated region body
PF: predicated region fallthrough
CT: control target
= control target key end

     0   :  { %s641_s17 = smov 0   ;;  %s755_s0 = inlined_call_operand.vmem [shape: f32[2,16,256], index: 0, kind: input, shape index: {}]   ;;  %s756_s1 = inlined_call_operand.vmem [shape: bf16[1,144], index: 1, kind: input, shape index: {}]   ;;  %s757_s2 = inlined_call_operand.<no memory space> [shape: f32[1,1], index: 2, kind: input, shape index: {}]   ;;  %s758_s3 = inlined_call_operand.vmem [shape: f32[2,1,256], index: 3, kind: input, shape index: {}]   ;;  %s759_s4 = inlined_call_operand.vmem [shape: f32[2,1,256], index: 4, kind: output, shape index: {}]  }
   0x1   :  { %v9_v0 = vstv %s757_s2 }
   0x2   :  { %10 = vst [vmem:[#allocation2] sm:$0x1] %v9_v0 }
   0x3 LB: > { %s561_s18 = sadd.s32 4294967295, %s602_s17   ;;  %p565_p0 = scmp.ge.s32.totalorder %s602_s17, 1  ;;  %s602_s17 = sphi %s641_s17, %s16_s17  }
   0x4   : > { %p173_p1 = scmp.lt.s32.totalorder %s602_s17, 3 }
   0x6   : > { %p174_p2 = pnand %p565_p0, %p173_p1 }
   0x7   : > { %p202_p3 = scmp.lt.s32.totalorder (!%p174_p2), %s561_s18, 1  ;;  %s604_s22 = smov (!%p174_p2), 127  }
   0x8   : > { %177 = sbr.rel (%p174_p2) target bundleno = 318 (0x13e), region = 36  ;;  %s605_s23 = smov (!%p174_p2), 112  }
   0x9   : > { %s606_s24 = smov (!%p174_p2), 113   ;;  %s607_s25 = smov (!%p174_p2), 1  }
   0xa   : > { %s608_s26 = smov (!%p174_p2), 15   ;;  %s609_s27 = smov (!%p174_p2), 16  }
   0xb   : > { %s610_s28 = smov (!%p174_p2), 17   ;;  %s611_s29 = smov (!%p174_p2), 111  }
   0xd   : > { %s769_s18 = smov (!%p202_p3, %s561_s18), 1  ;;  %v612_v13 = vmov 0   ;;  %v220_v14 = vlaneseq  ;;  %v218_v21 = vld [vmem:[%s756_s1] sm:$0x3]  ;;  %vm390_vm6 = vcmask 916480   ;;  %vm377_vm9 = vcmask 924672  }
   0xe   : > { %s576_s2 = sshll.u32 %s769_s18, 5  ;;  %594 = vset.pattern.permute.xlu1 %v612_v13  ;;  %595 = vset.pattern.permute.xlu0 %v612_v13  ;;  %419 = vst [vmem:[#allocation1] ss:$9 sm:$0xff] %v218_v21  ;;  %v287_v34 = vunpack.c.l.b16 %v612_v13  ;;  %v288_v35 = vunpack.c.h.b16 %v612_v13  ;;  %vm401_vm15 = vcmask 908288   ;;  %v219_v59 = vld [vmem:[#allocation2] sm:$0x1] }
   0xf   : > { %s206_s21 = scalar_lea.vmem %s755_s0, %s576_s2  ;;  %v221_v16 = vand.u32 127, %v220_v14  ;;  %s568_s6 = sshll.u32 %s769_s18, 1 }
  0x10   : > { %v251_v1 = vld [vmem:[%s206_s21] sm:$0xff]  ;;  %v252_v2 = vld [vmem:[%s206_s21 + $0x8] sm:$0xff]  ;;  %v253_v3 = vld [vmem:[%s206_s21 + $0x10] sm:$0xff]  ;;  %s210_s9 = scalar_lea.vmem %s758_s3, %s568_s6  ;;  %s214_s12 = scalar_lea.vmem %s759_s4, %s568_s6 }
  0x11   : > { %v254_v4 = vld [vmem:[%s206_s21 + $0x18] sm:$0xff]  ;;  %v255_v5 = vpack.c.bf16 %v252_v2, %v251_v1  ;;  %v222_v17 = vadd.s32 128, %v221_v16  ;;  %v227_v19 = vand.u32 15, %v221_v16 }
  0x12   : > { %v256_v6 = vpack.c.bf16 %v254_v4, %v253_v3 }
  0x13   : > { %v260_v7 = vunpack.c.h.b16 %v255_v5  ;;  %v259_v8 = vunpack.c.l.b16 %v255_v5  ;;  %v234_v20 = vand.u32 15, %v222_v17  ;;  %vm247_vm0 = vcmp.ge.s32.totalorder %v227_v19, 1 }
  0x14   : > { %v262_v9 = vunpack.c.h.b16 %v256_v6  ;;  %v261_v10 = vunpack.c.l.b16 %v256_v6  ;;  %vm249_vm2 = vcmp.lt.s32.totalorder %v227_v19, 15 }
  0x15   : > { %vm248_vm1 = vcmp.ge.s32.totalorder %v234_v20, 1  ;;  %vm250_vm3 = vcmp.lt.s32.totalorder %v234_v20, 15  ;;  %v421_v56 = vld [vmem:[#allocation1 + $0x9] sm:$0xff]  ;;  %v420_v17 = vld [vmem:[#allocation1] sm:$0xff] }
  0x16   : > { %v655_v11 = vpack.c.b16 %v262_v9, %v260_v7  ;;  %v657_v12 = vpack.c.b16 %v261_v10, %v259_v8  ;;  %vm281_vm4 = vmpackc.low %vm248_vm1, %vm247_vm0  ;;  %vm364_vm0 = vcmask 1039360  }
  0x17   : > { %vm327_vm5 = vmpackc.low %vm250_vm3, %vm249_vm2  ;;  %v282_v23 = vsel %vm281_vm4, 65537, %v612_v13 }
  0x18   : > { %362 = vrot.lane.b32.xlu1 %v655_v11, %s604_s22  ;;  %388 = vrot.lane.b32.xlu0 %v655_v11, %s605_s23  ;;  %v328_v24 = vsel %vm327_vm5, 65537, %v612_v13  ;;  %v284_v25 = vperm.slane %v282_v23, 4  ;;  %v283_v27 = vperm.slane %v282_v23, 0  ;;  %vm305_vm5 = vcmask 130048  }
  0x19   : > { %373 = vrot.lane.b32.xlu2 %v657_v12, %s606_s24  ;;  %v330_v26 = vperm.slane %v328_v24, 4  ;;  %v329_v40 = vperm.slane %v328_v24, 0 }
  0x1a   : > { %v292_v30 = vunpack.c.l.b16 %v284_v25  ;;  %v293_v31 = vunpack.c.h.b16 %v284_v25  ;;  %v285_v38 = vunpack.c.l.b16 %v283_v27  ;;  %v286_v39 = vunpack.c.h.b16 %v283_v27 }
  0x1b   : > { %v338_v36 = vunpack.c.l.b16 %v330_v26  ;;  %v339_v37 = vunpack.c.h.b16 %v330_v26  ;;  %v331_v44 = vunpack.c.l.b16 %v329_v40  ;;  %v332_v45 = vunpack.c.h.b16 %v329_v40 }
  0x1c   : > { %vm296_vm7 = vcmp.ne.s32.totalorder %v292_v30, %v287_v34  ;;  %vm297_vm8 = vcmp.ne.s32.totalorder %v293_v31, %v288_v35  ;;  %vm289_vm13 = vcmp.ne.s32.totalorder %v285_v38, %v287_v34  ;;  %vm290_vm14 = vcmp.ne.s32.totalorder %v286_v39, %v288_v35 }
  0x1d   : > { %vm342_vm10 = vcmp.ne.s32.totalorder %v338_v36, %v287_v34  ;;  %vm343_vm11 = vcmp.ne.s32.totalorder %v339_v37, %v288_v35  ;;  %vm686_vm12 = vmpackc.low %vm297_vm8, %vm296_vm7  ;;  %vm335_vm3 = vcmp.ne.s32.totalorder %v331_v44, %v287_v34  ;;  %vm336_vm4 = vcmp.ne.s32.totalorder %v332_v45, %v288_v35 }
  0x1e   : > { %vm692_vm1 = vmpackc.low %vm343_vm11, %vm342_vm10  ;;  %vm351_vm7 = vcmask 7168   ;;  %vm316_vm8 = vcmask 121856   ;;  %vm488_vm11 = vcmask 1040384  }
  0x1f   : > { %vm698_vm2 = vmpackc.low %vm290_vm14, %vm289_vm13 }
  0x20   : > { %375 = vrot.lane.b32.xlu0 %v655_v11, %s606_s24  ;;  %386 = vrot.lane.b32.xlu1 %v657_v12, %s605_s23  ;;  %vm570_vm10 = vmneg %vm305_vm5 }
  0x21   : > { %347 = vrot.lane.b32.xlu2 %v657_v12, %s607_s25 }
  0x28   : > { %349 = vrot.lane.b32.xlu0 %v655_v11, %s607_s25  ;;  %360 = vrot.lane.b32.xlu1 %v657_v12, %s604_s22 }
  0x29   : > { %312 = vrot.lane.b32.xlu2 %v657_v12, %s608_s26 }
  0x30   : > { %314 = vrot.lane.b32.xlu0 %v655_v11, %s608_s26  ;;  %301 = vrot.lane.b32.xlu1 %v657_v12, %s609_s27 }
  0x31   : > { %303 = vrot.lane.b32.xlu2 %v655_v11, %s609_s27 }
  0x38   : > { %265 = vrot.lane.b32.xlu0 %v657_v12, %s610_s28  ;;  %267 = vrot.lane.b32.xlu1 %v655_v11, %s610_s28 }
  0x39   : > { %399 = vrot.lane.b32.xlu2 %v655_v11, %s611_s29 }
  0x40   : > { %397 = vrot.lane.b32.xlu0 %v657_v12, %s611_s29  ;;  %414 = vperm.xlu1 %594, %v219_v59  }
  0x73   : > { %v374_v15 = vpop.permute.xlu2 %373 }
  0x7b   : > { %v676_v18 = vpop.permute.xlu2 %347 }
  0x7c   : > { %v356_v3 = vsel %vm351_vm7, 0, %v676_v18 }
  0x7d   : > { %v358_v7 = vsel %vm698_vm2, %v356_v3, 0 }
  0x83   : > { %v681_v22 = vpop.permute.xlu2 %312 }
  0x84   : > { %v321_v9 = vsel %vm316_vm8, 0, %v681_v22 }
  0x8a   : > { %v363_v28 = vpop.permute.xlu1 %362  ;;  %v389_v29 = vpop.permute.xlu0 %388 }
  0x8b   : > { %v395_v32 = vsel %vm390_vm6, %v389_v29, 0  ;;  %v684_v33 = vpop.permute.xlu2 %303  ;;  %v369_v54 = vsel %vm364_vm0, %v363_v28, 0 }
  0x8c   : > { %451 = vmatpush.bf16.msra.mxu2 %v395_v32  ;;  %v372_v58 = vsel %vm692_vm1, %v369_v54, 0 }
  0x92   : > { %v376_v42 = vpop.permute.xlu0 %375  ;;  %v387_v43 = vpop.permute.xlu1 %386 }
  0x93   : > { %v391_v46 = vsel %vm390_vm6, %v387_v43, %v389_v29  ;;  %v382_v47 = vsel %vm377_vm9, %v376_v42, 0  ;;  %v400_v49 = vpop.permute.xlu2 %399  ;;  %v378_v52 = vsel %vm377_vm9, %v374_v15, %v376_v42  ;;  %vm711_vm6 = vmpackc.low %vm336_vm4, %vm335_vm3  ;;  %vm269_vm9 = vcmask 138240  }
  0x94   : > { %425 = vmatpush.bf16.msra.mxu0 %v391_v46  ;;  %v385_v50 = vsel %vm686_vm12, %v382_v47, 0  ;;  %v406_v53 = vsel %vm401_vm15, %v400_v49, 0  ;;  %v384_v57 = vsel %vm698_vm2, %v378_v52, 0  ;;  %v345_v10 = vsel %vm711_vm6, %v321_v9, 0 }
  0x95   : > { %452 = vmatpush.bf16.msra.mxu2 %v385_v50  ;;  %v409_v55 = vsel %vm692_vm1, %v406_v53, 0 }
  0x96   : > { %471 = vmatpush.bf16.msra.mxu3 %v409_v55 }
  0x98   : > { %426 = vmatpush.bf16.msra.mxu0 %v384_v57 }
  0x99   : > { %453 = vmatpush.bf16.msra.mxu2 %v372_v58  ;;  %573 = vmatmul.msk.bf16.vlgmr.msra.gmra.mxu3 %vm305_vm5, %v421_v56 }
  0x9a   : > { %v350_v61 = vpop.permute.xlu0 %349  ;;  %v361_v62 = vpop.permute.xlu1 %360 }
  0x9b   : > { %v365_v63 = vsel %vm364_vm0, %v361_v62, %v363_v28  ;;  %v352_v1 = vsel %vm351_vm7, %v676_v18, %v350_v61  ;;  %v477_v28 = vld [vmem:[%s210_s9] sm:$0x3] }
  0x9c   : > { %v371_v0 = vsel %vm711_vm6, %v365_v63, 0  ;;  %v359_v2 = vsel %vm686_vm12, %v352_v1, 0  ;;  %v480_v32 = vperm.slane %v477_v28, 1  ;;  %v479_v36 = vperm.slane %v477_v28, 0 }
  0x9d   : > { %427 = vmatpush.bf16.msra.mxu0 %v371_v0  ;;  %454 = vmatpush.bf16.msra.mxu2 %v655_v11 }
  0xa1   : > { %428 = vmatpush.bf16.msra.mxu0 %v657_v12  ;;  %455 = vmatpush.bf16.msra.mxu2 %v359_v2 }
  0xa2   : > { %v315_v4 = vpop.permute.xlu0 %314  ;;  %v302_v5 = vpop.permute.xlu1 %301 }
  0xa3   : > { %v317_v6 = vsel %vm316_vm8, %v681_v22, %v315_v4  ;;  %v306_v11 = vsel %vm305_vm5, %v302_v5, %v684_v33 }
  0xa4   : > { %v346_v8 = vsel %vm692_vm1, %v317_v6, 0 }
  0xa5   : > { %429 = vmatpush.bf16.msra.mxu0 %v358_v7  ;;  %456 = vmatpush.bf16.msra.mxu2 %v346_v8 }
  0xa9   : > { %430 = vmatpush.bf16.msra.mxu0 %v345_v10  ;;  %457 = vmatpush.bf16.msra.mxu2 %v306_v11 }
  0xaa   : > { %v266_v12 = vpop.permute.xlu0 %265  ;;  %v268_v13 = vpop.permute.xlu1 %267 }
  0xab   : > { %v270_v15 = vsel %vm269_vm9, %v266_v12, %v268_v13  ;;  %v275_v18 = vsel %vm269_vm9, 0, %v266_v12 }
  0xac   : > { %v300_v16 = vsel %vm686_vm12, %v270_v15, 0  ;;  %v299_v19 = vsel %vm698_vm2, %v275_v18, 0  ;;  %vm493_vm12 = vcmp.lt.s32.totalorder %v220_v14, 256 }
  0xad   : > { %571 = vmatpush.bf16.msk.msra.mxu0 %vm570_vm10, %v302_v5  ;;  %458 = vmatpush.bf16.msra.mxu2 %v300_v16 }
  0xb0   : > { %459 = vmatmul.bf16.vlgmr.msra.gmra.mxu2 %v420_v17 }
  0xb1   : > { %432 = vmatpush.bf16.msra.mxu0 %v299_v19 }
  0xb2   : > { %v398_v20 = vpop.permute.xlu0 %397  ;;  %v415_v25 = vpop.permute.xlu1 %414 }
  0xb3   : > { %v402_v21 = vsel %vm401_vm15, %v398_v20, %v400_v49  ;;  %v417_v26 = vperm.slane %v415_v25, 0 }
  0xb4   : > { %433 = vmatmul.bf16.vlgmr.msra.gmra.mxu0 %v420_v17  ;;  %v408_v22 = vsel %vm711_vm6, %v402_v21, 0 }
  0xb5   : > { %445 = vmatpush.bf16.msra.mxu1 %v408_v22 }
  0xb8   : > { %572 = vmatmul.msk.bf16.vlgmr.msra.gmra.mxu1 %vm305_vm5, %v421_v56 }
 0x11c   : > { %v473_v23 = vpop.f32.mrf.mxu3 }
 0x124   : > { %v475_v24 = vpop.f32.mrf.mxu3 }
 0x131   : > { %v434_v27 = vpop.f32.mrf.mxu0 }
 0x132   : > { %v435_v29 = vadd.f32 %v434_v27, %v417_v26 }
 0x133   : > { %v460_v30 = vpop.f32.mrf.mxu2 }
 0x134   : > { %v461_v31 = vadd.f32 %v460_v30, %v417_v26 }
 0x135   : > { %v447_v33 = vpop.f32.mrf.mxu1 }
 0x136   : > { %v474_v34 = vadd.f32 %v473_v23, %v461_v31  ;;  %v448_v35 = vadd.f32 %v447_v33, %v435_v29 }
 0x138   : > { %v484_v37 = vadd.f32 %v480_v32, %v474_v34  ;;  %v483_v40 = vadd.f32 %v479_v36, %v448_v35 }
 0x139   : > { %v436_v38 = vpop.f32.mrf.mxu0 }
 0x13a   : > { %v487_v39 = vrot.slane %v484_v37, 7 }
 0x13b   : > { %v462_v41 = vpop.f32.mrf.mxu2 }
 0x13c   : > { %v489_v42 = vsel %vm488_vm11, %v483_v40, %v487_v39 }
 0x13d   : > { %495 = vst.msk [vmem:[%s214_s12] sm:$0x3] %vm493_vm12, %v489_v42  ;;  %v449_v43 = vpop.f32.mrf.mxu1 }
 0x13e PF: > { %s16_s17 = sadd.s32 1, %s602_s17  }
 0x13f   : > { %p13_p4 = scmp.ge.s32.totalorder %s16_s17, 4  }
 0x141   :  { %15 = sbr.rel (!%p13_p4) target bundleno = 3 (0x3), region = 69 }

</bundles_post_ra>
